<compile_context>
chip_gen: v5e
topology: v5e:2x2
jax: 0.10.0
libtpu: 0.0.40
codegen_flags: <defaults>
</compile_context>

<pallas_src>
import functools

import jax
import jax.numpy as jnp
from jax.experimental import pallas as pl
from jax.experimental.pallas import tpu as pltpu

C_PAD = 128  # lane-dense padded channel width used for every layer


# ----------------------------- Pallas kernel -------------------------------


def _fused_rgcn_kernel(x0_ref, a_ref, w_ref, bias_ref, out_ref, xw_ref, *,
                       num_layers, num_blocks, num_nodes, out_channels):
    """Fused RGCN forward (all layers + log_softmax), single TensorCore program.

    x0_ref:   [N, C]        padded input features (f32)
    a_ref:    [N, B*N]      lane-stacked adjacency (bf16):
                              blocks 0..E-1   mean-normalized A_e (dst rows)
                              blocks E..E+T-1 diag(node_type == t) root self-loops
    w_ref:    [L*B, C, C]   per-(layer, block) weights, zero padded (bf16);
                            relation weights followed by root weights per layer
    bias_ref: [L, N, C]     per-node root bias (= b_root[l, node_type[n]]) (f32)
    out_ref:  [N, C]        log_softmax output; padded lanes written as 0 (f32)
    xw_ref:   [B*N, C]      VMEM scratch for the per-block x @ W_b results (bf16)
    """
    n = num_nodes
    x = x0_ref[...]                                             # [N, C] f32

    for l in range(num_layers):
        # Single bf16 cast of the activation per layer, shared by every block dot.
        x_bf = x.astype(jnp.bfloat16)

        # ---- per-block weight dots (relation + root), written to VMEM scratch ----
        for b in range(num_blocks):
            xw = jnp.dot(x_bf, w_ref[l * num_blocks + b],
                         preferred_element_type=jnp.float32)
            xw_ref[b * n:(b + 1) * n, :] = xw.astype(jnp.bfloat16)

        # ---- single wide-K aggregation dot: acc = bias + A_wide @ XW ----
        #   sum_b A_b @ (x @ W_b) == sum_b (A_b @ x) @ W_b
        # (mean of a bias-free linear == linear of the mean); root blocks use
        # A_{E+t} = diag(node_type == t), reproducing the masked root path.
        acc = bias_ref[l] + jnp.dot(a_ref[...], xw_ref[...],
                                    preferred_element_type=jnp.float32)

        # ReLU between layers (dropout is eval-mode identity).
        x = jnp.maximum(acc, 0.0) if l != num_layers - 1 else acc

    # ---- masked log_softmax over the first `out_channels` lanes ----
    col = jax.lax.broadcasted_iota(jnp.int32, x.shape, 1)
    valid = col < out_channels
    xv = jnp.where(valid, x, -jnp.inf)
    m = jnp.max(xv, axis=-1, keepdims=True)
    p = jnp.exp(xv - m)                       # exp(-inf) == 0 on padded lanes
    lse = jnp.log(jnp.sum(p, axis=-1, keepdims=True))
    out_ref[...] = jnp.where(valid, x - m - lse, 0.0)


def rgcn_forward_fused(x0, a_wide_bf16, w_all_bf16, bias_all, *,
                       num_layers, num_blocks, out_channels):
    n, c = x0.shape
    assert c == C_PAD
    assert n % 8 == 0, "pad the number of subgraph nodes to a multiple of 8"

    kernel = functools.partial(
        _fused_rgcn_kernel,
        num_layers=num_layers,
        num_blocks=num_blocks,
        num_nodes=n,
        out_channels=out_channels,
    )

    flops = 2 * num_layers * (num_blocks * n * c * c          # per-block weight dots
                              + n * (num_blocks * n) * c)     # wide-K aggregation dot
    transcendentals = n * c + n                               # exp + log
    bytes_accessed = sum(int(a.size) * a.dtype.itemsize
                         for a in (x0, a_wide_bf16, w_all_bf16, bias_all))
    bytes_accessed += n * c * 4                               # output

    # Live VMEM = operands + output + xw scratch; add headroom, cap below the
    # v7x 64 MiB physical ceiling (v5e/v6e have 128 MiB so this is always safe).
    live_bytes = bytes_accessed + num_blocks * n * c * 2
    vmem_limit = int(min(max(2 * live_bytes + (8 << 20), 16 << 20), 48 << 20))

    # TODO(synk): for real GraphSAINT subgraph sizes (N >~ 1500 on v7x) add a
    # row-tiled BlockSpec for a_wide / a >=2 "parallel" grid axis; with all
    # layers fused in one program this needs cross-tile activation exchange.
    return pl.pallas_call(
        kernel,
        out_shape=jax.ShapeDtypeStruct((n, c), jnp.float32),
        in_specs=[pl.BlockSpec(memory_space=pltpu.MemorySpace.VMEM)] * 4,
        out_specs=pl.BlockSpec(memory_space=pltpu.MemorySpace.VMEM),
        scratch_shapes=[pltpu.VMEM((num_blocks * n, c), jnp.bfloat16)],
        compiler_params=pltpu.CompilerParams(vmem_limit_bytes=vmem_limit),
        cost_estimate=pl.CostEstimate(flops=flops,
                                      transcendentals=transcendentals,
                                      bytes_accessed=bytes_accessed),
    )(x0, a_wide_bf16, w_all_bf16, bias_all)


# ----------------------------- JAX glue / model -----------------------------


def _linear_params(key, fan_in, fan_out, with_bias):
    # PyTorch nn.Linear.reset_parameters: kaiming_uniform(a=sqrt(5)) on weight
    # -> bound = 1/sqrt(fan_in); bias uniform(-1/sqrt(fan_in), 1/sqrt(fan_in)).
    kw, kb = jax.random.split(key)
    bound = 1.0 / (fan_in ** 0.5)
    w = jax.random.uniform(kw, (fan_in, fan_out), jnp.float32, -bound, bound)
    b = (jax.random.uniform(kb, (fan_out,), jnp.float32, -bound, bound)
         if with_bias else jnp.zeros((fan_out,), jnp.float32))
    return w, b


def _pad2(w, rows, cols):
    out = jnp.zeros((rows, cols), jnp.float32)
    return out.at[:w.shape[0], :w.shape[1]].set(w)


def build_wide_adjacency(edge_index, edge_type, node_type, num_edge_types,
                         num_node_types, num_nodes):
    """[N, (E+T)*N]: E mean-normalized adjacency blocks + T node-type diag blocks.

    A_e[dst, src] counts type-e edges, row-normalized so A_e @ x == scatter-mean;
    the T trailing blocks are diag(node_type == t) for the root self-loop path.
    """
    src, dst = edge_index[0], edge_index[1]
    blocks = []
    for e in range(num_edge_types):
        w = (edge_type == e).astype(jnp.float32)
        a = jnp.zeros((num_nodes, num_nodes), jnp.float32).at[dst, src].add(w)
        deg = a.sum(axis=1, keepdims=True)
        blocks.append(a / jnp.maximum(deg, 1.0))
    eye = jnp.eye(num_nodes, dtype=jnp.float32)
    for t in range(num_node_types):
        blocks.append(eye * (node_type == t).astype(jnp.float32)[:, None])
    return jnp.concatenate(blocks, axis=1)                    # [N, (E+T)*N]


class RGCNPallas:
    def __init__(self, key, in_channels, hidden_channels, out_channels,
                 num_layers, dropout, num_nodes_dict, x_types, num_edge_types):
        assert in_channels <= C_PAD and hidden_channels <= C_PAD and out_channels <= C_PAD
        self.in_channels = in_channels
        self.out_channels = out_channels
        self.num_layers = num_layers
        self.dropout = dropout
        node_types = list(num_nodes_dict.keys())
        self.num_node_types = len(node_types)
        self.num_edge_types = num_edge_types
        self.num_blocks = num_edge_types + self.num_node_types

        key, ek = jax.random.split(key)
        # xavier_uniform embeddings for node types without input features.
        self.emb_dict = {}
        for nt in sorted(set(node_types).difference(set(x_types))):
            ek, sub = jax.random.split(ek)
            n_rows = num_nodes_dict[nt]
            bound = (6.0 / (n_rows + in_channels)) ** 0.5
            self.emb_dict[nt] = jax.random.uniform(
                sub, (n_rows, in_channels), jnp.float32, -bound, bound)

        dims = [in_channels] + [hidden_channels] * (num_layers - 1) + [out_channels]
        w_blocks, b_root_all = [], []
        for li in range(num_layers):
            cin, cout = dims[li], dims[li + 1]
            for _ in range(num_edge_types):                   # relation lins (no bias)
                key, sub = jax.random.split(key)
                w, _ = _linear_params(sub, cin, cout, with_bias=False)
                w_blocks.append(_pad2(w, C_PAD, C_PAD))
            layer_b = []
            for _ in range(self.num_node_types):              # root lins (with bias)
                key, sub = jax.random.split(key)
                w, b = _linear_params(sub, cin, cout, with_bias=True)
                w_blocks.append(_pad2(w, C_PAD, C_PAD))
                layer_b.append(jnp.zeros((C_PAD,), jnp.float32).at[:cout].set(b))
            b_root_all.append(jnp.stack(layer_b, axis=0))     # [T, C]

        self.w_all_f32 = jnp.stack(w_blocks, axis=0)          # [L*(E+T), C, C]
        self.w_all = self.w_all_f32.astype(jnp.bfloat16)
        self.b_root = jnp.stack(b_root_all, axis=0)           # [L, T, C] f32

    def group_input(self, x_dict, node_type, local_node_idx):
        n = node_type.shape[0]
        h = jnp.zeros((n, self.in_channels), jnp.float32)
        for nt, x in x_dict.items():
            mask = (node_type == nt)[:, None]
            h = jnp.where(mask, x[local_node_idx], h)
        for nt, emb in self.emb_dict.items():
            mask = (node_type == nt)[:, None]
            h = jnp.where(mask, emb[local_node_idx], h)
        return h

    def _prepare(self, x_dict, edge_index, edge_type, node_type, local_node_idx):
        n = node_type.shape[0]
        x = self.group_input(x_dict, node_type, local_node_idx)           # [N, Cin]
        x0 = jnp.zeros((n, C_PAD), jnp.float32).at[:, :self.in_channels].set(x)
        a_wide = build_wide_adjacency(edge_index, edge_type, node_type,
                                      self.num_edge_types, self.num_node_types, n)
        bias_all = self.b_root[:, node_type, :]                           # [L, N, C]
        return x0, a_wide, bias_all

    def forward(self, x_dict, edge_index, edge_type, node_type, local_node_idx):
        x0, a_wide, bias_all = self._prepare(
            x_dict, edge_index, edge_type, node_type, local_node_idx)
        # TODO(synk): training-mode dropout between layers not reproduced (eval-mode identity).
        out_pad = rgcn_forward_fused(
            x0, a_wide.astype(jnp.bfloat16), self.w_all, bias_all,
            num_layers=self.num_layers,
            num_blocks=self.num_blocks,
            out_channels=self.out_channels)
        return out_pad[:, :self.out_channels]

    def reference_forward(self, x_dict, edge_index, edge_type, node_type,
                          local_node_idx):
        """Pure-JAX f32 reference with identical semantics (for validation)."""
        x0, a_wide, bias_all = self._prepare(
            x_dict, edge_index, edge_type, node_type, local_node_idx)
        x = x0
        for l in range(self.num_layers):
            xw = jnp.concatenate(
                [x @ self.w_all_f32[l * self.num_blocks + b]
                 for b in range(self.num_blocks)], axis=0)
            acc = bias_all[l] + a_wide @ xw
            x = jnp.maximum(acc, 0.0) if l != self.num_layers - 1 else acc
        return jax.nn.log_softmax(x[:, :self.out_channels], axis=-1)


# ---------------------------------- main ------------------------------------

if __name__ == "__main__":
    key = jax.random.PRNGKey(0)

    in_channels, hidden_channels, out_channels = 16, 32, 8
    num_layers = 3
    num_edge_types = 4
    num_nodes_dict = {0: 40, 1: 24, 2: 20}   # 3 node types
    x_types = [0]                            # only type 0 has input features

    N = 128      # nodes in the sampled subgraph ((E+T)*N multiple of 128 -> aligned dots)
    E = 256      # edges in the sampled subgraph

    k1, k2, k3, k4, k5, kmodel = jax.random.split(key, 6)
    x_dict = {0: jax.random.normal(k1, (num_nodes_dict[0], in_channels), jnp.float32)}
    node_type = jax.random.randint(k2, (N,), 0, 3, jnp.int32)
    local_node_idx = jax.random.randint(k3, (N,), 0, 16, jnp.int32)  # valid for every type table
    edge_index = jax.random.randint(k4, (2, E), 0, N, jnp.int32)
    edge_type = jax.random.randint(k5, (E,), 0, num_edge_types, jnp.int32)

    model = RGCNPallas(kmodel, in_channels, hidden_channels, out_channels,
                       num_layers, dropout=0.5, num_nodes_dict=num_nodes_dict,
                       x_types=x_types, num_edge_types=num_edge_types)

    out = model.forward(x_dict, edge_index, edge_type, node_type, local_node_idx)
    out = jax.block_until_ready(out)
    assert out.shape == (N, out_channels)
    assert bool(jnp.all(jnp.isfinite(out)))

    # Tolerance check against the pure-JAX f32 reference (bf16 MXU path drifts a bit).
    ref = model.reference_forward(x_dict, edge_index, edge_type, node_type,
                                  local_node_idx)
    max_err = float(jnp.max(jnp.abs(out - ref)))
    assert max_err < 0.2, f"kernel deviates from f32 reference: max_err={max_err}"

    print("KERNEL_OK")
</pallas_src>

<mosaic_0001>
module attributes {stable_mosaic.version = 11 : i64} {
  func.func @_fused_rgcn_kernel(%arg0: memref<128x128xf32, #tpu.memory_space<vmem>>, %arg1: memref<128x896xbf16, #tpu.memory_space<vmem>>, %arg2: memref<21x128x128xbf16, #tpu.memory_space<vmem>>, %arg3: memref<3x128x128xf32, #tpu.memory_space<vmem>>, %arg4: memref<128x128xf32, #tpu.memory_space<vmem>>, %arg5: memref<896x128xbf16, #tpu.memory_space<vmem>>) attributes {dimension_semantics = [], scalar_prefetch = 0 : i64, scratch_operands = 1 : i64, tpu.core_type = #tpu.core_type<tc>} {
    %c0 = arith.constant 0 : index
    %c0_0 = arith.constant 0 : index
    %0 = vector.load %arg0[%c0, %c0_0] : memref<128x128xf32, #tpu.memory_space<vmem>>, vector<128x128xf32>
    %1 = arith.truncf %0 : vector<128x128xf32> to vector<128x128xbf16>
    %c0_1 = arith.constant 0 : index
    %c0_2 = arith.constant 0 : index
    %c0_3 = arith.constant 0 : index
    %2 = vector.load %arg2[%c0_1, %c0_2, %c0_3] : memref<21x128x128xbf16, #tpu.memory_space<vmem>>, vector<1x128x128xbf16>
    %3 = vector.shape_cast %2 : vector<1x128x128xbf16> to vector<128x128xbf16>
    %cst = arith.constant dense<0.000000e+00> : vector<128x128xf32>
    %4 = tpu.matmul %1, %3, %cst {dimension_numbers = #tpu.dot_dimension_numbers<[1], [0], [0], [1], [0, 0, 1, 1], [], []>} : vector<128x128xbf16>, vector<128x128xbf16>, vector<128x128xf32> -> vector<128x128xf32>
    %5 = arith.truncf %4 : vector<128x128xf32> to vector<128x128xbf16>
    %c0_4 = arith.constant 0 : index
    %c0_5 = arith.constant 0 : index
    %6 = vector.load %arg5[%c0_4, %c0_5] : memref<896x128xbf16, #tpu.memory_space<vmem>>, vector<128x128xbf16>
    tpu.vector_store %arg5[%c0_4, %c0_5], %5 {strides = array<i32>} : memref<896x128xbf16, #tpu.memory_space<vmem>>, vector<128x128xbf16>,
    %c1 = arith.constant 1 : index
    %c0_6 = arith.constant 0 : index
    %c0_7 = arith.constant 0 : index
    %7 = vector.load %arg2[%c1, %c0_6, %c0_7] : memref<21x128x128xbf16, #tpu.memory_space<vmem>>, vector<1x128x128xbf16>
    %8 = vector.shape_cast %7 : vector<1x128x128xbf16> to vector<128x128xbf16>
    %cst_8 = arith.constant dense<0.000000e+00> : vector<128x128xf32>
    %9 = tpu.matmul %1, %8, %cst_8 {dimension_numbers = #tpu.dot_dimension_numbers<[1], [0], [0], [1], [0, 0, 1, 1], [], []>} : vector<128x128xbf16>, vector<128x128xbf16>, vector<128x128xf32> -> vector<128x128xf32>
    %10 = arith.truncf %9 : vector<128x128xf32> to vector<128x128xbf16>
    %c128 = arith.constant 128 : index
    %c0_9 = arith.constant 0 : index
    %11 = vector.load %arg5[%c128, %c0_9] : memref<896x128xbf16, #tpu.memory_space<vmem>>, vector<128x128xbf16>
    tpu.vector_store %arg5[%c128, %c0_9], %10 {strides = array<i32>} : memref<896x128xbf16, #tpu.memory_space<vmem>>, vector<128x128xbf16>,
    %c2 = arith.constant 2 : index
    %c0_10 = arith.constant 0 : index
    %c0_11 = arith.constant 0 : index
    %12 = vector.load %arg2[%c2, %c0_10, %c0_11] : memref<21x128x128xbf16, #tpu.memory_space<vmem>>, vector<1x128x128xbf16>
    %13 = vector.shape_cast %12 : vector<1x128x128xbf16> to vector<128x128xbf16>
    %cst_12 = arith.constant dense<0.000000e+00> : vector<128x128xf32>
    %14 = tpu.matmul %1, %13, %cst_12 {dimension_numbers = #tpu.dot_dimension_numbers<[1], [0], [0], [1], [0, 0, 1, 1], [], []>} : vector<128x128xbf16>, vector<128x128xbf16>, vector<128x128xf32> -> vector<128x128xf32>
    %15 = arith.truncf %14 : vector<128x128xf32> to vector<128x128xbf16>
    %c256 = arith.constant 256 : index
    %c0_13 = arith.constant 0 : index
    %16 = vector.load %arg5[%c256, %c0_13] : memref<896x128xbf16, #tpu.memory_space<vmem>>, vector<128x128xbf16>
    tpu.vector_store %arg5[%c256, %c0_13], %15 {strides = array<i32>} : memref<896x128xbf16, #tpu.memory_space<vmem>>, vector<128x128xbf16>,
    %c3 = arith.constant 3 : index
    %c0_14 = arith.constant 0 : index
    %c0_15 = arith.constant 0 : index
    %17 = vector.load %arg2[%c3, %c0_14, %c0_15] : memref<21x128x128xbf16, #tpu.memory_space<vmem>>, vector<1x128x128xbf16>
    %18 = vector.shape_cast %17 : vector<1x128x128xbf16> to vector<128x128xbf16>
    %cst_16 = arith.constant dense<0.000000e+00> : vector<128x128xf32>
    %19 = tpu.matmul %1, %18, %cst_16 {dimension_numbers = #tpu.dot_dimension_numbers<[1], [0], [0], [1], [0, 0, 1, 1], [], []>} : vector<128x128xbf16>, vector<128x128xbf16>, vector<128x128xf32> -> vector<128x128xf32>
    %20 = arith.truncf %19 : vector<128x128xf32> to vector<128x128xbf16>
    %c384 = arith.constant 384 : index
    %c0_17 = arith.constant 0 : index
    %21 = vector.load %arg5[%c384, %c0_17] : memref<896x128xbf16, #tpu.memory_space<vmem>>, vector<128x128xbf16>
    tpu.vector_store %arg5[%c384, %c0_17], %20 {strides = array<i32>} : memref<896x128xbf16, #tpu.memory_space<vmem>>, vector<128x128xbf16>,
    %c4 = arith.constant 4 : index
    %c0_18 = arith.constant 0 : index
    %c0_19 = arith.constant 0 : index
    %22 = vector.load %arg2[%c4, %c0_18, %c0_19] : memref<21x128x128xbf16, #tpu.memory_space<vmem>>, vector<1x128x128xbf16>
    %23 = vector.shape_cast %22 : vector<1x128x128xbf16> to vector<128x128xbf16>
    %cst_20 = arith.constant dense<0.000000e+00> : vector<128x128xf32>
    %24 = tpu.matmul %1, %23, %cst_20 {dimension_numbers = #tpu.dot_dimension_numbers<[1], [0], [0], [1], [0, 0, 1, 1], [], []>} : vector<128x128xbf16>, vector<128x128xbf16>, vector<128x128xf32> -> vector<128x128xf32>
    %25 = arith.truncf %24 : vector<128x128xf32> to vector<128x128xbf16>
    %c512 = arith.constant 512 : index
    %c0_21 = arith.constant 0 : index
    %26 = vector.load %arg5[%c512, %c0_21] : memref<896x128xbf16, #tpu.memory_space<vmem>>, vector<128x128xbf16>
    tpu.vector_store %arg5[%c512, %c0_21], %25 {strides = array<i32>} : memref<896x128xbf16, #tpu.memory_space<vmem>>, vector<128x128xbf16>,
    %c5 = arith.constant 5 : index
    %c0_22 = arith.constant 0 : index
    %c0_23 = arith.constant 0 : index
    %27 = vector.load %arg2[%c5, %c0_22, %c0_23] : memref<21x128x128xbf16, #tpu.memory_space<vmem>>, vector<1x128x128xbf16>
    %28 = vector.shape_cast %27 : vector<1x128x128xbf16> to vector<128x128xbf16>
    %cst_24 = arith.constant dense<0.000000e+00> : vector<128x128xf32>
    %29 = tpu.matmul %1, %28, %cst_24 {dimension_numbers = #tpu.dot_dimension_numbers<[1], [0], [0], [1], [0, 0, 1, 1], [], []>} : vector<128x128xbf16>, vector<128x128xbf16>, vector<128x128xf32> -> vector<128x128xf32>
    %30 = arith.truncf %29 : vector<128x128xf32> to vector<128x128xbf16>
    %c640 = arith.constant 640 : index
    %c0_25 = arith.constant 0 : index
    %31 = vector.load %arg5[%c640, %c0_25] : memref<896x128xbf16, #tpu.memory_space<vmem>>, vector<128x128xbf16>
    tpu.vector_store %arg5[%c640, %c0_25], %30 {strides = array<i32>} : memref<896x128xbf16, #tpu.memory_space<vmem>>, vector<128x128xbf16>,
    %c6 = arith.constant 6 : index
    %c0_26 = arith.constant 0 : index
    %c0_27 = arith.constant 0 : index
    %32 = vector.load %arg2[%c6, %c0_26, %c0_27] : memref<21x128x128xbf16, #tpu.memory_space<vmem>>, vector<1x128x128xbf16>
    %33 = vector.shape_cast %32 : vector<1x128x128xbf16> to vector<128x128xbf16>
    %cst_28 = arith.constant dense<0.000000e+00> : vector<128x128xf32>
    %34 = tpu.matmul %1, %33, %cst_28 {dimension_numbers = #tpu.dot_dimension_numbers<[1], [0], [0], [1], [0, 0, 1, 1], [], []>} : vector<128x128xbf16>, vector<128x128xbf16>, vector<128x128xf32> -> vector<128x128xf32>
    %35 = arith.truncf %34 : vector<128x128xf32> to vector<128x128xbf16>
    %c768 = arith.constant 768 : index
    %c0_29 = arith.constant 0 : index
    %36 = vector.load %arg5[%c768, %c0_29] : memref<896x128xbf16, #tpu.memory_space<vmem>>, vector<128x128xbf16>
    tpu.vector_store %arg5[%c768, %c0_29], %35 {strides = array<i32>} : memref<896x128xbf16, #tpu.memory_space<vmem>>, vector<128x128xbf16>,
    %c0_30 = arith.constant 0 : index
    %c0_31 = arith.constant 0 : index
    %c0_32 = arith.constant 0 : index
    %37 = vector.load %arg3[%c0_30, %c0_31, %c0_32] : memref<3x128x128xf32, #tpu.memory_space<vmem>>, vector<1x128x128xf32>
    %38 = vector.shape_cast %37 : vector<1x128x128xf32> to vector<128x128xf32>
    %c0_33 = arith.constant 0 : index
    %c0_34 = arith.constant 0 : index
    %39 = vector.load %arg1[%c0_33, %c0_34] : memref<128x896xbf16, #tpu.memory_space<vmem>>, vector<128x896xbf16>
    %c0_35 = arith.constant 0 : index
    %c0_36 = arith.constant 0 : index
    %40 = vector.load %arg5[%c0_35, %c0_36] : memref<896x128xbf16, #tpu.memory_space<vmem>>, vector<896x128xbf16>
    %cst_37 = arith.constant dense<0.000000e+00> : vector<128x128xf32>
    %41 = tpu.matmul %39, %40, %cst_37 {dimension_numbers = #tpu.dot_dimension_numbers<[1], [0], [0], [1], [0, 0, 1, 1], [], []>} : vector<128x896xbf16>, vector<896x128xbf16>, vector<128x128xf32> -> vector<128x128xf32>
    %42 = arith.addf %38, %41 : vector<128x128xf32>
    %cst_38 = arith.constant 0.000000e+00 : f32
    %43 = vector.broadcast %cst_38 : f32 to vector<128x128xf32>
    %44 = arith.maximumf %42, %43 : vector<128x128xf32>
    %45 = arith.truncf %44 : vector<128x128xf32> to vector<128x128xbf16>
    %c7 = arith.constant 7 : index
    %c0_39 = arith.constant 0 : index
    %c0_40 = arith.constant 0 : index
    %46 = vector.load %arg2[%c7, %c0_39, %c0_40] : memref<21x128x128xbf16, #tpu.memory_space<vmem>>, vector<1x128x128xbf16>
    %47 = vector.shape_cast %46 : vector<1x128x128xbf16> to vector<128x128xbf16>
    %cst_41 = arith.constant dense<0.000000e+00> : vector<128x128xf32>
    %48 = tpu.matmul %45, %47, %cst_41 {dimension_numbers = #tpu.dot_dimension_numbers<[1], [0], [0], [1], [0, 0, 1, 1], [], []>} : vector<128x128xbf16>, vector<128x128xbf16>, vector<128x128xf32> -> vector<128x128xf32>
    %49 = arith.truncf %48 : vector<128x128xf32> to vector<128x128xbf16>
    %c0_42 = arith.constant 0 : index
    %c0_43 = arith.constant 0 : index
    %50 = vector.load %arg5[%c0_42, %c0_43] : memref<896x128xbf16, #tpu.memory_space<vmem>>, vector<128x128xbf16>
    tpu.vector_store %arg5[%c0_42, %c0_43], %49 {strides = array<i32>} : memref<896x128xbf16, #tpu.memory_space<vmem>>, vector<128x128xbf16>,
    %c8 = arith.constant 8 : index
    %c0_44 = arith.constant 0 : index
    %c0_45 = arith.constant 0 : index
    %51 = vector.load %arg2[%c8, %c0_44, %c0_45] : memref<21x128x128xbf16, #tpu.memory_space<vmem>>, vector<1x128x128xbf16>
    %52 = vector.shape_cast %51 : vector<1x128x128xbf16> to vector<128x128xbf16>
    %cst_46 = arith.constant dense<0.000000e+00> : vector<128x128xf32>
    %53 = tpu.matmul %45, %52, %cst_46 {dimension_numbers = #tpu.dot_dimension_numbers<[1], [0], [0], [1], [0, 0, 1, 1], [], []>} : vector<128x128xbf16>, vector<128x128xbf16>, vector<128x128xf32> -> vector<128x128xf32>
    %54 = arith.truncf %53 : vector<128x128xf32> to vector<128x128xbf16>
    %c128_47 = arith.constant 128 : index
    %c0_48 = arith.constant 0 : index
    %55 = vector.load %arg5[%c128_47, %c0_48] : memref<896x128xbf16, #tpu.memory_space<vmem>>, vector<128x128xbf16>
    tpu.vector_store %arg5[%c128_47, %c0_48], %54 {strides = array<i32>} : memref<896x128xbf16, #tpu.memory_space<vmem>>, vector<128x128xbf16>,
    %c9 = arith.constant 9 : index
    %c0_49 = arith.constant 0 : index
    %c0_50 = arith.constant 0 : index
    %56 = vector.load %arg2[%c9, %c0_49, %c0_50] : memref<21x128x128xbf16, #tpu.memory_space<vmem>>, vector<1x128x128xbf16>
    %57 = vector.shape_cast %56 : vector<1x128x128xbf16> to vector<128x128xbf16>
    %cst_51 = arith.constant dense<0.000000e+00> : vector<128x128xf32>
    %58 = tpu.matmul %45, %57, %cst_51 {dimension_numbers = #tpu.dot_dimension_numbers<[1], [0], [0], [1], [0, 0, 1, 1], [], []>} : vector<128x128xbf16>, vector<128x128xbf16>, vector<128x128xf32> -> vector<128x128xf32>
    %59 = arith.truncf %58 : vector<128x128xf32> to vector<128x128xbf16>
    %c256_52 = arith.constant 256 : index
    %c0_53 = arith.constant 0 : index
    %60 = vector.load %arg5[%c256_52, %c0_53] : memref<896x128xbf16, #tpu.memory_space<vmem>>, vector<128x128xbf16>
    tpu.vector_store %arg5[%c256_52, %c0_53], %59 {strides = array<i32>} : memref<896x128xbf16, #tpu.memory_space<vmem>>, vector<128x128xbf16>,
    %c10 = arith.constant 10 : index
    %c0_54 = arith.constant 0 : index
    %c0_55 = arith.constant 0 : index
    %61 = vector.load %arg2[%c10, %c0_54, %c0_55] : memref<21x128x128xbf16, #tpu.memory_space<vmem>>, vector<1x128x128xbf16>
    %62 = vector.shape_cast %61 : vector<1x128x128xbf16> to vector<128x128xbf16>
    %cst_56 = arith.constant dense<0.000000e+00> : vector<128x128xf32>
    %63 = tpu.matmul %45, %62, %cst_56 {dimension_numbers = #tpu.dot_dimension_numbers<[1], [0], [0], [1], [0, 0, 1, 1], [], []>} : vector<128x128xbf16>, vector<128x128xbf16>, vector<128x128xf32> -> vector<128x128xf32>
    %64 = arith.truncf %63 : vector<128x128xf32> to vector<128x128xbf16>
    %c384_57 = arith.constant 384 : index
    %c0_58 = arith.constant 0 : index
    %65 = vector.load %arg5[%c384_57, %c0_58] : memref<896x128xbf16, #tpu.memory_space<vmem>>, vector<128x128xbf16>
    tpu.vector_store %arg5[%c384_57, %c0_58], %64 {strides = array<i32>} : memref<896x128xbf16, #tpu.memory_space<vmem>>, vector<128x128xbf16>,
    %c11 = arith.constant 11 : index
    %c0_59 = arith.constant 0 : index
    %c0_60 = arith.constant 0 : index
    %66 = vector.load %arg2[%c11, %c0_59, %c0_60] : memref<21x128x128xbf16, #tpu.memory_space<vmem>>, vector<1x128x128xbf16>
    %67 = vector.shape_cast %66 : vector<1x128x128xbf16> to vector<128x128xbf16>
    %cst_61 = arith.constant dense<0.000000e+00> : vector<128x128xf32>
    %68 = tpu.matmul %45, %67, %cst_61 {dimension_numbers = #tpu.dot_dimension_numbers<[1], [0], [0], [1], [0, 0, 1, 1], [], []>} : vector<128x128xbf16>, vector<128x128xbf16>, vector<128x128xf32> -> vector<128x128xf32>
    %69 = arith.truncf %68 : vector<128x128xf32> to vector<128x128xbf16>
    %c512_62 = arith.constant 512 : index
    %c0_63 = arith.constant 0 : index
    %70 = vector.load %arg5[%c512_62, %c0_63] : memref<896x128xbf16, #tpu.memory_space<vmem>>, vector<128x128xbf16>
    tpu.vector_store %arg5[%c512_62, %c0_63], %69 {strides = array<i32>} : memref<896x128xbf16, #tpu.memory_space<vmem>>, vector<128x128xbf16>,
    %c12 = arith.constant 12 : index
    %c0_64 = arith.constant 0 : index
    %c0_65 = arith.constant 0 : index
    %71 = vector.load %arg2[%c12, %c0_64, %c0_65] : memref<21x128x128xbf16, #tpu.memory_space<vmem>>, vector<1x128x128xbf16>
    %72 = vector.shape_cast %71 : vector<1x128x128xbf16> to vector<128x128xbf16>
    %cst_66 = arith.constant dense<0.000000e+00> : vector<128x128xf32>
    %73 = tpu.matmul %45, %72, %cst_66 {dimension_numbers = #tpu.dot_dimension_numbers<[1], [0], [0], [1], [0, 0, 1, 1], [], []>} : vector<128x128xbf16>, vector<128x128xbf16>, vector<128x128xf32> -> vector<128x128xf32>
    %74 = arith.truncf %73 : vector<128x128xf32> to vector<128x128xbf16>
    %c640_67 = arith.constant 640 : index
    %c0_68 = arith.constant 0 : index
    %75 = vector.load %arg5[%c640_67, %c0_68] : memref<896x128xbf16, #tpu.memory_space<vmem>>, vector<128x128xbf16>
    tpu.vector_store %arg5[%c640_67, %c0_68], %74 {strides = array<i32>} : memref<896x128xbf16, #tpu.memory_space<vmem>>, vector<128x128xbf16>,
    %c13 = arith.constant 13 : index
    %c0_69 = arith.constant 0 : index
    %c0_70 = arith.constant 0 : index
    %76 = vector.load %arg2[%c13, %c0_69, %c0_70] : memref<21x128x128xbf16, #tpu.memory_space<vmem>>, vector<1x128x128xbf16>
    %77 = vector.shape_cast %76 : vector<1x128x128xbf16> to vector<128x128xbf16>
    %cst_71 = arith.constant dense<0.000000e+00> : vector<128x128xf32>
    %78 = tpu.matmul %45, %77, %cst_71 {dimension_numbers = #tpu.dot_dimension_numbers<[1], [0], [0], [1], [0, 0, 1, 1], [], []>} : vector<128x128xbf16>, vector<128x128xbf16>, vector<128x128xf32> -> vector<128x128xf32>
    %79 = arith.truncf %78 : vector<128x128xf32> to vector<128x128xbf16>
    %c768_72 = arith.constant 768 : index
    %c0_73 = arith.constant 0 : index
    %80 = vector.load %arg5[%c768_72, %c0_73] : memref<896x128xbf16, #tpu.memory_space<vmem>>, vector<128x128xbf16>
    tpu.vector_store %arg5[%c768_72, %c0_73], %79 {strides = array<i32>} : memref<896x128xbf16, #tpu.memory_space<vmem>>, vector<128x128xbf16>,
    %c1_74 = arith.constant 1 : index
    %c0_75 = arith.constant 0 : index
    %c0_76 = arith.constant 0 : index
    %81 = vector.load %arg3[%c1_74, %c0_75, %c0_76] : memref<3x128x128xf32, #tpu.memory_space<vmem>>, vector<1x128x128xf32>
    %82 = vector.shape_cast %81 : vector<1x128x128xf32> to vector<128x128xf32>
    %c0_77 = arith.constant 0 : index
    %c0_78 = arith.constant 0 : index
    %83 = vector.load %arg1[%c0_77, %c0_78] : memref<128x896xbf16, #tpu.memory_space<vmem>>, vector<128x896xbf16>
    %c0_79 = arith.constant 0 : index
    %c0_80 = arith.constant 0 : index
    %84 = vector.load %arg5[%c0_79, %c0_80] : memref<896x128xbf16, #tpu.memory_space<vmem>>, vector<896x128xbf16>
    %cst_81 = arith.constant dense<0.000000e+00> : vector<128x128xf32>
    %85 = tpu.matmul %83, %84, %cst_81 {dimension_numbers = #tpu.dot_dimension_numbers<[1], [0], [0], [1], [0, 0, 1, 1], [], []>} : vector<128x896xbf16>, vector<896x128xbf16>, vector<128x128xf32> -> vector<128x128xf32>
    %86 = arith.addf %82, %85 : vector<128x128xf32>
    %cst_82 = arith.constant 0.000000e+00 : f32
    %87 = vector.broadcast %cst_82 : f32 to vector<128x128xf32>
    %88 = arith.maximumf %86, %87 : vector<128x128xf32>
    %89 = arith.truncf %88 : vector<128x128xf32> to vector<128x128xbf16>
    %c14 = arith.constant 14 : index
    %c0_83 = arith.constant 0 : index
    %c0_84 = arith.constant 0 : index
    %90 = vector.load %arg2[%c14, %c0_83, %c0_84] : memref<21x128x128xbf16, #tpu.memory_space<vmem>>, vector<1x128x128xbf16>
    %91 = vector.shape_cast %90 : vector<1x128x128xbf16> to vector<128x128xbf16>
    %cst_85 = arith.constant dense<0.000000e+00> : vector<128x128xf32>
    %92 = tpu.matmul %89, %91, %cst_85 {dimension_numbers = #tpu.dot_dimension_numbers<[1], [0], [0], [1], [0, 0, 1, 1], [], []>} : vector<128x128xbf16>, vector<128x128xbf16>, vector<128x128xf32> -> vector<128x128xf32>
    %93 = arith.truncf %92 : vector<128x128xf32> to vector<128x128xbf16>
    %c0_86 = arith.constant 0 : index
    %c0_87 = arith.constant 0 : index
    %94 = vector.load %arg5[%c0_86, %c0_87] : memref<896x128xbf16, #tpu.memory_space<vmem>>, vector<128x128xbf16>
    tpu.vector_store %arg5[%c0_86, %c0_87], %93 {strides = array<i32>} : memref<896x128xbf16, #tpu.memory_space<vmem>>, vector<128x128xbf16>,
    %c15 = arith.constant 15 : index
    %c0_88 = arith.constant 0 : index
    %c0_89 = arith.constant 0 : index
    %95 = vector.load %arg2[%c15, %c0_88, %c0_89] : memref<21x128x128xbf16, #tpu.memory_space<vmem>>, vector<1x128x128xbf16>
    %96 = vector.shape_cast %95 : vector<1x128x128xbf16> to vector<128x128xbf16>
    %cst_90 = arith.constant dense<0.000000e+00> : vector<128x128xf32>
    %97 = tpu.matmul %89, %96, %cst_90 {dimension_numbers = #tpu.dot_dimension_numbers<[1], [0], [0], [1], [0, 0, 1, 1], [], []>} : vector<128x128xbf16>, vector<128x128xbf16>, vector<128x128xf32> -> vector<128x128xf32>
    %98 = arith.truncf %97 : vector<128x128xf32> to vector<128x128xbf16>
    %c128_91 = arith.constant 128 : index
    %c0_92 = arith.constant 0 : index
    %99 = vector.load %arg5[%c128_91, %c0_92] : memref<896x128xbf16, #tpu.memory_space<vmem>>, vector<128x128xbf16>
    tpu.vector_store %arg5[%c128_91, %c0_92], %98 {strides = array<i32>} : memref<896x128xbf16, #tpu.memory_space<vmem>>, vector<128x128xbf16>,
    %c16 = arith.constant 16 : index
    %c0_93 = arith.constant 0 : index
    %c0_94 = arith.constant 0 : index
    %100 = vector.load %arg2[%c16, %c0_93, %c0_94] : memref<21x128x128xbf16, #tpu.memory_space<vmem>>, vector<1x128x128xbf16>
    %101 = vector.shape_cast %100 : vector<1x128x128xbf16> to vector<128x128xbf16>
    %cst_95 = arith.constant dense<0.000000e+00> : vector<128x128xf32>
    %102 = tpu.matmul %89, %101, %cst_95 {dimension_numbers = #tpu.dot_dimension_numbers<[1], [0], [0], [1], [0, 0, 1, 1], [], []>} : vector<128x128xbf16>, vector<128x128xbf16>, vector<128x128xf32> -> vector<128x128xf32>
    %103 = arith.truncf %102 : vector<128x128xf32> to vector<128x128xbf16>
    %c256_96 = arith.constant 256 : index
    %c0_97 = arith.constant 0 : index
    %104 = vector.load %arg5[%c256_96, %c0_97] : memref<896x128xbf16, #tpu.memory_space<vmem>>, vector<128x128xbf16>
    tpu.vector_store %arg5[%c256_96, %c0_97], %103 {strides = array<i32>} : memref<896x128xbf16, #tpu.memory_space<vmem>>, vector<128x128xbf16>,
    %c17 = arith.constant 17 : index
    %c0_98 = arith.constant 0 : index
    %c0_99 = arith.constant 0 : index
    %105 = vector.load %arg2[%c17, %c0_98, %c0_99] : memref<21x128x128xbf16, #tpu.memory_space<vmem>>, vector<1x128x128xbf16>
    %106 = vector.shape_cast %105 : vector<1x128x128xbf16> to vector<128x128xbf16>
    %cst_100 = arith.constant dense<0.000000e+00> : vector<128x128xf32>
    %107 = tpu.matmul %89, %106, %cst_100 {dimension_numbers = #tpu.dot_dimension_numbers<[1], [0], [0], [1], [0, 0, 1, 1], [], []>} : vector<128x128xbf16>, vector<128x128xbf16>, vector<128x128xf32> -> vector<128x128xf32>
    %108 = arith.truncf %107 : vector<128x128xf32> to vector<128x128xbf16>
    %c384_101 = arith.constant 384 : index
    %c0_102 = arith.constant 0 : index
    %109 = vector.load %arg5[%c384_101, %c0_102] : memref<896x128xbf16, #tpu.memory_space<vmem>>, vector<128x128xbf16>
    tpu.vector_store %arg5[%c384_101, %c0_102], %108 {strides = array<i32>} : memref<896x128xbf16, #tpu.memory_space<vmem>>, vector<128x128xbf16>,
    %c18 = arith.constant 18 : index
    %c0_103 = arith.constant 0 : index
    %c0_104 = arith.constant 0 : index
    %110 = vector.load %arg2[%c18, %c0_103, %c0_104] : memref<21x128x128xbf16, #tpu.memory_space<vmem>>, vector<1x128x128xbf16>
    %111 = vector.shape_cast %110 : vector<1x128x128xbf16> to vector<128x128xbf16>
    %cst_105 = arith.constant dense<0.000000e+00> : vector<128x128xf32>
    %112 = tpu.matmul %89, %111, %cst_105 {dimension_numbers = #tpu.dot_dimension_numbers<[1], [0], [0], [1], [0, 0, 1, 1], [], []>} : vector<128x128xbf16>, vector<128x128xbf16>, vector<128x128xf32> -> vector<128x128xf32>
    %113 = arith.truncf %112 : vector<128x128xf32> to vector<128x128xbf16>
    %c512_106 = arith.constant 512 : index
    %c0_107 = arith.constant 0 : index
    %114 = vector.load %arg5[%c512_106, %c0_107] : memref<896x128xbf16, #tpu.memory_space<vmem>>, vector<128x128xbf16>
    tpu.vector_store %arg5[%c512_106, %c0_107], %113 {strides = array<i32>} : memref<896x128xbf16, #tpu.memory_space<vmem>>, vector<128x128xbf16>,
    %c19 = arith.constant 19 : index
    %c0_108 = arith.constant 0 : index
    %c0_109 = arith.constant 0 : index
    %115 = vector.load %arg2[%c19, %c0_108, %c0_109] : memref<21x128x128xbf16, #tpu.memory_space<vmem>>, vector<1x128x128xbf16>
    %116 = vector.shape_cast %115 : vector<1x128x128xbf16> to vector<128x128xbf16>
    %cst_110 = arith.constant dense<0.000000e+00> : vector<128x128xf32>
    %117 = tpu.matmul %89, %116, %cst_110 {dimension_numbers = #tpu.dot_dimension_numbers<[1], [0], [0], [1], [0, 0, 1, 1], [], []>} : vector<128x128xbf16>, vector<128x128xbf16>, vector<128x128xf32> -> vector<128x128xf32>
    %118 = arith.truncf %117 : vector<128x128xf32> to vector<128x128xbf16>
    %c640_111 = arith.constant 640 : index
    %c0_112 = arith.constant 0 : index
    %119 = vector.load %arg5[%c640_111, %c0_112] : memref<896x128xbf16, #tpu.memory_space<vmem>>, vector<128x128xbf16>
    tpu.vector_store %arg5[%c640_111, %c0_112], %118 {strides = array<i32>} : memref<896x128xbf16, #tpu.memory_space<vmem>>, vector<128x128xbf16>,
    %c20 = arith.constant 20 : index
    %c0_113 = arith.constant 0 : index
    %c0_114 = arith.constant 0 : index
    %120 = vector.load %arg2[%c20, %c0_113, %c0_114] : memref<21x128x128xbf16, #tpu.memory_space<vmem>>, vector<1x128x128xbf16>
    %121 = vector.shape_cast %120 : vector<1x128x128xbf16> to vector<128x128xbf16>
    %cst_115 = arith.constant dense<0.000000e+00> : vector<128x128xf32>
    %122 = tpu.matmul %89, %121, %cst_115 {dimension_numbers = #tpu.dot_dimension_numbers<[1], [0], [0], [1], [0, 0, 1, 1], [], []>} : vector<128x128xbf16>, vector<128x128xbf16>, vector<128x128xf32> -> vector<128x128xf32>
    %123 = arith.truncf %122 : vector<128x128xf32> to vector<128x128xbf16>
    %c768_116 = arith.constant 768 : index
    %c0_117 = arith.constant 0 : index
    %124 = vector.load %arg5[%c768_116, %c0_117] : memref<896x128xbf16, #tpu.memory_space<vmem>>, vector<128x128xbf16>
    tpu.vector_store %arg5[%c768_116, %c0_117], %123 {strides = array<i32>} : memref<896x128xbf16, #tpu.memory_space<vmem>>, vector<128x128xbf16>,
    %c2_118 = arith.constant 2 : index
    %c0_119 = arith.constant 0 : index
    %c0_120 = arith.constant 0 : index
    %125 = vector.load %arg3[%c2_118, %c0_119, %c0_120] : memref<3x128x128xf32, #tpu.memory_space<vmem>>, vector<1x128x128xf32>
    %126 = vector.shape_cast %125 : vector<1x128x128xf32> to vector<128x128xf32>
    %c0_121 = arith.constant 0 : index
    %c0_122 = arith.constant 0 : index
    %127 = vector.load %arg1[%c0_121, %c0_122] : memref<128x896xbf16, #tpu.memory_space<vmem>>, vector<128x896xbf16>
    %c0_123 = arith.constant 0 : index
    %c0_124 = arith.constant 0 : index
    %128 = vector.load %arg5[%c0_123, %c0_124] : memref<896x128xbf16, #tpu.memory_space<vmem>>, vector<896x128xbf16>
    %cst_125 = arith.constant dense<0.000000e+00> : vector<128x128xf32>
    %129 = tpu.matmul %127, %128, %cst_125 {dimension_numbers = #tpu.dot_dimension_numbers<[1], [0], [0], [1], [0, 0, 1, 1], [], []>} : vector<128x896xbf16>, vector<896x128xbf16>, vector<128x128xf32> -> vector<128x128xf32>
    %130 = arith.addf %126, %129 : vector<128x128xf32>
    %131 = tpu.iota {dimensions = array<i32: 1>} : vector<128x128xi32>
    %c8_i32 = arith.constant 8 : i32
    %132 = vector.broadcast %c8_i32 : i32 to vector<128x128xi32>
    %133 = arith.cmpi slt, %131, %132 : vector<128x128xi32>
    %cst_126 = arith.constant 0xFF800000 : f32
    %134 = vector.broadcast %cst_126 : f32 to vector<128x128xf32>
    %135 = arith.select %133, %130, %134 : vector<128x128xi1>, vector<128x128xf32>
    %cst_127 = arith.constant dense<0xFF800000> : vector<128xf32>
    %136 = vector.multi_reduction <maximumf>, %135, %cst_127 [1] : vector<128x128xf32> to vector<128xf32>
    %137 = vector.shape_cast %136 : vector<128xf32> to vector<128x1xf32>
    %138 = vector.broadcast %137 : vector<128x1xf32> to vector<128x128xf32>
    %139 = arith.subf %135, %138 : vector<128x128xf32>
    %140 = math.exp %139 : vector<128x128xf32>
    %cst_128 = arith.constant dense<0.000000e+00> : vector<128xf32>
    %141 = vector.multi_reduction <add>, %140, %cst_128 [1] : vector<128x128xf32> to vector<128xf32>
    %142 = vector.shape_cast %141 : vector<128xf32> to vector<128x1xf32>
    %143 = math.log %142 : vector<128x1xf32>
    %144 = vector.broadcast %137 : vector<128x1xf32> to vector<128x128xf32>
    %145 = arith.subf %130, %144 : vector<128x128xf32>
    %146 = vector.broadcast %143 : vector<128x1xf32> to vector<128x128xf32>
    %147 = arith.subf %145, %146 : vector<128x128xf32>
    %cst_129 = arith.constant 0.000000e+00 : f32
    %148 = vector.broadcast %cst_129 : f32 to vector<128x128xf32>
    %149 = arith.select %133, %147, %148 : vector<128x128xi1>, vector<128x128xf32>
    %c0_130 = arith.constant 0 : index
    %c0_131 = arith.constant 0 : index
    %150 = vector.load %arg4[%c0_130, %c0_131] : memref<128x128xf32, #tpu.memory_space<vmem>>, vector<128x128xf32>
    tpu.vector_store %arg4[%c0_130, %c0_131], %149 {strides = array<i32>} : memref<128x128xf32, #tpu.memory_space<vmem>>, vector<128x128xf32>,
    return
  }
}

</mosaic_0001>

<bundles_post_ra>
// kernel: tpu_custom_call.1
= control target key start
LH: loop header
LB: loop body
LE: loop exit
PB: predicated region body
PF: predicated region fallthrough
CT: control target
= control target key end

     0   :  { %9 = vsyncpa [#allocation4], 0  ;;  %s11512_s0 = inlined_call_operand.hbm [shape: f32[128,128], index: 0, kind: input, shape index: {}]   ;;  %s11513_s1 = inlined_call_operand.hbm [shape: bf16[128,896], index: 1, kind: input, shape index: {}]   ;;  %s11514_s2 = inlined_call_operand.hbm [shape: bf16[21,128,128], index: 2, kind: input, shape index: {}]   ;;  %s11515_s3 = inlined_call_operand.hbm [shape: f32[3,128,128], index: 3, kind: input, shape index: {}]   ;;  %s11516_s4 = inlined_call_operand.hbm [shape: f32[128,128], index: 4, kind: output, shape index: {}]  }
   0x1   :  { %10 = vsyncpa [#allocation7], 0 }
   0x2   :  { %11 = vsyncpa [#allocation10], 0  ;;  %s30_s17 = sshll.u32 %s11513_s1, 4  ;;  %s31_s17 = int_to_ptr.hbm [resolvable:$true] %s30_s17 }
   0x3   :  { %12 = vsyncpa [#allocation5], 0  ;;  %s10737_s18 = smov [#allocation6]   ;;  %s17_s22 = sshll.u32 %s11512_s0, 4  ;;  %s18_s22 = int_to_ptr.hbm [resolvable:$true] %s17_s22 }
   0x4   :  { %s32_s19 = sshll.u32 %s10737_s18, 4  ;;  %s10738_s23 = smov 448   ;;  %s33_s19 = int_to_ptr.vmem [resolvable:$true] %s32_s19 }
   0x5   :  { %s10739_s24 = smov 28   ;;  %s10740_s25 = smov [#allocation3]  }
   0x6   :  { %38 = dma.hbm_to_vmem [thread:$0]  %s31_s17, 7168, %s33_s19, [#allocation7], %s10738_s23, %s10738_s23, %s10739_s24  }
   0x7   :  { %s19_s26 = sshll.u32 %s10740_s25, 4  ;;  %s10741_s27 = smov 128   ;;  %s20_s26 = int_to_ptr.vmem [resolvable:$true] %s19_s26 }
   0x8   :  { %s10742_s28 = smov 8   ;;  %s43_s30 = sshll.u32 %s11514_s2, 4  ;;  %s44_s30 = int_to_ptr.hbm [resolvable:$true] %s43_s30 }
   0x9   :  { %25 = dma.hbm_to_vmem [thread:$0]  %s18_s22, 2048, %s20_s26, [#allocation4], %s10741_s27, %s10741_s27, %s10742_s28  }
   0xa   :  { %s10743_s5 = smov [#allocation8]   ;;  %s56_s8 = sshll.u32 %s11515_s3, 4  ;;  %s57_s8 = int_to_ptr.hbm [resolvable:$true] %s56_s8 }
   0xb   :  { %s45_s0 = sshll.u32 %s10743_s5, 4  ;;  %s10744_s9 = smov 64   ;;  %s46_s0 = int_to_ptr.vmem [resolvable:$true] %s45_s0 }
   0xc   :  { %s10745_s10 = smov 4   ;;  %s10746_s11 = smov [#allocation9]  }
   0xd   :  { %51 = dma.hbm_to_vmem [thread:$0]  %s44_s30, 21504, %s46_s0, [#allocation7], %s10744_s9, %s10744_s9, %s10745_s10  }
   0xe   :  { %s58_s12 = sshll.u32 %s10746_s11, 4  ;;  %s59_s12 = int_to_ptr.vmem [resolvable:$true] %s58_s12 }
   0xf   :  { %64 = dma.hbm_to_vmem [thread:$0]  %s57_s8, 6144, %s59_s12, [#allocation10], %s10741_s27, %s10741_s27, %s10742_s28  }
  0x10   :  { %10729 = dma.done.wait [#allocation4], 2048  }
  0x11   :  { %10730 = vsyncadd [#allocation4], 4294965248 }
  0x12   :  { %10731 = dma.done.wait [#allocation7], 28672  }
  0x13   :  { %10732 = vsyncadd [#allocation7], 4294938624 }
  0x14   :  { %10733 = dma.done.wait [#allocation10], 6144  }
  0x15   :  { %10734 = vsyncadd [#allocation10], 4294961152  ;;  %v9016_v0 = vld [vmem:[#allocation8 + $0x38] sm:$0xff]  ;;  %v9015_v2 = vld [vmem:[#allocation8 + $0x30] sm:$0xff]  ;;  %s10747_s2 = smov [#allocation11]   ;;  %s6978_s15 = sshll.u32 %s11516_s4, 4  ;;  %s6979_s15 = int_to_ptr.hbm [resolvable:$true] %s6978_s15 }
  0x16   :  { %v9024_v1 = vld [vmem:[#allocation8 + $0x78] sm:$0xff]  ;;  %169 = vmatpush.bf16.msra.mxu0 %v9016_v0  ;;  %10518 = vmatpush.bf16.msra.mxu2 %v9016_v0  ;;  %v9023_v3 = vld [vmem:[#allocation8 + $0x70] sm:$0xff]  ;;  %v9014_v4 = vld [vmem:[#allocation8 + $0x28] sm:$0xff]  ;;  %s6976_s3 = sshll.u32 %s10747_s2, 4  ;;  %s6977_s3 = int_to_ptr.vmem [resolvable:$true] %s6976_s3 }
  0x17   :  { %315 = vmatpush.bf16.msra.mxu1 %v9024_v1  ;;  %10526 = vmatpush.bf16.msra.mxu3 %v9024_v1  ;;  %v9022_v5 = vld [vmem:[#allocation8 + $0x68] sm:$0xff]  ;;  %v9013_v6 = vld [vmem:[#allocation8 + $0x20] sm:$0xff]  ;;  %v9012_v8 = vld [vmem:[#allocation8 + $0x18] sm:$0xff] }
  0x18   :  { %v9021_v7 = vld [vmem:[#allocation8 + $0x60] sm:$0xff]  ;;  %v9020_v9 = vld [vmem:[#allocation8 + $0x58] sm:$0xff]  ;;  %v9011_v10 = vld [vmem:[#allocation8 + $0x10] sm:$0xff] }
  0x19   :  { %v9019_v11 = vld [vmem:[#allocation8 + $0x50] sm:$0xff]  ;;  %v9010_v12 = vld [vmem:[#allocation8 + $0x8] sm:$0xff]  ;;  %v9009_v14 = vld [vmem:[#allocation8] sm:$0xff] }
  0x1a   :  { %170 = vmatpush.bf16.msra.mxu0 %v9015_v2  ;;  %10519 = vmatpush.bf16.msra.mxu2 %v9015_v2  ;;  %v9018_v13 = vld [vmem:[#allocation8 + $0x48] sm:$0xff]  ;;  %v81_v15 = vld [vmem:[#allocation3] sm:$0xff]  ;;  %v9032_v22 = vld [vmem:[#allocation8 + $0xb8] sm:$0xff] }
  0x1b   :  { %316 = vmatpush.bf16.msra.mxu1 %v9023_v3  ;;  %10527 = vmatpush.bf16.msra.mxu3 %v9023_v3  ;;  %v82_v16 = vld [vmem:[#allocation3 + $0x8] sm:$0xff]  ;;  %v89_v17 = vld [vmem:[#allocation3 + $0x40] sm:$0xff]  ;;  %v9040_v23 = vld [vmem:[#allocation8 + $0xf8] sm:$0xff] }
  0x1c   :  { %v90_v18 = vld [vmem:[#allocation3 + $0x48] sm:$0xff]  ;;  %v9017_v19 = vld [vmem:[#allocation8 + $0x40] sm:$0xff]  ;;  %v10791_v20 = vpack.c.bf16 %v82_v16, %v81_v15  ;;  %v9048_v24 = vld [vmem:[#allocation8 + $0x138] sm:$0xff] }
  0x1d   :  { %v10793_v21 = vpack.c.bf16 %v90_v18, %v89_v17  ;;  %v9056_v25 = vld [vmem:[#allocation8 + $0x178] sm:$0xff]  ;;  %v9031_v26 = vld [vmem:[#allocation8 + $0xb0] sm:$0xff]  ;;  %v9030_v30 = vld [vmem:[#allocation8 + $0xa8] sm:$0xff] }
  0x1e   :  { %171 = vmatpush.bf16.msra.mxu0 %v9014_v4  ;;  %10520 = vmatpush.bf16.msra.mxu2 %v9014_v4  ;;  %v9039_v27 = vld [vmem:[#allocation8 + $0xf0] sm:$0xff]  ;;  %v9038_v31 = vld [vmem:[#allocation8 + $0xe8] sm:$0xff]  ;;  %v84_v35 = vld [vmem:[#allocation3 + $0x18] sm:$0xff] }
  0x1f   :  { %317 = vmatpush.bf16.msra.mxu1 %v9022_v5  ;;  %10528 = vmatpush.bf16.msra.mxu3 %v9022_v5  ;;  %v9047_v28 = vld [vmem:[#allocation8 + $0x130] sm:$0xff]  ;;  %v9046_v32 = vld [vmem:[#allocation8 + $0x128] sm:$0xff]  ;;  %v92_v37 = vld [vmem:[#allocation3 + $0x58] sm:$0xff] }
  0x20   :  { %v9055_v29 = vld [vmem:[#allocation8 + $0x170] sm:$0xff]  ;;  %v9054_v33 = vld [vmem:[#allocation8 + $0x168] sm:$0xff]  ;;  %v9029_v38 = vld [vmem:[#allocation8 + $0xa0] sm:$0xff] }
  0x21   :  { %v83_v34 = vld [vmem:[#allocation3 + $0x10] sm:$0xff]  ;;  %v9037_v39 = vld [vmem:[#allocation8 + $0xe0] sm:$0xff]  ;;  %v9028_v44 = vld [vmem:[#allocation8 + $0x98] sm:$0xff] }
  0x22   :  { %172 = vmatpush.bf16.msra.mxu0 %v9013_v6  ;;  %10521 = vmatpush.bf16.msra.mxu2 %v9013_v6  ;;  %v91_v36 = vld [vmem:[#allocation3 + $0x50] sm:$0xff]  ;;  %v9045_v40 = vld [vmem:[#allocation8 + $0x120] sm:$0xff]  ;;  %v10799_v42 = vpack.c.bf16 %v84_v35, %v83_v34  ;;  %v9036_v45 = vld [vmem:[#allocation8 + $0xd8] sm:$0xff] }
  0x23   :  { %318 = vmatpush.bf16.msra.mxu1 %v9021_v7  ;;  %10529 = vmatpush.bf16.msra.mxu3 %v9021_v7  ;;  %v9053_v41 = vld [vmem:[#allocation8 + $0x160] sm:$0xff]  ;;  %v10801_v43 = vpack.c.bf16 %v92_v37, %v91_v36  ;;  %v9044_v46 = vld [vmem:[#allocation8 + $0x118] sm:$0xff]  ;;  %v9027_v48 = vld [vmem:[#allocation8 + $0x90] sm:$0xff] }
  0x24   :  { %v9052_v47 = vld [vmem:[#allocation8 + $0x158] sm:$0xff]  ;;  %v9035_v49 = vld [vmem:[#allocation8 + $0xd0] sm:$0xff]  ;;  %v9026_v52 = vld [vmem:[#allocation8 + $0x88] sm:$0xff] }
  0x25   :  { %v9043_v50 = vld [vmem:[#allocation8 + $0x110] sm:$0xff]  ;;  %v9034_v53 = vld [vmem:[#allocation8 + $0xc8] sm:$0xff]  ;;  %v85_v56 = vld [vmem:[#allocation3 + $0x20] sm:$0xff] }
  0x26   :  { %173 = vmatpush.bf16.msra.mxu0 %v9012_v8  ;;  %10522 = vmatpush.bf16.msra.mxu2 %v9012_v8  ;;  %v9051_v51 = vld [vmem:[#allocation8 + $0x150] sm:$0xff]  ;;  %v9042_v54 = vld [vmem:[#allocation8 + $0x108] sm:$0xff]  ;;  %v93_v58 = vld [vmem:[#allocation3 + $0x60] sm:$0xff] }
  0x27   :  { %319 = vmatpush.bf16.msra.mxu1 %v9020_v9  ;;  %10530 = vmatpush.bf16.msra.mxu3 %v9020_v9  ;;  %v9050_v55 = vld [vmem:[#allocation8 + $0x148] sm:$0xff]  ;;  %v9025_v60 = vld [vmem:[#allocation8 + $0x80] sm:$0xff]  ;;  %v87_v2 = vld [vmem:[#allocation3 + $0x30] sm:$0xff] }
  0x28   :  { %v86_v57 = vld [vmem:[#allocation3 + $0x28] sm:$0xff]  ;;  %v9033_v61 = vld [vmem:[#allocation8 + $0xc0] sm:$0xff]  ;;  %v88_v3 = vld [vmem:[#allocation3 + $0x38] sm:$0xff] }
  0x29   :  { %v94_v59 = vld [vmem:[#allocation3 + $0x68] sm:$0xff]  ;;  %v9041_v62 = vld [vmem:[#allocation8 + $0x100] sm:$0xff]  ;;  %v10807_v0 = vpack.c.bf16 %v86_v57, %v85_v56  ;;  %v95_v4 = vld [vmem:[#allocation3 + $0x70] sm:$0xff]  ;;  %v10815_v6 = vpack.c.bf16 %v88_v3, %v87_v2 }
  0x2a   :  { %174 = vmatpush.bf16.msra.mxu0 %v9011_v10  ;;  %10523 = vmatpush.bf16.msra.mxu2 %v9011_v10  ;;  %v9049_v63 = vld [vmem:[#allocation8 + $0x140] sm:$0xff]  ;;  %v10809_v1 = vpack.c.bf16 %v94_v59, %v93_v58  ;;  %v96_v5 = vld [vmem:[#allocation3 + $0x78] sm:$0xff]  ;;  %v9062_v18 = vld [vmem:[#allocation8 + $0x1a8] sm:$0xff] }
  0x2b   :  { %320 = vmatpush.bf16.msra.mxu1 %v9019_v11  ;;  %10531 = vmatpush.bf16.msra.mxu3 %v9019_v11  ;;  %v10817_v7 = vpack.c.bf16 %v96_v5, %v95_v4  ;;  %v9064_v10 = vld [vmem:[#allocation8 + $0x1b8] sm:$0xff]  ;;  %v9058_v36 = vld [vmem:[#allocation8 + $0x188] sm:$0xff] }
  0x2e   :  { %175 = vmatpush.bf16.msra.mxu0 %v9010_v12  ;;  %10524 = vmatpush.bf16.msra.mxu2 %v9010_v12 }
  0x2f   :  { %321 = vmatpush.bf16.msra.mxu1 %v9018_v13  ;;  %10532 = vmatpush.bf16.msra.mxu3 %v9018_v13  ;;  %v9063_v13 = vld [vmem:[#allocation8 + $0x1b0] sm:$0xff] }
  0x32   :  { %176 = vmatpush.bf16.msra.mxu0 %v9009_v14  ;;  %10525 = vmatpush.bf16.msra.mxu2 %v9009_v14 }
  0x33   :  { %322 = vmatpush.bf16.msra.mxu1 %v9017_v19  ;;  %10533 = vmatpush.bf16.msra.mxu3 %v9017_v19 }
  0x35   :  { %177 = vmatmul.bf16.vlgmr.msra.gmra.mxu0 %v10791_v20  ;;  %197 = vmatmul.bf16.vlgmr.msra.gmra.mxu2 %v10793_v21 }
  0x36   :  { %323 = vmatmul.bf16.vlgmr.msra.gmra.mxu1 %v10791_v20  ;;  %343 = vmatmul.bf16.vlgmr.msra.gmra.mxu3 %v10793_v21 }
  0x37   :  { %461 = vmatpush.bf16.msrb.mxu2 %v9032_v22  ;;  %607 = vmatpush.bf16.msrb.mxu3 %v9040_v23 }
  0x38   :  { %753 = vmatpush.bf16.msrb.mxu0 %v9048_v24  ;;  %899 = vmatpush.bf16.msrb.mxu1 %v9056_v25  ;;  %v9061_v24 = vld [vmem:[#allocation8 + $0x1a0] sm:$0xff] }
  0x3b   :  { %462 = vmatpush.bf16.msrb.mxu2 %v9031_v26  ;;  %608 = vmatpush.bf16.msrb.mxu3 %v9039_v27 }
  0x3c   :  { %754 = vmatpush.bf16.msrb.mxu0 %v9047_v28  ;;  %900 = vmatpush.bf16.msrb.mxu1 %v9055_v29  ;;  %v9060_v28 = vld [vmem:[#allocation8 + $0x198] sm:$0xff] }
  0x3f   :  { %463 = vmatpush.bf16.msrb.mxu2 %v9030_v30  ;;  %609 = vmatpush.bf16.msrb.mxu3 %v9038_v31  ;;  %v9059_v31 = vld [vmem:[#allocation8 + $0x190] sm:$0xff] }
  0x40   :  { %755 = vmatpush.bf16.msrb.mxu0 %v9046_v32  ;;  %901 = vmatpush.bf16.msrb.mxu1 %v9054_v33 }
  0x43   :  { %464 = vmatpush.bf16.msrb.mxu2 %v9029_v38  ;;  %610 = vmatpush.bf16.msrb.mxu3 %v9037_v39 }
  0x44   :  { %756 = vmatpush.bf16.msrb.mxu0 %v9045_v40  ;;  %902 = vmatpush.bf16.msrb.mxu1 %v9053_v41  ;;  %v9057_v40 = vld [vmem:[#allocation8 + $0x180] sm:$0xff] }
  0x45   :  { %182 = vmatmul.bf16.gmra.mxu0 %v10799_v42  ;;  %202 = vmatmul.bf16.gmra.mxu2 %v10801_v43 }
  0x46   :  { %328 = vmatmul.bf16.gmra.mxu1 %v10799_v42  ;;  %348 = vmatmul.bf16.gmra.mxu3 %v10801_v43 }
  0x47   :  { %465 = vmatpush.bf16.msrb.mxu2 %v9028_v44  ;;  %611 = vmatpush.bf16.msrb.mxu3 %v9036_v45 }
  0x48   :  { %757 = vmatpush.bf16.msrb.mxu0 %v9044_v46  ;;  %903 = vmatpush.bf16.msrb.mxu1 %v9052_v47 }
  0x4b   :  { %466 = vmatpush.bf16.msrb.mxu2 %v9027_v48  ;;  %612 = vmatpush.bf16.msrb.mxu3 %v9035_v49 }
  0x4c   :  { %758 = vmatpush.bf16.msrb.mxu0 %v9043_v50  ;;  %904 = vmatpush.bf16.msrb.mxu1 %v9051_v51 }
  0x4f   :  { %467 = vmatpush.bf16.msrb.mxu2 %v9026_v52  ;;  %613 = vmatpush.bf16.msrb.mxu3 %v9034_v53 }
  0x50   :  { %759 = vmatpush.bf16.msrb.mxu0 %v9042_v54  ;;  %905 = vmatpush.bf16.msrb.mxu1 %v9050_v55 }
  0x53   :  { %468 = vmatpush.bf16.msrb.mxu2 %v9025_v60  ;;  %614 = vmatpush.bf16.msrb.mxu3 %v9033_v61 }
  0x54   :  { %760 = vmatpush.bf16.msrb.mxu0 %v9041_v62  ;;  %906 = vmatpush.bf16.msrb.mxu1 %v9049_v63 }
  0x55   :  { %187 = vmatmul.bf16.gmra.mxu0 %v10807_v0  ;;  %207 = vmatmul.bf16.gmra.mxu2 %v10809_v1 }
  0x56   :  { %333 = vmatmul.bf16.gmra.mxu1 %v10807_v0  ;;  %353 = vmatmul.bf16.gmra.mxu3 %v10809_v1 }
  0x57   :  { %1045 = vmatpush.bf16.msra.mxu2 %v9064_v10 }
  0x5b   :  { %1046 = vmatpush.bf16.msra.mxu2 %v9063_v13 }
  0x5f   :  { %1047 = vmatpush.bf16.msra.mxu2 %v9062_v18 }
  0x63   :  { %1048 = vmatpush.bf16.msra.mxu2 %v9061_v24 }
  0x65   :  { %192 = vmatmul.bf16.gmra.mxu0 %v10815_v6  ;;  %212 = vmatmul.bf16.gmra.mxu2 %v10817_v7 }
  0x66   :  { %338 = vmatmul.bf16.gmra.mxu1 %v10815_v6  ;;  %358 = vmatmul.bf16.gmra.mxu3 %v10817_v7 }
  0x67   :  { %1049 = vmatpush.bf16.msra.mxu2 %v9060_v28 }
  0x6b   :  { %1050 = vmatpush.bf16.msra.mxu2 %v9059_v31 }
  0x6f   :  { %1051 = vmatpush.bf16.msra.mxu2 %v9058_v36 }
  0x73   :  { %1052 = vmatpush.bf16.msra.mxu2 %v9057_v40 }
  0x75   :  { %469 = vmatmul.bf16.vlgmr.msrb.gmra.mxu2 %v10791_v20  ;;  %761 = vmatmul.bf16.vlgmr.msrb.gmra.mxu0 %v10791_v20 }
  0x76   :  { %615 = vmatmul.bf16.vlgmr.msrb.gmra.mxu3 %v10791_v20  ;;  %907 = vmatmul.bf16.vlgmr.msrb.gmra.mxu1 %v10791_v20 }
  0x85   :  { %474 = vmatmul.bf16.gmra.mxu2 %v10799_v42  ;;  %766 = vmatmul.bf16.gmra.mxu0 %v10799_v42 }
  0x86   :  { %620 = vmatmul.bf16.gmra.mxu3 %v10799_v42  ;;  %912 = vmatmul.bf16.gmra.mxu1 %v10799_v42 }
  0x95   :  { %479 = vmatmul.bf16.gmra.mxu2 %v10807_v0  ;;  %771 = vmatmul.bf16.gmra.mxu0 %v10807_v0 }
  0x96   :  { %625 = vmatmul.bf16.gmra.mxu3 %v10807_v0  ;;  %917 = vmatmul.bf16.gmra.mxu1 %v10807_v0 }
  0xa5   :  { %484 = vmatmul.bf16.gmra.mxu2 %v10815_v6  ;;  %776 = vmatmul.bf16.gmra.mxu0 %v10815_v6 }
  0xa6   :  { %630 = vmatmul.bf16.gmra.mxu3 %v10815_v6  ;;  %922 = vmatmul.bf16.gmra.mxu1 %v10815_v6 }
  0xb2   :  { %v178_v8 = vpop.f32.mrf.mxu0 }
  0xb3   :  { %v324_v9 = vpop.f32.mrf.mxu1 }
  0xb5   :  { %489 = vmatmul.bf16.gmra.mxu2 %v10793_v21  ;;  %781 = vmatmul.bf16.gmra.mxu0 %v10793_v21 }
  0xb6   :  { %635 = vmatmul.bf16.gmra.mxu3 %v10793_v21  ;;  %927 = vmatmul.bf16.gmra.mxu1 %v10793_v21 }
  0xb8   :  { %v198_v11 = vpop.f32.mrf.mxu2 }
  0xb9   :  { %v344_v12 = vpop.f32.mrf.mxu3 }
  0xba   :  { %v180_v14 = vpop.f32.mrf.mxu0 }
  0xbb   :  { %v9516_v15 = vpack.c.bf16 %v180_v14, %v178_v8  ;;  %v326_v16 = vpop.f32.mrf.mxu1 }
  0xbc   :  { %v9556_v17 = vpack.c.bf16 %v326_v16, %v324_v9 }
  0xbd   :  { %9517 = vst [vmem:[#allocation2 + $0xb0] sm:$0xff] %v9516_v15  }
  0xbe   :  { %10360 = vst [vmem:[#allocation2 + $0x180] sm:$0xff] %v9556_v17  }
  0xc0   :  { %v200_v19 = vpop.f32.mrf.mxu2 }
  0xc1   :  { %v9536_v22 = vpack.c.bf16 %v200_v19, %v198_v11  ;;  %v346_v23 = vpop.f32.mrf.mxu3 }
  0xc2   :  { %v9576_v25 = vpack.c.bf16 %v346_v23, %v344_v12  ;;  %v183_v26 = vpop.f32.mrf.mxu0 }
  0xc3   :  { %10356 = vst [vmem:[#allocation2 + $0x50] sm:$0xff] %v9536_v22   ;;  %v329_v27 = vpop.f32.mrf.mxu1 }
  0xc4   :  { %10364 = vst [vmem:[#allocation2 + $0x120] sm:$0xff] %v9576_v25  }
  0xc5   :  { %494 = vmatmul.bf16.gmra.mxu2 %v10801_v43  ;;  %786 = vmatmul.bf16.gmra.mxu0 %v10801_v43 }
  0xc6   :  { %640 = vmatmul.bf16.gmra.mxu3 %v10801_v43  ;;  %932 = vmatmul.bf16.gmra.mxu1 %v10801_v43 }
  0xc8   :  { %v203_v29 = vpop.f32.mrf.mxu2 }
  0xc9   :  { %v349_v30 = vpop.f32.mrf.mxu3 }
  0xca   :  { %v185_v32 = vpop.f32.mrf.mxu0 }
  0xcb   :  { %v9521_v33 = vpack.c.bf16 %v185_v32, %v183_v26  ;;  %v331_v34 = vpop.f32.mrf.mxu1 }
  0xcc   :  { %v9561_v35 = vpack.c.bf16 %v331_v34, %v329_v27 }
  0xcd   :  { %10353 = vst [vmem:[#allocation2 + $0x1b0] sm:$0xff] %v9521_v33  }
  0xce   :  { %10361 = vst [vmem:[#allocation2 + $0x110] sm:$0xff] %v9561_v35  }
  0xd0   :  { %v205_v37 = vpop.f32.mrf.mxu2 }
  0xd1   :  { %v9541_v38 = vpack.c.bf16 %v205_v37, %v203_v29  ;;  %v351_v39 = vpop.f32.mrf.mxu3  ;;  %v9133_v29 = vld [vmem:[#allocation2 + $0x120] sm:$0xff] }
  0xd2   :  { %v9581_v41 = vpack.c.bf16 %v351_v39, %v349_v30  ;;  %v188_v44 = vpop.f32.mrf.mxu0  ;;  %v9125_v30 = vld [vmem:[#allocation2 + $0x50] sm:$0xff] }
  0xd3   :  { %10357 = vst [vmem:[#allocation2 + $0x168] sm:$0xff] %v9541_v38   ;;  %v334_v45 = vpop.f32.mrf.mxu1 }
  0xd4   :  { %10365 = vst [vmem:[#allocation2 + $0x150] sm:$0xff] %v9581_v41   ;;  %v9122_v41 = vld [vmem:[#allocation2 + $0x1b0] sm:$0xff] }
  0xd5   :  { %499 = vmatmul.bf16.gmra.mxu2 %v10809_v1  ;;  %791 = vmatmul.bf16.gmra.mxu0 %v10809_v1 }
  0xd6   :  { %645 = vmatmul.bf16.gmra.mxu3 %v10809_v1  ;;  %937 = vmatmul.bf16.gmra.mxu1 %v10809_v1 }
  0xd8   :  { %v208_v46 = vpop.f32.mrf.mxu2 }
  0xd9   :  { %v354_v47 = vpop.f32.mrf.mxu3 }
  0xda   :  { %v190_v48 = vpop.f32.mrf.mxu0  ;;  %v9126_v27 = vld [vmem:[#allocation2 + $0x168] sm:$0xff] }
  0xdb   :  { %v9526_v49 = vpack.c.bf16 %v190_v48, %v188_v44  ;;  %v336_v50 = vpop.f32.mrf.mxu1 }
  0xdc   :  { %v9566_v51 = vpack.c.bf16 %v336_v50, %v334_v45  ;;  %v9121_v50 = vld [vmem:[#allocation2 + $0xb0] sm:$0xff] }
  0xdd   :  { %10354 = vst [vmem:[#allocation2 + $0xd8] sm:$0xff] %v9526_v49  }
  0xde   :  { %10362 = vst [vmem:[#allocation2 + $0x118] sm:$0xff] %v9566_v51   ;;  %v7219_v51 = vld [vmem:[#allocation6] sm:$0xf] }
  0xe0   :  { %v210_v52 = vpop.f32.mrf.mxu2 }
  0xe1   :  { %v9546_v53 = vpack.c.bf16 %v210_v52, %v208_v46  ;;  %v356_v54 = vpop.f32.mrf.mxu3  ;;  %v9130_v46 = vld [vmem:[#allocation2 + $0x110] sm:$0xff]  ;;  %v9068_v52 = vld [vmem:[#allocation6 + $0x18] sm:$0xf0] }
  0xe2   :  { %v9586_v55 = vpack.c.bf16 %v356_v54, %v354_v47  ;;  %v193_v56 = vpop.f32.mrf.mxu0  ;;  %v9065_v54 = vld [vmem:[#allocation6 + $0x4] sm:$0xf] }
  0xe3   :  { %10358 = vst [vmem:[#allocation2 + $0x130] sm:$0xff] %v9546_v53   ;;  %v339_v57 = vpop.f32.mrf.mxu1  ;;  %v9129_v53 = vld [vmem:[#allocation2 + $0x180] sm:$0xff] }
  0xe4   :  { %10366 = vst [vmem:[#allocation2 + $0x108] sm:$0xff] %v9586_v55   ;;  %v9123_v39 = vld [vmem:[#allocation2 + $0xd8] sm:$0xff]  ;;  %v7221_v55 = vld [vmem:[#allocation6 + $0x1c] sm:$0xf0] }
  0xe5   :  { %504 = vmatmul.bf16.gmra.mxu2 %v10817_v7  ;;  %796 = vmatmul.bf16.gmra.mxu0 %v10817_v7  ;;  %v9131_v40 = vld [vmem:[#allocation2 + $0x118] sm:$0xff] }
  0xe6   :  { %650 = vmatmul.bf16.gmra.mxu3 %v10817_v7  ;;  %942 = vmatmul.bf16.gmra.mxu1 %v10817_v7 }
  0xe8   :  { %v213_v58 = vpop.f32.mrf.mxu2 }
  0xe9   :  { %v359_v59 = vpop.f32.mrf.mxu3 }
  0xea   :  { %v195_v60 = vpop.f32.mrf.mxu0  ;;  %v9127_v19 = vld [vmem:[#allocation2 + $0x130] sm:$0xff] }
  0xeb   :  { %v9531_v61 = vpack.c.bf16 %v195_v60, %v193_v56  ;;  %v341_v62 = vpop.f32.mrf.mxu1  ;;  %v9135_v18 = vld [vmem:[#allocation2 + $0x108] sm:$0xff]  ;;  %v7220_v56 = vor.u32 %v9068_v52, %v7219_v51 }
  0xec   :  { %v9571_v63 = vpack.c.bf16 %v341_v62, %v339_v57 }
  0xed   :  { %10355 = vst [vmem:[#allocation2 + $0x18] sm:$0xff] %v9531_v61  }
  0xee   :  { %10363 = vst [vmem:[#allocation2 + $0x98] sm:$0xff] %v9571_v63  }
  0xf0   :  { %v215_v2 = vpop.f32.mrf.mxu2 }
  0xf1   :  { %v9551_v3 = vpack.c.bf16 %v215_v2, %v213_v58  ;;  %v361_v4 = vpop.f32.mrf.mxu3  ;;  %v7224_v58 = vor.u32 %v9065_v54, %v7221_v55 }
  0xf2   :  { %v9591_v5 = vpack.c.bf16 %v361_v4, %v359_v59  ;;  %v762_v8 = vpop.f32.mrf.mxu0 }
  0xf3   :  { %10359 = vst [vmem:[#allocation2 + $0x48] sm:$0xff] %v9551_v3   ;;  %v908_v9 = vpop.f32.mrf.mxu1 }
  0xf4   :  { %10367 = vst [vmem:[#allocation2 + $0x60] sm:$0xff] %v9591_v5   ;;  %v9124_v32 = vld [vmem:[#allocation2 + $0x18] sm:$0xff] }
  0xf5   :  { %1053 = vmatmul.bf16.vlgmr.msra.gmra.mxu2 %v10791_v20  ;;  %v9134_v20 = vld [vmem:[#allocation2 + $0x150] sm:$0xff]  ;;  %v9132_v34 = vld [vmem:[#allocation2 + $0x98] sm:$0xff] }
  0xf8   :  { %v470_v10 = vpop.f32.mrf.mxu2 }
  0xf9   :  { %v616_v11 = vpop.f32.mrf.mxu3 }
  0xfa   :  { %v764_v12 = vpop.f32.mrf.mxu0  ;;  %v9128_v13 = vld [vmem:[#allocation2 + $0x48] sm:$0xff] }
  0xfb   :  { %v9676_v14 = vpack.c.bf16 %v764_v12, %v762_v8  ;;  %v910_v15 = vpop.f32.mrf.mxu1  ;;  %v9136_v16 = vld [vmem:[#allocation2 + $0x60] sm:$0xff]  ;;  %1942 = vmatpush.bf16.msra.mxu3 %v9128_v13  ;;  %v7249_v12 = vld [vmem:[#allocation6 + $0x54] sm:$0xf0] }
  0xfc   :  { %v9716_v17 = vpack.c.bf16 %v910_v15, %v908_v9  ;;  %1991 = vmatpush.bf16.msra.mxu0 %v9136_v16  ;;  %v7247_v9 = vld [vmem:[#allocation6 + $0x38] sm:$0xf] }
  0xfd   :  { %10384 = vst [vmem:[#allocation2] sm:$0xff] %v9676_v14  }
  0xfe   :  { %10392 = vst [vmem:[#allocation2 + $0x10] sm:$0xff] %v9716_v17  }
  0xff   :  { %1943 = vmatpush.bf16.msra.mxu3 %v9127_v19 }
 0x100   :  { %v472_v22 = vpop.f32.mrf.mxu2  ;;  %1992 = vmatpush.bf16.msra.mxu0 %v9135_v18 }
 0x101   :  { %v9596_v23 = vpack.c.bf16 %v472_v22, %v470_v10  ;;  %v618_v24 = vpop.f32.mrf.mxu3  ;;  %v9075_v10 = vld [vmem:[#allocation6 + $0x50] sm:$0xf0] }
 0x102   :  { %v9636_v25 = vpack.c.bf16 %v618_v24, %v616_v11  ;;  %v767_v26 = vpop.f32.mrf.mxu0  ;;  %v9072_v11 = vld [vmem:[#allocation6 + $0x3c] sm:$0xf]  ;;  %v7248_v13 = vor.u32 %v9075_v10, %v7247_v9 }
 0x103   :  { %10368 = vst [vmem:[#allocation2 + $0xe0] sm:$0xff] %v9596_v23   ;;  %v913_v28 = vpop.f32.mrf.mxu1  ;;  %1944 = vmatpush.bf16.msra.mxu3 %v9126_v27  ;;  %v7252_v15 = vor.u32 %v9072_v11, %v7249_v12  ;;  %v7275_v27 = vld [vmem:[#allocation6 + $0x70] sm:$0xf] }
 0x104   :  { %10376 = vst [vmem:[#allocation2 + $0xe8] sm:$0xff] %v9636_v25   ;;  %1993 = vmatpush.bf16.msra.mxu0 %v9134_v20 }
 0x105   :  { %1058 = vmatmul.bf16.gmra.mxu2 %v10799_v42 }
 0x107   :  { %1945 = vmatpush.bf16.msra.mxu3 %v9125_v30  ;;  %v7277_v30 = vld [vmem:[#allocation6 + $0x8c] sm:$0xf0] }
 0x108   :  { %v475_v31 = vpop.f32.mrf.mxu2  ;;  %1994 = vmatpush.bf16.msra.mxu0 %v9133_v29  ;;  %v9079_v29 = vld [vmem:[#allocation6 + $0x74] sm:$0xf] }
 0x109   :  { %v621_v33 = vpop.f32.mrf.mxu3 }
 0x10a   :  { %v769_v35 = vpop.f32.mrf.mxu0 }
 0x10b   :  { %v9681_v36 = vpack.c.bf16 %v769_v35, %v767_v26  ;;  %v915_v37 = vpop.f32.mrf.mxu1  ;;  %1946 = vmatpush.bf16.msra.mxu3 %v9124_v32 }
 0x10c   :  { %v9721_v38 = vpack.c.bf16 %v915_v37, %v913_v28  ;;  %1995 = vmatpush.bf16.msra.mxu0 %v9132_v34  ;;  %v9082_v28 = vld [vmem:[#allocation6 + $0x88] sm:$0xf0] }
 0x10d   :  { %10385 = vst [vmem:[#allocation2 + $0x68] sm:$0xff] %v9681_v36  }
 0x10e   :  { %10393 = vst [vmem:[#allocation2 + $0x100] sm:$0xff] %v9721_v38  }
 0x10f   :  { %1947 = vmatpush.bf16.msra.mxu3 %v9123_v39 }
 0x110   :  { %v477_v42 = vpop.f32.mrf.mxu2  ;;  %1996 = vmatpush.bf16.msra.mxu0 %v9131_v40 }
 0x111   :  { %v9601_v44 = vpack.c.bf16 %v477_v42, %v475_v31  ;;  %v623_v45 = vpop.f32.mrf.mxu3  ;;  %v7276_v31 = vor.u32 %v9082_v28, %v7275_v27 }
 0x112   :  { %v9641_v47 = vpack.c.bf16 %v623_v45, %v621_v33  ;;  %v772_v48 = vpop.f32.mrf.mxu0  ;;  %v7280_v33 = vor.u32 %v9079_v29, %v7277_v30  ;;  %v7303_v45 = vld [vmem:[#allocation6 + $0xa8] sm:$0xf] }
 0x113   :  { %10369 = vst [vmem:[#allocation2 + $0x188] sm:$0xff] %v9601_v44   ;;  %v918_v49 = vpop.f32.mrf.mxu1  ;;  %1948 = vmatpush.bf16.msra.mxu3 %v9122_v41 }
 0x114   :  { %10377 = vst [vmem:[#allocation2 + $0xf8] sm:$0xff] %v9641_v47   ;;  %1997 = vmatpush.bf16.msra.mxu0 %v9130_v46  ;;  %v9089_v46 = vld [vmem:[#allocation6 + $0xc0] sm:$0xf0]  ;;  %v9086_v47 = vld [vmem:[#allocation6 + $0xac] sm:$0xf] }
 0x115   :  { %1063 = vmatmul.bf16.gmra.mxu2 %v10807_v0 }
 0x117   :  { %1949 = vmatpush.bf16.msra.mxu3 %v9121_v50 }
 0x118   :  { %v480_v57 = vpop.f32.mrf.mxu2  ;;  %1998 = vmatpush.bf16.msra.mxu0 %v9129_v53 }
 0x119   :  { %v626_v59 = vpop.f32.mrf.mxu3 }
 0x11a   :  { %v774_v60 = vpop.f32.mrf.mxu0  ;;  %1950 = vmatmul.bf16.vlgmr.msra.gmra.mxu3 %v7220_v56 }
 0x11b   :  { %v9686_v61 = vpack.c.bf16 %v774_v60, %v772_v48  ;;  %v920_v62 = vpop.f32.mrf.mxu1  ;;  %1999 = vmatmul.bf16.vlgmr.msra.gmra.mxu0 %v7224_v58  ;;  %v7305_v48 = vld [vmem:[#allocation6 + $0xc4] sm:$0xf0] }
 0x11c   :  { %v9726_v63 = vpack.c.bf16 %v920_v62, %v918_v49  ;;  %v7304_v49 = vor.u32 %v9089_v46, %v7303_v45  ;;  %v7308_v51 = vor.u32 %v9086_v47, %v7305_v48  ;;  %v7331_v62 = vld [vmem:[#allocation6 + $0xe0] sm:$0xf] }
 0x11d   :  { %10386 = vst [vmem:[#allocation2 + $0x148] sm:$0xff] %v9686_v61  }
 0x11e   :  { %10394 = vst [vmem:[#allocation2 + $0x160] sm:$0xff] %v9726_v63   ;;  %v9096_v63 = vld [vmem:[#allocation6 + $0xf8] sm:$0xf0] }
 0x120   :  { %v482_v2 = vpop.f32.mrf.mxu2 }
 0x121   :  { %v9606_v0 = vpack.c.bf16 %v482_v2, %v480_v57  ;;  %v628_v3 = vpop.f32.mrf.mxu3  ;;  %v9093_v2 = vld [vmem:[#allocation6 + $0xe4] sm:$0xf] }
 0x122   :  { %v9646_v4 = vpack.c.bf16 %v628_v3, %v626_v59  ;;  %v777_v5 = vpop.f32.mrf.mxu0  ;;  %v7332_v3 = vor.u32 %v9096_v63, %v7331_v62 }
 0x123   :  { %10370 = vst [vmem:[#allocation2 + $0x138] sm:$0xff] %v9606_v0   ;;  %v923_v8 = vpop.f32.mrf.mxu1  ;;  %v7333_v0 = vld [vmem:[#allocation6 + $0xfc] sm:$0xf0] }
 0x124   :  { %10378 = vst [vmem:[#allocation2 + $0x190] sm:$0xff] %v9646_v4   ;;  %v9155_v63 = vld [vmem:[#allocation2 + $0x148] sm:$0xff] }
 0x125   :  { %1068 = vmatmul.bf16.gmra.mxu2 %v10815_v6 }
 0x128   :  { %v485_v14 = vpop.f32.mrf.mxu2 }
 0x129   :  { %v631_v16 = vpop.f32.mrf.mxu3 }
 0x12a   :  { %v779_v17 = vpop.f32.mrf.mxu0  ;;  %1955 = vmatmul.bf16.gmra.mxu3 %v7248_v13 }
 0x12b   :  { %v9691_v18 = vpack.c.bf16 %v779_v17, %v777_v5  ;;  %v925_v19 = vpop.f32.mrf.mxu1  ;;  %2004 = vmatmul.bf16.gmra.mxu0 %v7252_v15  ;;  %v7336_v5 = vor.u32 %v9093_v2, %v7333_v0  ;;  %v9163_v2 = vld [vmem:[#allocation2 + $0x160] sm:$0xff] }
 0x12c   :  { %v9731_v22 = vpack.c.bf16 %v925_v19, %v923_v8  ;;  %v9103_v19 = vld [vmem:[#allocation6 + $0x130] sm:$0xf0] }
 0x12d   :  { %10387 = vst [vmem:[#allocation2 + $0x8] sm:$0xff] %v9691_v18   ;;  %v7359_v18 = vld [vmem:[#allocation6 + $0x118] sm:$0xf] }
 0x12e   :  { %10395 = vst [vmem:[#allocation2 + $0x20] sm:$0xff] %v9731_v22   ;;  %v9100_v22 = vld [vmem:[#allocation6 + $0x11c] sm:$0xf] }
 0x130   :  { %v487_v23 = vpop.f32.mrf.mxu2 }
 0x131   :  { %v9611_v24 = vpack.c.bf16 %v487_v23, %v485_v14  ;;  %v633_v20 = vpop.f32.mrf.mxu3  ;;  %v7361_v23 = vld [vmem:[#allocation6 + $0x134] sm:$0xf0] }
 0x132   :  { %v9651_v25 = vpack.c.bf16 %v633_v20, %v631_v16  ;;  %v782_v26 = vpop.f32.mrf.mxu0 }
 0x133   :  { %10371 = vst [vmem:[#allocation2 + $0x140] sm:$0xff] %v9611_v24   ;;  %v928_v6 = vpop.f32.mrf.mxu1  ;;  %v7360_v24 = vor.u32 %v9103_v19, %v7359_v18  ;;  %v7227_v18 = vld [vmem:[#allocation6 + $0x8] sm:$0xf]  ;;  %v9069_v19 = vld [vmem:[#allocation6 + $0x20] sm:$0xf0] }
 0x134   :  { %10379 = vst [vmem:[#allocation2 + $0xb8] sm:$0xff] %v9651_v25   ;;  %v7364_v25 = vor.u32 %v9100_v22, %v7361_v23  ;;  %v9066_v22 = vld [vmem:[#allocation6 + $0xc] sm:$0xf]  ;;  %v7235_v23 = vld [vmem:[#allocation6 + $0x10] sm:$0xf] }
 0x135   :  { %1073 = vmatmul.bf16.gmra.mxu2 %v10793_v21 }
 0x138   :  { %v490_v32 = vpop.f32.mrf.mxu2 }
 0x139   :  { %v636_v34 = vpop.f32.mrf.mxu3 }
 0x13a   :  { %v784_v35 = vpop.f32.mrf.mxu0  ;;  %1960 = vmatmul.bf16.gmra.mxu3 %v7276_v31 }
 0x13b   :  { %v9696_v36 = vpack.c.bf16 %v784_v35, %v782_v26  ;;  %v930_v37 = vpop.f32.mrf.mxu1  ;;  %2009 = vmatmul.bf16.gmra.mxu0 %v7280_v33  ;;  %v9110_v35 = vld [vmem:[#allocation6 + $0x168] sm:$0xf0] }
 0x13c   :  { %v9736_v38 = vpack.c.bf16 %v930_v37, %v928_v6  ;;  %v9107_v37 = vld [vmem:[#allocation6 + $0x154] sm:$0xf] }
 0x13d   :  { %10388 = vst [vmem:[#allocation2 + $0x40] sm:$0xff] %v9696_v36  }
 0x13e   :  { %10396 = vst [vmem:[#allocation2 + $0x70] sm:$0xff] %v9736_v38   ;;  %v7389_v38 = vld [vmem:[#allocation6 + $0x16c] sm:$0xf0] }
 0x140   :  { %v492_v39 = vpop.f32.mrf.mxu2 }
 0x141   :  { %v9616_v40 = vpack.c.bf16 %v492_v39, %v490_v32  ;;  %v638_v42 = vpop.f32.mrf.mxu3 }
 0x142   :  { %v9656_v41 = vpack.c.bf16 %v638_v42, %v636_v34  ;;  %v787_v44 = vpop.f32.mrf.mxu0  ;;  %v7387_v34 = vld [vmem:[#allocation6 + $0x150] sm:$0xf] }
 0x143   :  { %10372 = vst [vmem:[#allocation2 + $0x80] sm:$0xff] %v9616_v40   ;;  %v933_v21 = vpop.f32.mrf.mxu1  ;;  %v7388_v42 = vor.u32 %v9110_v35, %v7387_v34 }
 0x144   :  { %10380 = vst [vmem:[#allocation2 + $0x90] sm:$0xff] %v9656_v41  }
 0x145   :  { %1078 = vmatmul.bf16.gmra.mxu2 %v10801_v43 }
 0x148   :  { %v495_v50 = vpop.f32.mrf.mxu2 }
 0x149   :  { %v641_v52 = vpop.f32.mrf.mxu3 }
 0x14a   :  { %v789_v53 = vpop.f32.mrf.mxu0  ;;  %1965 = vmatmul.bf16.gmra.mxu3 %v7304_v49  ;;  %v9141_v62 = vld [vmem:[#allocation2 + $0x80] sm:$0xff] }
 0x14b   :  { %v9701_v54 = vpack.c.bf16 %v789_v53, %v787_v44  ;;  %v935_v55 = vpop.f32.mrf.mxu1  ;;  %2014 = vmatmul.bf16.gmra.mxu0 %v7308_v51  ;;  %v7392_v44 = vor.u32 %v9107_v37, %v7389_v38  ;;  %v9165_v51 = vld [vmem:[#allocation2 + $0x70] sm:$0xff]  ;;  %v7255_v38 = vld [vmem:[#allocation6 + $0x40] sm:$0xf] }
 0x14c   :  { %v9741_v56 = vpack.c.bf16 %v935_v55, %v933_v21 }
 0x14d   :  { %10389 = vst [vmem:[#allocation2 + $0xa8] sm:$0xff] %v9701_v54  }
 0x14e   :  { %10397 = vst [vmem:[#allocation2 + $0x78] sm:$0xff] %v9741_v56   ;;  %v9156_v56 = vld [vmem:[#allocation2 + $0x8] sm:$0xff] }
 0x150   :  { %v497_v57 = vpop.f32.mrf.mxu2 }
 0x151   :  { %v9621_v58 = vpack.c.bf16 %v497_v57, %v495_v50  ;;  %v643_v59 = vpop.f32.mrf.mxu3  ;;  %v9157_v50 = vld [vmem:[#allocation2 + $0x40] sm:$0xff] }
 0x152   :  { %v9661_v60 = vpack.c.bf16 %v643_v59, %v641_v52  ;;  %v792_v61 = vpop.f32.mrf.mxu0  ;;  %v9164_v57 = vld [vmem:[#allocation2 + $0x20] sm:$0xff] }
 0x153   :  { %10373 = vst [vmem:[#allocation2 + $0x1a8] sm:$0xff] %v9621_v58   ;;  %v938_v43 = vpop.f32.mrf.mxu1  ;;  %v7415_v58 = vld [vmem:[#allocation6 + $0x188] sm:$0xf]  ;;  %v9117_v59 = vld [vmem:[#allocation6 + $0x1a0] sm:$0xf0] }
 0x154   :  { %10381 = vst [vmem:[#allocation2 + $0xc0] sm:$0xff] %v9661_v60   ;;  %v9158_v45 = vld [vmem:[#allocation2 + $0xa8] sm:$0xff]  ;;  %v9149_v60 = vld [vmem:[#allocation2 + $0x90] sm:$0xff]  ;;  %v7416_v0 = vor.u32 %v9117_v59, %v7415_v58  ;;  %v7283_v59 = vld [vmem:[#allocation6 + $0x78] sm:$0xf] }
 0x155   :  { %1083 = vmatmul.bf16.gmra.mxu2 %v10809_v1  ;;  %v9166_v47 = vld [vmem:[#allocation2 + $0x78] sm:$0xff] }
 0x158   :  { %v500_v4 = vpop.f32.mrf.mxu2 }
 0x159   :  { %v646_v8 = vpop.f32.mrf.mxu3 }
 0x15a   :  { %v794_v9 = vpop.f32.mrf.mxu0  ;;  %1970 = vmatmul.bf16.gmra.mxu3 %v7332_v3  ;;  %v9142_v55 = vld [vmem:[#allocation2 + $0x1a8] sm:$0xff] }
 0x15b   :  { %v9706_v10 = vpack.c.bf16 %v794_v9, %v792_v61  ;;  %v940_v11 = vpop.f32.mrf.mxu1  ;;  %2019 = vmatmul.bf16.gmra.mxu0 %v7336_v5  ;;  %v9150_v54 = vld [vmem:[#allocation2 + $0xc0] sm:$0xff]  ;;  %v9114_v61 = vld [vmem:[#allocation6 + $0x18c] sm:$0xf]  ;;  %v9148_v5 = vld [vmem:[#allocation2 + $0xb8] sm:$0xff] }
 0x15c   :  { %v9746_v12 = vpack.c.bf16 %v940_v11, %v938_v43  ;;  %v7417_v43 = vld [vmem:[#allocation6 + $0x1a4] sm:$0xf0]  ;;  %v9162_v9 = vld [vmem:[#allocation2 + $0x100] sm:$0xff]  ;;  %v9147_v11 = vld [vmem:[#allocation2 + $0x190] sm:$0xff] }
 0x15d   :  { %10390 = vst [vmem:[#allocation2 + $0xd0] sm:$0xff] %v9706_v10   ;;  %v9154_v10 = vld [vmem:[#allocation2 + $0x68] sm:$0xff] }
 0x15e   :  { %10398 = vst [vmem:[#allocation2 + $0xa0] sm:$0xff] %v9746_v12   ;;  %v9139_v12 = vld [vmem:[#allocation2 + $0x138] sm:$0xff] }
 0x160   :  { %v502_v13 = vpop.f32.mrf.mxu2 }
 0x161   :  { %v9626_v14 = vpack.c.bf16 %v502_v13, %v500_v4  ;;  %v648_v15 = vpop.f32.mrf.mxu3  ;;  %v7420_v4 = vor.u32 %v9114_v61, %v7417_v43  ;;  %v9080_v61 = vld [vmem:[#allocation6 + $0x7c] sm:$0xf]  ;;  %v7291_v43 = vld [vmem:[#allocation6 + $0x80] sm:$0xf] }
 0x162   :  { %v9666_v16 = vpack.c.bf16 %v648_v15, %v646_v8  ;;  %v797_v17 = vpop.f32.mrf.mxu0  ;;  %v9140_v8 = vld [vmem:[#allocation2 + $0x140] sm:$0xff] }
 0x163   :  { %10374 = vst [vmem:[#allocation2 + $0x1b8] sm:$0xff] %v9626_v14   ;;  %v943_v1 = vpop.f32.mrf.mxu1  ;;  %v9153_v14 = vld [vmem:[#allocation2] sm:$0xff] }
 0x164   :  { %10382 = vst [vmem:[#allocation2 + $0x178] sm:$0xff] %v9666_v16   ;;  %v9159_v39 = vld [vmem:[#allocation2 + $0xd0] sm:$0xff] }
 0x165   :  { %1088 = vmatmul.bf16.gmra.mxu2 %v10817_v7  ;;  %v9167_v40 = vld [vmem:[#allocation2 + $0xa0] sm:$0xff]  ;;  %v9161_v16 = vld [vmem:[#allocation2 + $0x10] sm:$0xff] }
 0x168   :  { %v505_v20 = vpop.f32.mrf.mxu2 }
 0x169   :  { %v651_v26 = vpop.f32.mrf.mxu3 }
 0x16a   :  { %v799_v6 = vpop.f32.mrf.mxu0  ;;  %1975 = vmatmul.bf16.gmra.mxu3 %v7360_v24  ;;  %v9143_v49 = vld [vmem:[#allocation2 + $0x1b8] sm:$0xff]  ;;  %v9070_v24 = vld [vmem:[#allocation6 + $0x28] sm:$0xf0] }
 0x16b   :  { %v9711_v27 = vpack.c.bf16 %v799_v6, %v797_v17  ;;  %v945_v28 = vpop.f32.mrf.mxu1  ;;  %2024 = vmatmul.bf16.gmra.mxu0 %v7364_v25  ;;  %v9151_v48 = vld [vmem:[#allocation2 + $0x178] sm:$0xff]  ;;  %v9138_v17 = vld [vmem:[#allocation2 + $0x188] sm:$0xff]  ;;  %v9067_v25 = vld [vmem:[#allocation6 + $0x14] sm:$0xf] }
 0x16c   :  { %v9751_v29 = vpack.c.bf16 %v945_v28, %v943_v1  ;;  %v9146_v1 = vld [vmem:[#allocation2 + $0xf8] sm:$0xff]  ;;  %v9137_v6 = vld [vmem:[#allocation2 + $0xe0] sm:$0xff]  ;;  %v7228_v28 = vor.u32 %v9069_v19, %v7227_v18  ;;  %v9090_v18 = vld [vmem:[#allocation6 + $0xc8] sm:$0xf0] }
 0x16d   :  { %10391 = vst [vmem:[#allocation2 + $0x1a0] sm:$0xff] %v9711_v27   ;;  %v9145_v27 = vld [vmem:[#allocation2 + $0xe8] sm:$0xff]  ;;  %v9087_v19 = vld [vmem:[#allocation6 + $0xb4] sm:$0xf] }
 0x16e   :  { %10399 = vst [vmem:[#allocation2 + $0x158] sm:$0xff] %v9751_v29   ;;  %v7236_v29 = vor.u32 %v9070_v24, %v7235_v23  ;;  %v9091_v23 = vld [vmem:[#allocation6 + $0xd0] sm:$0xf0]  ;;  %v7313_v24 = vld [vmem:[#allocation6 + $0xcc] sm:$0xf0] }
 0x170   :  { %v507_v30 = vpop.f32.mrf.mxu2 }
 0x171   :  { %v9631_v31 = vpack.c.bf16 %v507_v30, %v505_v20  ;;  %v653_v32 = vpop.f32.mrf.mxu3  ;;  %v7229_v20 = vld [vmem:[#allocation6 + $0x24] sm:$0xf0] }
 0x172   :  { %v9671_v33 = vpack.c.bf16 %v653_v32, %v651_v26  ;;  %v7237_v26 = vld [vmem:[#allocation6 + $0x2c] sm:$0xf0] }
 0x173   :  { %10375 = vst [vmem:[#allocation2 + $0x28] sm:$0xff] %v9631_v31   ;;  %v7232_v31 = vor.u32 %v9066_v22, %v7229_v20  ;;  %v7240_v32 = vor.u32 %v9067_v25, %v7237_v26  ;;  %v7319_v22 = vld [vmem:[#allocation6 + $0xb8] sm:$0xf]  ;;  %v9088_v20 = vld [vmem:[#allocation6 + $0xbc] sm:$0xf] }
 0x174   :  { %10383 = vst [vmem:[#allocation2 + $0xc8] sm:$0xff] %v9671_v33   ;;  %v9160_v7 = vld [vmem:[#allocation2 + $0x1a0] sm:$0xff]  ;;  %v7321_v25 = vld [vmem:[#allocation6 + $0xd4] sm:$0xf0] }
 0x175   :  { %v9168_v36 = vld [vmem:[#allocation2 + $0x158] sm:$0xff]  ;;  %2138 = vmatpush.bf16.msrb.mxu3 %v9160_v7 }
 0x176   :  { %2187 = vmatpush.bf16.msrb.mxu0 %v9168_v36 }
 0x178   :  { %v1054_v41 = vpop.f32.mrf.mxu2 }
 0x179   :  { %2139 = vmatpush.bf16.msrb.mxu3 %v9159_v39  ;;  %v9076_v39 = vld [vmem:[#allocation6 + $0x58] sm:$0xf0] }
 0x17a   :  { %v9144_v21 = vld [vmem:[#allocation2 + $0x28] sm:$0xff]  ;;  %2188 = vmatpush.bf16.msrb.mxu0 %v9167_v40  ;;  %1980 = vmatmul.bf16.gmra.mxu3 %v7388_v42  ;;  %v9073_v40 = vld [vmem:[#allocation6 + $0x44] sm:$0xf] }
 0x17b   :  { %v9152_v46 = vld [vmem:[#allocation2 + $0xc8] sm:$0xff]  ;;  %2040 = vmatpush.bf16.msra.mxu1 %v9144_v21  ;;  %2029 = vmatmul.bf16.gmra.mxu0 %v7392_v44  ;;  %v7257_v44 = vld [vmem:[#allocation6 + $0x5c] sm:$0xf0] }
 0x17c   :  { %2089 = vmatpush.bf16.msrb.mxu2 %v9152_v46  ;;  %v7263_v42 = vld [vmem:[#allocation6 + $0x48] sm:$0xf]  ;;  %v9074_v21 = vld [vmem:[#allocation6 + $0x4c] sm:$0xf] }
 0x17d   :  { %2140 = vmatpush.bf16.msrb.mxu3 %v9158_v45  ;;  %v7265_v45 = vld [vmem:[#allocation6 + $0x64] sm:$0xf0] }
 0x17e   :  { %2189 = vmatpush.bf16.msrb.mxu0 %v9166_v47 }
 0x17f   :  { %2041 = vmatpush.bf16.msra.mxu1 %v9143_v49 }
 0x180   :  { %v1056_v52 = vpop.f32.mrf.mxu2  ;;  %2090 = vmatpush.bf16.msrb.mxu2 %v9151_v48  ;;  %v7256_v48 = vor.u32 %v9076_v39, %v7255_v38  ;;  %v7339_v38 = vld [vmem:[#allocation6 + $0xe8] sm:$0xf]  ;;  %v9097_v39 = vld [vmem:[#allocation6 + $0x100] sm:$0xf0] }
 0x181   :  { %v9756_v53 = vpack.c.bf16 %v1056_v52, %v1054_v41  ;;  %2141 = vmatpush.bf16.msrb.mxu3 %v9157_v50  ;;  %v9077_v41 = vld [vmem:[#allocation6 + $0x60] sm:$0xf0]  ;;  %v7268_v52 = vor.u32 %v9074_v21, %v7265_v45  ;;  %v9095_v21 = vld [vmem:[#allocation6 + $0xf4] sm:$0xf]  ;;  %v7349_v45 = vld [vmem:[#allocation6 + $0x10c] sm:$0xf0] }
 0x182   :  { %2190 = vmatpush.bf16.msrb.mxu0 %v9165_v51  ;;  %v7264_v49 = vor.u32 %v9077_v41, %v7263_v42  ;;  %v7260_v51 = vor.u32 %v9073_v40, %v7257_v44  ;;  %v9094_v40 = vld [vmem:[#allocation6 + $0xec] sm:$0xf]  ;;  %v7347_v42 = vld [vmem:[#allocation6 + $0xf0] sm:$0xf]  ;;  %v7341_v44 = vld [vmem:[#allocation6 + $0x104] sm:$0xf0] }
 0x183   :  { %10400 = vst [vmem:[#allocation2 + $0x128] sm:$0xff] %v9756_v53   ;;  %2042 = vmatpush.bf16.msra.mxu1 %v9142_v55  ;;  %v9098_v41 = vld [vmem:[#allocation6 + $0x108] sm:$0xf0] }
 0x184   :  { %2091 = vmatpush.bf16.msrb.mxu2 %v9150_v54 }
 0x185   :  { %2142 = vmatpush.bf16.msrb.mxu3 %v9156_v56 }
 0x186   :  { %2191 = vmatpush.bf16.msrb.mxu0 %v9164_v57 }
 0x187   :  { %2043 = vmatpush.bf16.msra.mxu1 %v9141_v62  ;;  %v9084_v62 = vld [vmem:[#allocation6 + $0x98] sm:$0xf0] }
 0x188   :  { %v1059_v3 = vpop.f32.mrf.mxu2  ;;  %2092 = vmatpush.bf16.msrb.mxu2 %v9149_v60  ;;  %v9083_v60 = vld [vmem:[#allocation6 + $0x90] sm:$0xf0] }
 0x189   :  { %2143 = vmatpush.bf16.msrb.mxu3 %v9155_v63  ;;  %v7285_v63 = vld [vmem:[#allocation6 + $0x94] sm:$0xf0] }
 0x18a   :  { %2192 = vmatpush.bf16.msrb.mxu0 %v9163_v2  ;;  %1985 = vmatmul.bf16.gmra.mxu3 %v7416_v0  ;;  %v9081_v2 = vld [vmem:[#allocation6 + $0x84] sm:$0xf]  ;;  %v7293_v0 = vld [vmem:[#allocation6 + $0x9c] sm:$0xf0] }
 0x18b   :  { %2044 = vmatpush.bf16.msra.mxu1 %v9140_v8  ;;  %2034 = vmatmul.bf16.gmra.mxu0 %v7420_v4  ;;  %v7292_v8 = vor.u32 %v9084_v62, %v7291_v43  ;;  %v9104_v43 = vld [vmem:[#allocation6 + $0x138] sm:$0xf0]  ;;  %v9101_v62 = vld [vmem:[#allocation6 + $0x124] sm:$0xf] }
 0x18c   :  { %2093 = vmatpush.bf16.msrb.mxu2 %v9148_v5  ;;  %v7284_v5 = vor.u32 %v9083_v60, %v7283_v59 }
 0x18d   :  { %2144 = vmatpush.bf16.msrb.mxu3 %v9154_v10  ;;  %v7288_v10 = vor.u32 %v9080_v61, %v7285_v63  ;;  %v7367_v61 = vld [vmem:[#allocation6 + $0x120] sm:$0xf]  ;;  %v7375_v63 = vld [vmem:[#allocation6 + $0x128] sm:$0xf] }
 0x18e   :  { %2193 = vmatpush.bf16.msrb.mxu0 %v9162_v9 }
 0x18f   :  { %2045 = vmatpush.bf16.msra.mxu1 %v9139_v12 }
 0x190   :  { %v1061_v13 = vpop.f32.mrf.mxu2  ;;  %2094 = vmatpush.bf16.msrb.mxu2 %v9147_v11  ;;  %v7296_v11 = vor.u32 %v9081_v2, %v7293_v0  ;;  %v9105_v2 = vld [vmem:[#allocation6 + $0x140] sm:$0xf0]  ;;  %v7369_v0 = vld [vmem:[#allocation6 + $0x13c] sm:$0xf0] }
 0x191   :  { %v9761_v15 = vpack.c.bf16 %v1061_v13, %v1059_v3  ;;  %2145 = vmatpush.bf16.msrb.mxu3 %v9153_v14 }
 0x192   :  { %2194 = vmatpush.bf16.msrb.mxu0 %v9161_v16 }
 0x193   :  { %10401 = vst [vmem:[#allocation2 + $0x38] sm:$0xff] %v9761_v15   ;;  %2046 = vmatpush.bf16.msra.mxu1 %v9138_v17 }
 0x194   :  { %2095 = vmatpush.bf16.msrb.mxu2 %v9146_v1  ;;  %v7311_v1 = vld [vmem:[#allocation6 + $0xb0] sm:$0xf] }
 0x197   :  { %2047 = vmatpush.bf16.msra.mxu1 %v9137_v6 }
 0x198   :  { %v1064_v30 = vpop.f32.mrf.mxu2  ;;  %2096 = vmatpush.bf16.msrb.mxu2 %v9145_v27  ;;  %v2000_v33 = vpop.f32.mrf.mxu0  ;;  %v7312_v27 = vor.u32 %v9090_v18, %v7311_v1 }
 0x19a   :  { %2048 = vmatmul.bf16.vlgmr.msra.gmra.mxu1 %v7228_v28  ;;  %2146 = vmatmul.bf16.vlgmr.msrb.gmra.mxu3 %v7236_v29  ;;  %v7320_v28 = vor.u32 %v9091_v23, %v7319_v22  ;;  %v7395_v22 = vld [vmem:[#allocation6 + $0x158] sm:$0xf]  ;;  %v9111_v23 = vld [vmem:[#allocation6 + $0x170] sm:$0xf0] }
 0x19b   :  { %2097 = vmatmul.bf16.vlgmr.msrb.gmra.mxu2 %v7232_v31  ;;  %2195 = vmatmul.bf16.vlgmr.msrb.gmra.mxu0 %v7240_v32  ;;  %v7324_v31 = vor.u32 %v9088_v20, %v7321_v25  ;;  %v9112_v20 = vld [vmem:[#allocation6 + $0x178] sm:$0xf0] }
 0x19c   :  { %v9108_v25 = vld [vmem:[#allocation6 + $0x15c] sm:$0xf] }
 0x19d   :  { %v1951_v7 = vpop.f32.mrf.mxu3 }
 0x19e   :  { %v10863_v34 = vadd.f32 %v2000_v33, %v1951_v7 }
 0x1a0   :  { %v1066_v35 = vpop.f32.mrf.mxu2  ;;  %v2002_v37 = vpop.f32.mrf.mxu0 }
 0x1a1   :  { %v9766_v36 = vpack.c.bf16 %v1066_v35, %v1064_v30  ;;  %v7316_v30 = vor.u32 %v9087_v19, %v7313_v24  ;;  %v7403_v24 = vld [vmem:[#allocation6 + $0x160] sm:$0xf] }
 0x1a3   :  { %10402 = vst [vmem:[#allocation2 + $0x88] sm:$0xff] %v9766_v36  }
 0x1a5   :  { %v1953_v46 = vpop.f32.mrf.mxu3 }
 0x1a6   :  { %v10865_v47 = vadd.f32 %v2002_v37, %v1953_v46 }
 0x1a8   :  { %v1069_v50 = vpop.f32.mrf.mxu2  ;;  %v2005_v53 = vpop.f32.mrf.mxu0 }
 0x1aa   :  { %2053 = vmatmul.bf16.gmra.mxu1 %v7256_v48  ;;  %2151 = vmatmul.bf16.gmra.mxu3 %v7264_v49  ;;  %v7340_v49 = vor.u32 %v9097_v39, %v7339_v38 }
 0x1ab   :  { %2102 = vmatmul.bf16.gmra.mxu2 %v7260_v51  ;;  %2200 = vmatmul.bf16.gmra.mxu0 %v7268_v52  ;;  %v7344_v52 = vor.u32 %v9094_v40, %v7341_v44  ;;  %v9118_v44 = vld [vmem:[#allocation6 + $0x1a8] sm:$0xf0] }
 0x1ad   :  { %v1956_v54 = vpop.f32.mrf.mxu3 }
 0x1ae   :  { %v10867_v55 = vadd.f32 %v2005_v53, %v1956_v54  ;;  %v7352_v53 = vor.u32 %v9095_v21, %v7349_v45  ;;  %v7431_v21 = vld [vmem:[#allocation6 + $0x198] sm:$0xf]  ;;  %v9119_v45 = vld [vmem:[#allocation6 + $0x1b0] sm:$0xf0] }
 0x1b0   :  { %v1071_v56 = vpop.f32.mrf.mxu2  ;;  %v2007_v58 = vpop.f32.mrf.mxu0 }
 0x1b1   :  { %v9771_v57 = vpack.c.bf16 %v1071_v56, %v1069_v50  ;;  %v7348_v50 = vor.u32 %v9098_v41, %v7347_v42  ;;  %v7423_v42 = vld [vmem:[#allocation6 + $0x190] sm:$0xf] }
 0x1b3   :  { %10403 = vst [vmem:[#allocation2 + $0x170] sm:$0xff] %v9771_v57  }
 0x1b5   :  { %v1958_v3 = vpop.f32.mrf.mxu3 }
 0x1b6   :  { %v10869_v4 = vadd.f32 %v2007_v58, %v1958_v3  ;;  %v9102_v3 = vld [vmem:[#allocation6 + $0x12c] sm:$0xf] }
 0x1b8   :  { %v1074_v9 = vpop.f32.mrf.mxu2  ;;  %v2010_v12 = vpop.f32.mrf.mxu0 }
 0x1ba   :  { %2058 = vmatmul.bf16.gmra.mxu1 %v7284_v5  ;;  %2156 = vmatmul.bf16.gmra.mxu3 %v7292_v8  ;;  %v7377_v5 = vld [vmem:[#allocation6 + $0x144] sm:$0xf0] }
 0x1bb   :  { %2107 = vmatmul.bf16.gmra.mxu2 %v7288_v10  ;;  %2205 = vmatmul.bf16.gmra.mxu0 %v7296_v11  ;;  %v7376_v10 = vor.u32 %v9105_v2, %v7375_v63 }
 0x1bd   :  { %v1961_v13 = vpop.f32.mrf.mxu3 }
 0x1be   :  { %v10871_v14 = vadd.f32 %v2010_v12, %v1961_v13  ;;  %v7372_v12 = vor.u32 %v9101_v62, %v7369_v0  ;;  %v7380_v13 = vor.u32 %v9102_v3, %v7377_v5  ;;  %v9171_v62 = vld [vmem:[#allocation2 + $0x88] sm:$0xff]  ;;  %v9170_v0 = vld [vmem:[#allocation2 + $0x38] sm:$0xff]  ;;  %v9071_v5 = vld [vmem:[#allocation6 + $0x30] sm:$0xf0] }
 0x1bf   :  { %v7243_v3 = vld [vmem:[#allocation6 + $0x18] sm:$0xf] }
 0x1c0   :  { %v1076_v15 = vpop.f32.mrf.mxu2  ;;  %v2012_v17 = vpop.f32.mrf.mxu0 }
 0x1c1   :  { %v9776_v16 = vpack.c.bf16 %v1076_v15, %v1074_v9  ;;  %v7368_v9 = vor.u32 %v9104_v43, %v7367_v61  ;;  %v9172_v61 = vld [vmem:[#allocation2 + $0x170] sm:$0xff] }
 0x1c3   :  { %10404 = vst [vmem:[#allocation2 + $0x58] sm:$0xff] %v9776_v16  }
 0x1c5   :  { %v1963_v26 = vpop.f32.mrf.mxu3 }
 0x1c6   :  { %v10873_v6 = vadd.f32 %v2012_v17, %v1963_v26  ;;  %v7397_v26 = vld [vmem:[#allocation6 + $0x174] sm:$0xf0] }
 0x1c8   :  { %v1079_v29 = vpop.f32.mrf.mxu2  ;;  %v2015_v32 = vpop.f32.mrf.mxu0 }
 0x1ca   :  { %2063 = vmatmul.bf16.gmra.mxu1 %v7312_v27  ;;  %2161 = vmatmul.bf16.gmra.mxu3 %v7320_v28  ;;  %v9109_v28 = vld [vmem:[#allocation6 + $0x164] sm:$0xf] }
 0x1cb   :  { %2112 = vmatmul.bf16.gmra.mxu2 %v7316_v30  ;;  %2210 = vmatmul.bf16.gmra.mxu0 %v7324_v31  ;;  %v7396_v30 = vor.u32 %v9111_v23, %v7395_v22  ;;  %v7404_v31 = vor.u32 %v9112_v20, %v7403_v24 }
 0x1cd   :  { %v1966_v33 = vpop.f32.mrf.mxu3 }
 0x1ce   :  { %v10875_v7 = vadd.f32 %v2015_v32, %v1966_v33  ;;  %v7400_v32 = vor.u32 %v9108_v25, %v7397_v26  ;;  %v7299_v25 = vld [vmem:[#allocation6 + $0x88] sm:$0xf] }
 0x1d0   :  { %v1081_v35 = vpop.f32.mrf.mxu2  ;;  %v2017_v37 = vpop.f32.mrf.mxu0 }
 0x1d1   :  { %v9781_v36 = vpack.c.bf16 %v1081_v35, %v1079_v29  ;;  %v7405_v29 = vld [vmem:[#allocation6 + $0x17c] sm:$0xf0] }
 0x1d2   :  { %v7408_v33 = vor.u32 %v9109_v28, %v7405_v29 }
 0x1d3   :  { %10405 = vst [vmem:[#allocation2 + $0xf0] sm:$0xff] %v9781_v36  }
 0x1d5   :  { %v1968_v46 = vpop.f32.mrf.mxu3 }
 0x1d6   :  { %v10877_v48 = vadd.f32 %v2017_v37, %v1968_v46  ;;  %v9115_v46 = vld [vmem:[#allocation6 + $0x194] sm:$0xf] }
 0x1d8   :  { %v1084_v51 = vpop.f32.mrf.mxu2  ;;  %v2020_v54 = vpop.f32.mrf.mxu0 }
 0x1da   :  { %2068 = vmatmul.bf16.gmra.mxu1 %v7340_v49  ;;  %2166 = vmatmul.bf16.gmra.mxu3 %v7348_v50  ;;  %v9174_v40 = vld [vmem:[#allocation2 + $0xf0] sm:$0xff] }
 0x1db   :  { %2117 = vmatmul.bf16.gmra.mxu2 %v7344_v52  ;;  %2215 = vmatmul.bf16.gmra.mxu0 %v7352_v53  ;;  %v7425_v49 = vld [vmem:[#allocation6 + $0x1ac] sm:$0xf0]  ;;  %v9116_v52 = vld [vmem:[#allocation6 + $0x19c] sm:$0xf]  ;;  %v7433_v53 = vld [vmem:[#allocation6 + $0x1b4] sm:$0xf0] }
 0x1dd   :  { %v1971_v56 = vpop.f32.mrf.mxu3 }
 0x1de   :  { %v10879_v57 = vadd.f32 %v2020_v54, %v1971_v56  ;;  %v7424_v54 = vor.u32 %v9118_v44, %v7423_v42  ;;  %v7432_v56 = vor.u32 %v9119_v45, %v7431_v21  ;;  %v7383_v44 = vld [vmem:[#allocation6 + $0x130] sm:$0xf]  ;;  %v9106_v21 = vld [vmem:[#allocation6 + $0x148] sm:$0xf0] }
 0x1df   :  { %v7384_v45 = vor.u32 %v9106_v21, %v7383_v44  ;;  %v9202_v21 = vld [vmem:[#allocation8 + $0x288] sm:$0xff] }
 0x1e0   :  { %v1086_v58 = vpop.f32.mrf.mxu2  ;;  %v10881_v60 = vpop.f32.mrf.mxu0 }
 0x1e1   :  { %v9786_v59 = vpack.c.bf16 %v1086_v58, %v1084_v51  ;;  %v9173_v51 = vld [vmem:[#allocation2 + $0x58] sm:$0xff]  ;;  %v7428_v58 = vor.u32 %v9115_v46, %v7425_v49 }
 0x1e3   :  { %10406 = vst [vmem:[#allocation2 + $0x30] sm:$0xff] %v9786_v59   ;;  %v7436_v59 = vor.u32 %v9116_v52, %v7433_v53  ;;  %v9200_v52 = vld [vmem:[#allocation8 + $0x278] sm:$0xff] }
 0x1e4   :  { %v9208_v53 = vld [vmem:[#allocation8 + $0x2b8] sm:$0xff]  ;;  %2682 = vmatpush.bf16.msra.mxu0 %v9200_v52  ;;  %v9193_v52 = vld [vmem:[#allocation8 + $0x240] sm:$0xff] }
 0x1e5   :  { %v10883_v8 = vpop.f32.mrf.mxu3 }
 0x1e8   :  { %v1089_v11 = vpop.f32.mrf.mxu2  ;;  %v2025_v15 = vpop.f32.mrf.mxu0 }
 0x1ea   :  { %2073 = vmatmul.bf16.gmra.mxu1 %v7368_v9  ;;  %2171 = vmatmul.bf16.gmra.mxu3 %v7376_v10  ;;  %v9175_v38 = vld [vmem:[#allocation2 + $0x30] sm:$0xff]  ;;  %v9169_v9 = vld [vmem:[#allocation2 + $0x128] sm:$0xff]  ;;  %v7244_v10 = vor.u32 %v9071_v5, %v7243_v3 }
 0x1eb   :  { %2122 = vmatmul.bf16.gmra.mxu2 %v7372_v12  ;;  %2220 = vmatmul.bf16.gmra.mxu0 %v7380_v13  ;;  %v9206_v3 = vld [vmem:[#allocation8 + $0x2a8] sm:$0xff] }
 0x1ec   :  { %v7411_v5 = vld [vmem:[#allocation6 + $0x168] sm:$0xf] }
 0x1ed   :  { %v1976_v16 = vpop.f32.mrf.mxu3 }
 0x1ee   :  { %v10885_v17 = vadd.f32 %v2025_v15, %v1976_v16  ;;  %v7271_v16 = vld [vmem:[#allocation6 + $0x50] sm:$0xf] }
 0x1f0   :  { %v1091_v1 = vpop.f32.mrf.mxu2  ;;  %v10887_v19 = vpop.f32.mrf.mxu0 }
 0x1f1   :  { %v9791_v18 = vpack.c.bf16 %v1091_v1, %v1089_v11  ;;  %v9078_v1 = vld [vmem:[#allocation6 + $0x68] sm:$0xf0] }
 0x1f3   :  { %10407 = vst [vmem:[#allocation2 + $0x198] sm:$0xff] %v9791_v18   ;;  %v7272_v18 = vor.u32 %v9078_v1, %v7271_v16  ;;  %v9205_v1 = vld [vmem:[#allocation8 + $0x2a0] sm:$0xff] }
 0x1f5   :  { %v10889_v27 = vpop.f32.mrf.mxu3 }
 0x1f8   :  { %v2030_v36 = vpop.f32.mrf.mxu0 }
 0x1fa   :  { %v9176_v35 = vld [vmem:[#allocation2 + $0x198] sm:$0xff]  ;;  %2078 = vmatmul.bf16.gmra.mxu1 %v7396_v30  ;;  %2176 = vmatmul.bf16.gmra.mxu3 %v7404_v31  ;;  %v7327_v31 = vld [vmem:[#allocation6 + $0xc0] sm:$0xf] }
 0x1fb   :  { %2127 = vmatmul.bf16.gmra.mxu2 %v7400_v32  ;;  %2236 = vmatpush.bf16.msrb.mxu1 %v9176_v35 }
 0x1fc   :  { %2225 = vmatmul.bf16.gmra.mxu0 %v7408_v33 }
 0x1fd   :  { %v1981_v37 = vpop.f32.mrf.mxu3 }
 0x1fe   :  { %v10891_v39 = vadd.f32 %v2030_v36, %v1981_v37  ;;  %v7355_v37 = vld [vmem:[#allocation6 + $0xf8] sm:$0xf] }
 0x1ff   :  { %2237 = vmatpush.bf16.msrb.mxu1 %v9175_v38 }
 0x200   :  { %v10893_v41 = vpop.f32.mrf.mxu0 }
 0x203   :  { %2238 = vmatpush.bf16.msrb.mxu1 %v9174_v40 }
 0x205   :  { %v10895_v50 = vpop.f32.mrf.mxu3 }
 0x207   :  { %2239 = vmatpush.bf16.msrb.mxu1 %v9173_v51  ;;  %v9192_v51 = vld [vmem:[#allocation8 + $0x238] sm:$0xff] }
 0x208   :  { %v2035_v63 = vpop.f32.mrf.mxu0  ;;  %2536 = vmatpush.bf16.msra.mxu3 %v9192_v51  ;;  %v9185_v51 = vld [vmem:[#allocation8 + $0x200] sm:$0xff] }
 0x20a   :  { %2083 = vmatmul.bf16.gmra.mxu1 %v7424_v54  ;;  %2181 = vmatmul.bf16.gmra.mxu3 %v7432_v56  ;;  %v9183_v54 = vld [vmem:[#allocation8 + $0x1f0] sm:$0xff] }
 0x20b   :  { %2132 = vmatmul.bf16.gmra.mxu2 %v7428_v58  ;;  %2240 = vmatpush.bf16.msrb.mxu1 %v9172_v61  ;;  %v9191_v56 = vld [vmem:[#allocation8 + $0x230] sm:$0xff] }
 0x20c   :  { %2230 = vmatmul.bf16.gmra.mxu0 %v7436_v59  ;;  %v9199_v58 = vld [vmem:[#allocation8 + $0x270] sm:$0xff]  ;;  %2537 = vmatpush.bf16.msra.mxu3 %v9191_v56 }
 0x20d   :  { %v1986_v43 = vpop.f32.mrf.mxu3  ;;  %v9207_v61 = vld [vmem:[#allocation8 + $0x2b0] sm:$0xff]  ;;  %2683 = vmatpush.bf16.msra.mxu0 %v9199_v58 }
 0x20e   :  { %v10897_v2 = vadd.f32 %v2035_v63, %v1986_v43  ;;  %v9182_v43 = vld [vmem:[#allocation8 + $0x1e8] sm:$0xff] }
 0x20f   :  { %2241 = vmatpush.bf16.msrb.mxu1 %v9171_v62  ;;  %v9190_v62 = vld [vmem:[#allocation8 + $0x228] sm:$0xff] }
 0x210   :  { %v9198_v63 = vld [vmem:[#allocation8 + $0x268] sm:$0xff]  ;;  %2538 = vmatpush.bf16.msra.mxu3 %v9190_v62 }
 0x211   :  { %2684 = vmatpush.bf16.msra.mxu0 %v9198_v63 }
 0x213   :  { %2242 = vmatpush.bf16.msrb.mxu1 %v9170_v0 }
 0x217   :  { %v2049_v11 = vpop.f32.mrf.mxu1  ;;  %2243 = vmatpush.bf16.msrb.mxu1 %v9169_v9  ;;  %v9113_v9 = vld [vmem:[#allocation6 + $0x180] sm:$0xf0] }
 0x218   :  { %v10900_v12 = vadd.f32 %v2049_v11, %v10863_v34  ;;  %v9085_v34 = vld [vmem:[#allocation6 + $0xa0] sm:$0xf0] }
 0x219   :  { %v7300_v26 = vor.u32 %v9085_v34, %v7299_v25  ;;  %v9189_v11 = vld [vmem:[#allocation8 + $0x220] sm:$0xff]  ;;  %v9180_v34 = vld [vmem:[#allocation8 + $0x1d8] sm:$0xff] }
 0x21a   :  { %2244 = vmatmul.bf16.vlgmr.msrb.gmra.mxu1 %v7244_v10  ;;  %v9181_v10 = vld [vmem:[#allocation8 + $0x1e0] sm:$0xff]  ;;  %2539 = vmatpush.bf16.msra.mxu3 %v9189_v11 }
 0x21b   :  { %2828 = vmatpush.bf16.msra.mxu1 %v9208_v53 }
 0x21e   :  { %v10935_v59 = vpop.f32.mrf.mxu2 }
 0x21f   :  { %v2051_v13 = vpop.f32.mrf.mxu1  ;;  %2829 = vmatpush.bf16.msra.mxu1 %v9207_v61 }
 0x220   :  { %v10903_v15 = vadd.f32 %v2051_v13, %v10865_v47  ;;  %v9197_v13 = vld [vmem:[#allocation8 + $0x260] sm:$0xff] }
 0x221   :  { %2685 = vmatpush.bf16.msra.mxu0 %v9197_v13 }
 0x223   :  { %2830 = vmatpush.bf16.msra.mxu1 %v9206_v3 }
 0x227   :  { %v2054_v22 = vpop.f32.mrf.mxu1  ;;  %2831 = vmatpush.bf16.msra.mxu1 %v9205_v1 }
 0x228   :  { %v10906_v23 = vadd.f32 %v2054_v22, %v10867_v55  ;;  %v9092_v55 = vld [vmem:[#allocation6 + $0xd8] sm:$0xf0]  ;;  %v2100_v22 = vpop.f32.mrf.mxu2 }
 0x229   :  { %v7328_v32 = vor.u32 %v9092_v55, %v7327_v31  ;;  %v9179_v55 = vld [vmem:[#allocation8 + $0x1d0] sm:$0xff]  ;;  %v2101_v13 = vadd.f32 %v2100_v22, %v10903_v15 }
 0x22a   :  { %2249 = vmatmul.bf16.gmra.mxu1 %v7272_v18  ;;  %v7412_v18 = vor.u32 %v9113_v9, %v7411_v5  ;;  %v2099_v5 = vadd.f32 %v10935_v59, %v10900_v12 }
 0x22f   :  { %v2056_v24 = vpop.f32.mrf.mxu1 }
 0x230   :  { %v10909_v20 = vadd.f32 %v2056_v24, %v10869_v4  ;;  %v2103_v44 = vpop.f32.mrf.mxu2 }
 0x231   :  { %v2104_v59 = vadd.f32 %v2103_v44, %v10906_v23 }
 0x237   :  { %v2059_v28 = vpop.f32.mrf.mxu1 }
 0x238   :  { %v10912_v29 = vadd.f32 %v2059_v28, %v10871_v14  ;;  %v9099_v14 = vld [vmem:[#allocation6 + $0x110] sm:$0xf0]  ;;  %v9196_v28 = vld [vmem:[#allocation8 + $0x258] sm:$0xff]  ;;  %v2105_v62 = vpop.f32.mrf.mxu2 }
 0x239   :  { %v7356_v38 = vor.u32 %v9099_v14, %v7355_v37  ;;  %2686 = vmatpush.bf16.msra.mxu0 %v9196_v28  ;;  %v1126_v28 = vld [vmem:[#allocation9] sm:$0xff] }
 0x23a   :  { %2254 = vmatmul.bf16.gmra.mxu1 %v7300_v26  ;;  %v9188_v26 = vld [vmem:[#allocation8 + $0x218] sm:$0xff] }
 0x23b   :  { %2540 = vmatpush.bf16.msra.mxu3 %v9188_v26 }
 0x23f   :  { %v2061_v47 = vpop.f32.mrf.mxu1 }
 0x240   :  { %v10915_v30 = vadd.f32 %v2061_v47, %v10873_v6  ;;  %v9204_v47 = vld [vmem:[#allocation8 + $0x298] sm:$0xff] }
 0x241   :  { %2832 = vmatpush.bf16.msra.mxu1 %v9204_v47 }
 0x247   :  { %v2064_v33 = vpop.f32.mrf.mxu1 }
 0x248   :  { %v10918_v35 = vadd.f32 %v2064_v33, %v10875_v7  ;;  %v10928_v7 = vpop.f32.mrf.mxu3  ;;  %v9195_v33 = vld [vmem:[#allocation8 + $0x250] sm:$0xff] }
 0x249   :  { %2687 = vmatpush.bf16.msra.mxu0 %v9195_v33 }
 0x24a   :  { %2259 = vmatmul.bf16.gmra.mxu1 %v7328_v32  ;;  %v9187_v32 = vld [vmem:[#allocation8 + $0x210] sm:$0xff] }
 0x24b   :  { %2541 = vmatpush.bf16.msra.mxu3 %v9187_v32  ;;  %v1127_v32 = vld [vmem:[#allocation9 + $0x8] sm:$0xff] }
 0x24f   :  { %v2066_v4 = vpop.f32.mrf.mxu1 }
 0x250   :  { %v10921_v36 = vadd.f32 %v2066_v4, %v10877_v48  ;;  %v9184_v48 = vld [vmem:[#allocation8 + $0x1f8] sm:$0xff]  ;;  %v10939_v0 = vpop.f32.mrf.mxu3  ;;  %v9203_v4 = vld [vmem:[#allocation8 + $0x290] sm:$0xff] }
 0x251   :  { %2390 = vmatpush.bf16.msra.mxu2 %v9184_v48  ;;  %2833 = vmatpush.bf16.msra.mxu1 %v9203_v4  ;;  %v9177_v48 = vld [vmem:[#allocation8 + $0x1c0] sm:$0xff]  ;;  %v2148_v11 = vadd.f32 %v10939_v0, %v2099_v5 }
 0x255   :  { %2391 = vmatpush.bf16.msra.mxu2 %v9183_v54  ;;  %2834 = vmatpush.bf16.msra.mxu1 %v9202_v21  ;;  %v9201_v54 = vld [vmem:[#allocation8 + $0x280] sm:$0xff] }
 0x257   :  { %v2069_v40 = vpop.f32.mrf.mxu1 }
 0x258   :  { %v10924_v42 = vadd.f32 %v2069_v40, %v10879_v57  ;;  %v10933_v57 = vpop.f32.mrf.mxu0  ;;  %v2149_v31 = vpop.f32.mrf.mxu3  ;;  %v9194_v40 = vld [vmem:[#allocation8 + $0x248] sm:$0xff] }
 0x259   :  { %2392 = vmatpush.bf16.msra.mxu2 %v9182_v43  ;;  %2688 = vmatpush.bf16.msra.mxu0 %v9194_v40  ;;  %v2106_v40 = vadd.f32 %v2105_v62, %v10909_v20  ;;  %v1129_v20 = vld [vmem:[#allocation9 + $0x18] sm:$0xff] }
 0x25a   :  { %2264 = vmatmul.bf16.gmra.mxu1 %v7356_v38  ;;  %v9186_v38 = vld [vmem:[#allocation8 + $0x208] sm:$0xff] }
 0x25b   :  { %2542 = vmatpush.bf16.msra.mxu3 %v9186_v38  ;;  %2835 = vmatpush.bf16.msra.mxu1 %v9201_v54 }
 0x25d   :  { %2393 = vmatpush.bf16.msra.mxu2 %v9181_v10  ;;  %2689 = vmatpush.bf16.msra.mxu0 %v9193_v52  ;;  %v2108_v10 = vpop.f32.mrf.mxu2 }
 0x25f   :  { %v10926_v6 = vpop.f32.mrf.mxu1  ;;  %2543 = vmatpush.bf16.msra.mxu3 %v9185_v51 }
 0x260   :  { %v10941_v16 = vpop.f32.mrf.mxu0  ;;  %v2152_v53 = vpop.f32.mrf.mxu3 }
 0x261   :  { %2394 = vmatpush.bf16.msra.mxu2 %v9180_v34  ;;  %v2153_v22 = vadd.f32 %v2152_v53, %v2104_v59 }
 0x265   :  { %2395 = vmatpush.bf16.msra.mxu2 %v9179_v55  ;;  %v2110_v55 = vpop.f32.mrf.mxu2 }
 0x267   :  { %v2074_v46 = vpop.f32.mrf.mxu1 }
 0x268   :  { %v10931_v49 = vadd.f32 %v2074_v46, %v10885_v17  ;;  %v2198_v37 = vpop.f32.mrf.mxu0  ;;  %v9120_v46 = vld [vmem:[#allocation6 + $0x1b8] sm:$0xf0]  ;;  %v2154_v63 = vpop.f32.mrf.mxu3 }
 0x269   :  { %v2155_v44 = vadd.f32 %v2154_v63, %v2106_v40 }
 0x26a   :  { %2269 = vmatmul.bf16.gmra.mxu1 %v7384_v45  ;;  %v7439_v45 = vld [vmem:[#allocation6 + $0x1a0] sm:$0xf] }
 0x26b   :  { %v7440_v56 = vor.u32 %v9120_v46, %v7439_v45 }
 0x26f   :  { %v10937_v17 = vpop.f32.mrf.mxu1 }
 0x270   :  { %v2201_v43 = vpop.f32.mrf.mxu0 }
 0x271   :  { %v2202_v23 = vadd.f32 %v2201_v43, %v2153_v22 }
 0x277   :  { %v2079_v24 = vpop.f32.mrf.mxu1 }
 0x278   :  { %v10944_v25 = vadd.f32 %v2079_v24, %v10891_v39  ;;  %v9178_v39 = vld [vmem:[#allocation8 + $0x1c8] sm:$0xff]  ;;  %v2203_v9 = vpop.f32.mrf.mxu0  ;;  %v2150_v24 = vadd.f32 %v2149_v31, %v2101_v13 }
 0x279   :  { %2396 = vmatpush.bf16.msra.mxu2 %v9178_v39  ;;  %v2204_v51 = vadd.f32 %v2203_v9, %v2155_v44  ;;  %v1132_v44 = vld [vmem:[#allocation9 + $0x30] sm:$0xff] }
 0x27a   :  { %2274 = vmatmul.bf16.gmra.mxu1 %v7412_v18  ;;  %v2157_v18 = vpop.f32.mrf.mxu3  ;;  %v2199_v47 = vadd.f32 %v2198_v37, %v2150_v24  ;;  %v2113_v37 = vpop.f32.mrf.mxu2 }
 0x27d   :  { %2397 = vmatpush.bf16.msra.mxu2 %v9177_v48  ;;  %v1128_v48 = vld [vmem:[#allocation9 + $0x10] sm:$0xff] }
 0x27f   :  { %v10946_v14 = vpop.f32.mrf.mxu1 }
 0x280   :  { %v2206_v26 = vpop.f32.mrf.mxu0 }
 0x282   :  { %v2159_v0 = vpop.f32.mrf.mxu3  ;;  %v2115_v5 = vpop.f32.mrf.mxu2 }
 0x287   :  { %v2084_v58 = vpop.f32.mrf.mxu1 }
 0x288   :  { %v10949_v61 = vadd.f32 %v2084_v58, %v10897_v2  ;;  %v2197_v2 = vadd.f32 %v10941_v16, %v2148_v11  ;;  %v2208_v31 = vpop.f32.mrf.mxu0  ;;  %v2109_v58 = vadd.f32 %v2108_v10, %v10912_v29 }
 0x28a   :  { %2279 = vmatmul.bf16.gmra.mxu1 %v7440_v56  ;;  %v2162_v46 = vpop.f32.mrf.mxu3 }
 0x28f   :  { %v10951_v3 = vpop.f32.mrf.mxu1 }
 0x290   :  { %v2211_v56 = vpop.f32.mrf.mxu0 }
 0x292   :  { %v2164_v63 = vpop.f32.mrf.mxu3 }
 0x297   :  { %v2245_v1 = vpop.f32.mrf.mxu1 }
 0x298   :  { %v2246_v34 = vadd.f32 %v2245_v1, %v2197_v2  ;;  %v2158_v1 = vadd.f32 %v2157_v18, %v2109_v58  ;;  %v2111_v2 = vadd.f32 %v2110_v55, %v10915_v30  ;;  %v2213_v10 = vpop.f32.mrf.mxu0  ;;  %v1130_v18 = vld [vmem:[#allocation9 + $0x20] sm:$0xff]  ;;  %v1131_v30 = vld [vmem:[#allocation9 + $0x28] sm:$0xff] }
 0x29a   :  { %v2285_v4 = vadd.f32 %v2246_v34, %v1126_v28  ;;  %v2207_v29 = vadd.f32 %v2206_v26, %v2158_v1  ;;  %v2160_v9 = vadd.f32 %v2159_v0, %v2111_v2  ;;  %v2118_v28 = vpop.f32.mrf.mxu2  ;;  %v2116_v26 = vadd.f32 %v2115_v5, %v10921_v36  ;;  %v1133_v36 = vld [vmem:[#allocation9 + $0x38] sm:$0xff] }
 0x29c   :  { %v2301_v38 = vmax.f32 %v2285_v4, 0.0  ;;  %v2167_v4 = vpop.f32.mrf.mxu3 }
 0x29f   :  { %v2247_v33 = vpop.f32.mrf.mxu1 }
 0x2a0   :  { %v2248_v12 = vadd.f32 %v2247_v33, %v2199_v47  ;;  %v2209_v47 = vadd.f32 %v2208_v31, %v2160_v9  ;;  %v2165_v31 = vadd.f32 %v2164_v63, %v2116_v26 }
 0x2a2   :  { %v2286_v39 = vadd.f32 %v2248_v12, %v1127_v32  ;;  %v2114_v12 = vadd.f32 %v2113_v37, %v10918_v35  ;;  %v2120_v40 = vpop.f32.mrf.mxu2 }
 0x2a4   :  { %v2302_v15 = vmax.f32 %v2286_v39, 0.0  ;;  %v2163_v22 = vadd.f32 %v2162_v46, %v2114_v12  ;;  %v2169_v37 = vpop.f32.mrf.mxu3 }
 0x2a6   :  { %v10960_v16 = vpack.c.bf16 %v2302_v15, %v2301_v38  ;;  %v2216_v15 = vpop.f32.mrf.mxu0  ;;  %v2212_v35 = vadd.f32 %v2211_v56, %v2163_v22 }
 0x2a7   :  { %v2250_v21 = vpop.f32.mrf.mxu1 }
 0x2a8   :  { %2398 = vmatmul.bf16.vlgmr.msra.gmra.mxu2 %v10960_v16  ;;  %2544 = vmatmul.bf16.vlgmr.msra.gmra.mxu3 %v10960_v16  ;;  %v2251_v45 = vadd.f32 %v2250_v21, %v2202_v23 }
 0x2a9   :  { %2690 = vmatmul.bf16.vlgmr.msra.gmra.mxu0 %v10960_v16  ;;  %2836 = vmatmul.bf16.vlgmr.msra.gmra.mxu1 %v10960_v16 }
 0x2aa   :  { %v2287_v53 = vadd.f32 %v2251_v45, %v1128_v48  ;;  %v2214_v45 = vadd.f32 %v2213_v10, %v2165_v31  ;;  %v9215_v31 = vld [vmem:[#allocation8 + $0x2f0] sm:$0xff] }
 0x2ac   :  { %v2303_v11 = vmax.f32 %v2287_v53, 0.0  ;;  %v2023_v53 = vadd.f32 %v10881_v60, %v10883_v8 }
 0x2ae   :  { %v2218_v46 = vpop.f32.mrf.mxu0 }
 0x2af   :  { %v2252_v52 = vpop.f32.mrf.mxu1 }
 0x2b0   :  { %v2253_v54 = vadd.f32 %v2252_v52, %v2204_v51  ;;  %v2123_v52 = vpop.f32.mrf.mxu2 }
 0x2b2   :  { %v2288_v62 = vadd.f32 %v2253_v54, %v1129_v20  ;;  %v2119_v54 = vadd.f32 %v2118_v28, %v10924_v42 }
 0x2b4   :  { %v2304_v13 = vmax.f32 %v2288_v62, 0.0  ;;  %v2072_v62 = vadd.f32 %v10926_v6, %v2023_v53  ;;  %v9214_v53 = vld [vmem:[#allocation8 + $0x2e8] sm:$0xff] }
 0x2b6   :  { %v10968_v43 = vpack.c.bf16 %v2304_v13, %v2303_v11  ;;  %v2172_v11 = vpop.f32.mrf.mxu3  ;;  %v2168_v13 = vadd.f32 %v2167_v4, %v2119_v54  ;;  %v2121_v1 = vadd.f32 %v2120_v40, %v2072_v62  ;;  %v9216_v40 = vld [vmem:[#allocation8 + $0x2f8] sm:$0xff]  ;;  %v9222_v54 = vld [vmem:[#allocation8 + $0x328] sm:$0xff]  ;;  %v2033_v62 = vadd.f32 %v10893_v41, %v10895_v50 }
 0x2b7   :  { %v2255_v24 = vpop.f32.mrf.mxu1  ;;  %2974 = vmatpush.bf16.msrb.mxu2 %v9216_v40 }
 0x2b8   :  { %2403 = vmatmul.bf16.gmra.mxu2 %v10968_v43  ;;  %2549 = vmatmul.bf16.gmra.mxu3 %v10968_v43  ;;  %v2256_v34 = vadd.f32 %v2255_v24, %v2207_v29  ;;  %v2221_v24 = vpop.f32.mrf.mxu0  ;;  %v2217_v60 = vadd.f32 %v2216_v15, %v2168_v13  ;;  %v2170_v8 = vadd.f32 %v2169_v37, %v2121_v1  ;;  %v2125_v42 = vpop.f32.mrf.mxu2  ;;  %v1134_v29 = vld [vmem:[#allocation9 + $0x40] sm:$0xff]  ;;  %v9223_v37 = vld [vmem:[#allocation8 + $0x330] sm:$0xff] }
 0x2b9   :  { %2695 = vmatmul.bf16.gmra.mxu0 %v10968_v43  ;;  %2841 = vmatmul.bf16.gmra.mxu1 %v10968_v43  ;;  %v2082_v13 = vadd.f32 %v10946_v14, %v2033_v62  ;;  %v9220_v14 = vld [vmem:[#allocation8 + $0x318] sm:$0xff] }
 0x2ba   :  { %v2289_v32 = vadd.f32 %v2256_v34, %v1130_v18  ;;  %v2219_v9 = vadd.f32 %v2218_v46, %v2170_v8  ;;  %v1135_v34 = vld [vmem:[#allocation9 + $0x48] sm:$0xff]  ;;  %v9229_v8 = vld [vmem:[#allocation8 + $0x360] sm:$0xff] }
 0x2bb   :  { %2975 = vmatpush.bf16.msrb.mxu2 %v9215_v31 }
 0x2bc   :  { %v2305_v39 = vmax.f32 %v2289_v32, 0.0 }
 0x2be   :  { %v2174_v10 = vpop.f32.mrf.mxu3 }
 0x2bf   :  { %v2257_v55 = vpop.f32.mrf.mxu1  ;;  %2976 = vmatpush.bf16.msrb.mxu2 %v9214_v53 }
 0x2c0   :  { %v2258_v33 = vadd.f32 %v2257_v55, %v2209_v47  ;;  %v2124_v55 = vadd.f32 %v2123_v52, %v10931_v49 }
 0x2c2   :  { %v2290_v59 = vadd.f32 %v2258_v33, %v1131_v30  ;;  %v2028_v30 = vadd.f32 %v10887_v19, %v10889_v27  ;;  %v2223_v33 = vpop.f32.mrf.mxu0  ;;  %v9224_v19 = vld [vmem:[#allocation8 + $0x338] sm:$0xff] }
 0x2c3   :  { %v9232_v27 = vld [vmem:[#allocation8 + $0x378] sm:$0xff]  ;;  %3120 = vmatpush.bf16.msrb.mxu3 %v9224_v19 }
 0x2c4   :  { %v2306_v38 = vmax.f32 %v2290_v59, 0.0  ;;  %v2077_v4 = vadd.f32 %v10937_v17, %v2028_v30  ;;  %3266 = vmatpush.bf16.msrb.mxu0 %v9232_v27  ;;  %v9227_v30 = vld [vmem:[#allocation8 + $0x350] sm:$0xff]  ;;  %v2038_v27 = vadd.f32 %v10933_v57, %v10928_v7 }
 0x2c6   :  { %v10976_v0 = vpack.c.bf16 %v2306_v38, %v2305_v39  ;;  %v2128_v39 = vpop.f32.mrf.mxu2  ;;  %v2173_v38 = vadd.f32 %v2172_v11, %v2124_v55  ;;  %v2126_v15 = vadd.f32 %v2125_v42, %v2077_v4  ;;  %v2177_v49 = vpop.f32.mrf.mxu3 }
 0x2c7   :  { %v2260_v21 = vpop.f32.mrf.mxu1  ;;  %3121 = vmatpush.bf16.msrb.mxu3 %v9223_v37 }
 0x2c8   :  { %2408 = vmatmul.bf16.gmra.mxu2 %v10976_v0  ;;  %2554 = vmatmul.bf16.gmra.mxu3 %v10976_v0  ;;  %v2261_v23 = vadd.f32 %v2260_v21, %v2212_v35  ;;  %v2222_v17 = vadd.f32 %v2221_v24, %v2173_v38  ;;  %v2175_v21 = vadd.f32 %v2174_v10, %v2126_v15  ;;  %v9213_v24 = vld [vmem:[#allocation8 + $0x2e0] sm:$0xff]  ;;  %v9226_v15 = vld [vmem:[#allocation8 + $0x348] sm:$0xff] }
 0x2c9   :  { %2700 = vmatmul.bf16.gmra.mxu0 %v10976_v0  ;;  %2846 = vmatmul.bf16.gmra.mxu1 %v10976_v0 }
 0x2ca   :  { %v2291_v51 = vadd.f32 %v2261_v23, %v1132_v44  ;;  %v9231_v23 = vld [vmem:[#allocation8 + $0x370] sm:$0xff]  ;;  %v2226_v44 = vpop.f32.mrf.mxu0  ;;  %v2224_v46 = vadd.f32 %v2223_v33, %v2175_v21  ;;  %2977 = vmatpush.bf16.msrb.mxu2 %v9213_v24  ;;  %v1138_v33 = vld [vmem:[#allocation9 + $0x60] sm:$0xff] }
 0x2cb   :  { %3267 = vmatpush.bf16.msrb.mxu0 %v9231_v23  ;;  %3122 = vmatpush.bf16.msrb.mxu3 %v9222_v54  ;;  %v9209_v23 = vld [vmem:[#allocation8 + $0x2c0] sm:$0xff]  ;;  %v1141_v54 = vld [vmem:[#allocation9 + $0x78] sm:$0xff] }
 0x2cc   :  { %v2307_v56 = vmax.f32 %v2291_v51, 0.0 }
 0x2ce   :  { %v2179_v11 = vpop.f32.mrf.mxu3 }
 0x2cf   :  { %v2262_v48 = vpop.f32.mrf.mxu1 }
 0x2d0   :  { %v2263_v20 = vadd.f32 %v2262_v48, %v2214_v45  ;;  %v1136_v45 = vld [vmem:[#allocation9 + $0x50] sm:$0xff]  ;;  %v1137_v48 = vld [vmem:[#allocation9 + $0x58] sm:$0xff] }
 0x2d2   :  { %v2292_v58 = vadd.f32 %v2263_v20, %v1133_v36  ;;  %v2130_v36 = vpop.f32.mrf.mxu2  ;;  %v2228_v41 = vpop.f32.mrf.mxu0 }
 0x2d4   :  { %v2308_v5 = vmax.f32 %v2292_v58, 0.0  ;;  %v9230_v58 = vld [vmem:[#allocation8 + $0x368] sm:$0xff] }
 0x2d5   :  { %3268 = vmatpush.bf16.msrb.mxu0 %v9230_v58 }
 0x2d6   :  { %v10986_v2 = vpack.c.bf16 %v2308_v5, %v2307_v56  ;;  %v2129_v56 = vadd.f32 %v2128_v39, %v10944_v25  ;;  %v9212_v25 = vld [vmem:[#allocation8 + $0x2d8] sm:$0xff]  ;;  %v1139_v39 = vld [vmem:[#allocation9 + $0x68] sm:$0xff] }
 0x2d7   :  { %v2265_v63 = vpop.f32.mrf.mxu1  ;;  %2978 = vmatpush.bf16.msrb.mxu2 %v9212_v25 }
 0x2d8   :  { %2413 = vmatmul.bf16.gmra.mxu2 %v10986_v2  ;;  %2559 = vmatmul.bf16.gmra.mxu3 %v10986_v2  ;;  %v2266_v6 = vadd.f32 %v2265_v63, %v2217_v60  ;;  %v9221_v60 = vld [vmem:[#allocation8 + $0x320] sm:$0xff]  ;;  %v2178_v42 = vadd.f32 %v2177_v49, %v2129_v56 }
 0x2d9   :  { %2705 = vmatmul.bf16.gmra.mxu0 %v10986_v2  ;;  %2851 = vmatmul.bf16.gmra.mxu1 %v10986_v2 }
 0x2da   :  { %v2293_v18 = vadd.f32 %v2266_v6, %v1134_v29  ;;  %v2131_v6 = vadd.f32 %v2130_v36, %v2082_v13  ;;  %3123 = vmatpush.bf16.msrb.mxu3 %v9221_v60  ;;  %3269 = vmatpush.bf16.msrb.mxu0 %v9229_v8  ;;  %v2133_v10 = vpop.f32.mrf.mxu2  ;;  %v2231_v19 = vpop.f32.mrf.mxu0 }
 0x2db   :  { %v2134_v49 = vadd.f32 %v2133_v10, %v10949_v61 }
 0x2dc   :  { %v2309_v12 = vmax.f32 %v2293_v18, 0.0  ;;  %v9211_v18 = vld [vmem:[#allocation8 + $0x2d0] sm:$0xff] }
 0x2dd   :  { %2979 = vmatpush.bf16.msrb.mxu2 %v9211_v18 }
 0x2de   :  { %3124 = vmatpush.bf16.msrb.mxu3 %v9220_v14 }
 0x2df   :  { %v2267_v28 = vpop.f32.mrf.mxu1 }
 0x2e0   :  { %v2268_v47 = vadd.f32 %v2267_v28, %v2219_v9  ;;  %v9228_v9 = vld [vmem:[#allocation8 + $0x358] sm:$0xff]  ;;  %v2180_v28 = vadd.f32 %v2179_v11, %v2131_v6 }
 0x2e1   :  { %3270 = vmatpush.bf16.msrb.mxu0 %v9228_v9 }
 0x2e2   :  { %v2294_v32 = vadd.f32 %v2268_v47, %v1135_v34  ;;  %v2227_v34 = vadd.f32 %v2226_v44, %v2178_v42  ;;  %v9219_v47 = vld [vmem:[#allocation8 + $0x310] sm:$0xff]  ;;  %v2229_v4 = vadd.f32 %v2228_v41, %v2180_v28  ;;  %v2135_v21 = vpop.f32.mrf.mxu2  ;;  %v9217_v44 = vld [vmem:[#allocation8 + $0x300] sm:$0xff] }
 0x2e3   :  { %3125 = vmatpush.bf16.msrb.mxu3 %v9219_v47 }
 0x2e4   :  { %v2310_v59 = vmax.f32 %v2294_v32, 0.0  ;;  %v2182_v32 = vpop.f32.mrf.mxu3 }
 0x2e5   :  { %3271 = vmatpush.bf16.msrb.mxu0 %v9227_v30 }
 0x2e6   :  { %v10996_v22 = vpack.c.bf16 %v2310_v59, %v2309_v12  ;;  %v9210_v12 = vld [vmem:[#allocation8 + $0x2c8] sm:$0xff] }
 0x2e7   :  { %v2270_v26 = vpop.f32.mrf.mxu1  ;;  %v9218_v59 = vld [vmem:[#allocation8 + $0x308] sm:$0xff]  ;;  %2980 = vmatpush.bf16.msrb.mxu2 %v9210_v12 }
 0x2e8   :  { %2418 = vmatmul.bf16.gmra.mxu2 %v10996_v22  ;;  %2564 = vmatmul.bf16.gmra.mxu3 %v10996_v22  ;;  %v2271_v35 = vadd.f32 %v2270_v26, %v2222_v17 }
 0x2e9   :  { %2710 = vmatmul.bf16.gmra.mxu0 %v10996_v22  ;;  %2856 = vmatmul.bf16.gmra.mxu1 %v10996_v22 }
 0x2ea   :  { %v2295_v20 = vadd.f32 %v2271_v35, %v1136_v45  ;;  %3126 = vmatpush.bf16.msrb.mxu3 %v9218_v59  ;;  %3272 = vmatpush.bf16.msrb.mxu0 %v9226_v15  ;;  %v2087_v35 = vadd.f32 %v10951_v3, %v2038_v27  ;;  %v9225_v45 = vld [vmem:[#allocation8 + $0x340] sm:$0xff] }
 0x2eb   :  { %2981 = vmatpush.bf16.msrb.mxu2 %v9209_v23 }
 0x2ec   :  { %v2311_v1 = vmax.f32 %v2295_v20, 0.0  ;;  %v2136_v36 = vadd.f32 %v2135_v21, %v2087_v35  ;;  %v2184_v7 = vpop.f32.mrf.mxu3 }
 0x2ee   :  { %3127 = vmatpush.bf16.msrb.mxu3 %v9217_v44  ;;  %3273 = vmatpush.bf16.msrb.mxu0 %v9225_v45  ;;  %v2185_v3 = vadd.f32 %v2184_v7, %v2136_v36 }
 0x2ef   :  { %v2272_v51 = vpop.f32.mrf.mxu1 }
 0x2f0   :  { %v2273_v52 = vadd.f32 %v2272_v51, %v2224_v46  ;;  %v2183_v46 = vadd.f32 %v2182_v32, %v2134_v49  ;;  %v2233_v51 = vpop.f32.mrf.mxu0 }
 0x2f1   :  { %v2234_v53 = vadd.f32 %v2233_v51, %v2185_v3 }
 0x2f2   :  { %v2296_v5 = vadd.f32 %v2273_v52, %v1137_v48  ;;  %v2232_v61 = vadd.f32 %v2231_v19, %v2183_v46  ;;  %v1140_v52 = vld [vmem:[#allocation9 + $0x70] sm:$0xff] }
 0x2f4   :  { %v2312_v63 = vmax.f32 %v2296_v5, 0.0 }
 0x2f6   :  { %v11006_v29 = vpack.c.bf16 %v2312_v63, %v2311_v1 }
 0x2f7   :  { %v2275_v50 = vpop.f32.mrf.mxu1 }
 0x2f8   :  { %2423 = vmatmul.bf16.gmra.mxu2 %v11006_v29  ;;  %2569 = vmatmul.bf16.gmra.mxu3 %v11006_v29  ;;  %v2276_v55 = vadd.f32 %v2275_v50, %v2227_v34 }
 0x2f9   :  { %2715 = vmatmul.bf16.gmra.mxu0 %v11006_v29  ;;  %2861 = vmatmul.bf16.gmra.mxu1 %v11006_v29 }
 0x2fa   :  { %v2297_v26 = vadd.f32 %v2276_v55, %v1138_v33 }
 0x2fc   :  { %v2313_v31 = vmax.f32 %v2297_v26, 0.0 }
 0x2ff   :  { %v2277_v38 = vpop.f32.mrf.mxu1 }
 0x300   :  { %v2278_v40 = vadd.f32 %v2277_v38, %v2229_v4 }
 0x302   :  { %v2298_v17 = vadd.f32 %v2278_v40, %v1139_v39 }
 0x304   :  { %v2314_v37 = vmax.f32 %v2298_v17, 0.0 }
 0x306   :  { %v11016_v48 = vpack.c.bf16 %v2314_v37, %v2313_v31 }
 0x307   :  { %v2280_v57 = vpop.f32.mrf.mxu1 }
 0x308   :  { %2428 = vmatmul.bf16.gmra.mxu2 %v11016_v48  ;;  %2574 = vmatmul.bf16.gmra.mxu3 %v11016_v48  ;;  %v2281_v20 = vadd.f32 %v2280_v57, %v2232_v61 }
 0x309   :  { %2720 = vmatmul.bf16.gmra.mxu0 %v11016_v48  ;;  %2866 = vmatmul.bf16.gmra.mxu1 %v11016_v48 }
 0x30a   :  { %v2299_v62 = vadd.f32 %v2281_v20, %v1140_v52 }
 0x30c   :  { %v2315_v11 = vmax.f32 %v2299_v62, 0.0 }
 0x30f   :  { %v2282_v58 = vpop.f32.mrf.mxu1 }
 0x310   :  { %v2283_v56 = vadd.f32 %v2282_v58, %v2234_v53 }
 0x312   :  { %v2300_v5 = vadd.f32 %v2283_v56, %v1141_v54 }
 0x314   :  { %v2316_v13 = vmax.f32 %v2300_v5, 0.0 }
 0x316   :  { %v11022_v1 = vpack.c.bf16 %v2316_v13, %v2315_v11 }
 0x318   :  { %2433 = vmatmul.bf16.gmra.mxu2 %v11022_v1  ;;  %2579 = vmatmul.bf16.gmra.mxu3 %v11022_v1 }
 0x319   :  { %2725 = vmatmul.bf16.gmra.mxu0 %v11022_v1  ;;  %2871 = vmatmul.bf16.gmra.mxu1 %v11022_v1 }
 0x326   :  { %v2691_v63 = vpop.f32.mrf.mxu0  ;;  %v2837_v24 = vpop.f32.mrf.mxu1 }
 0x328   :  { %2982 = vmatmul.bf16.vlgmr.msrb.gmra.mxu2 %v10960_v16  ;;  %3128 = vmatmul.bf16.vlgmr.msrb.gmra.mxu3 %v10960_v16 }
 0x329   :  { %3274 = vmatmul.bf16.vlgmr.msrb.gmra.mxu0 %v10960_v16 }
 0x32b   :  { %v2399_v60 = vpop.f32.mrf.mxu2  ;;  %v2545_v8 = vpop.f32.mrf.mxu3 }
 0x32e   :  { %v2693_v42 = vpop.f32.mrf.mxu0  ;;  %v2839_v6 = vpop.f32.mrf.mxu1 }
 0x32f   :  { %v9876_v41 = vpack.c.bf16 %v2693_v42, %v2691_v63  ;;  %v9916_v50 = vpack.c.bf16 %v2839_v6, %v2837_v24 }
 0x331   :  { %10423 = vst [vmem:[#allocation2 + $0xe0] sm:$0xff] %v9876_v41  }
 0x332   :  { %10431 = vst [vmem:[#allocation2 + $0xe8] sm:$0xff] %v9916_v50  }
 0x333   :  { %v2401_v25 = vpop.f32.mrf.mxu2  ;;  %v2547_v14 = vpop.f32.mrf.mxu3 }
 0x334   :  { %v9796_v9 = vpack.c.bf16 %v2401_v25, %v2399_v60  ;;  %v9836_v10 = vpack.c.bf16 %v2547_v14, %v2545_v8 }
 0x336   :  { %9797 = vst [vmem:[#allocation2 + $0xb0] sm:$0xff] %v9796_v9   ;;  %v2696_v34 = vpop.f32.mrf.mxu0  ;;  %v2842_v28 = vpop.f32.mrf.mxu1 }
 0x337   :  { %10415 = vst [vmem:[#allocation2 + $0x180] sm:$0xff] %v9836_v10  }
 0x338   :  { %2987 = vmatmul.bf16.gmra.mxu2 %v10968_v43  ;;  %3133 = vmatmul.bf16.gmra.mxu3 %v10968_v43 }
 0x339   :  { %3279 = vmatmul.bf16.gmra.mxu0 %v10968_v43 }
 0x33b   :  { %v2404_v16 = vpop.f32.mrf.mxu2  ;;  %v2550_v18 = vpop.f32.mrf.mxu3 }
 0x33e   :  { %v2698_v47 = vpop.f32.mrf.mxu0  ;;  %v2844_v30 = vpop.f32.mrf.mxu1 }
 0x33f   :  { %v9881_v55 = vpack.c.bf16 %v2698_v47, %v2696_v34  ;;  %v9921_v32 = vpack.c.bf16 %v2844_v30, %v2842_v28 }
 0x341   :  { %10424 = vst [vmem:[#allocation2 + $0x188] sm:$0xff] %v9881_v55  }
 0x342   :  { %10432 = vst [vmem:[#allocation2 + $0xf8] sm:$0xff] %v9921_v32  }
 0x343   :  { %v2406_v33 = vpop.f32.mrf.mxu2  ;;  %v2552_v4 = vpop.f32.mrf.mxu3 }
 0x344   :  { %v9801_v12 = vpack.c.bf16 %v2406_v33, %v2404_v16  ;;  %v9841_v59 = vpack.c.bf16 %v2552_v4, %v2550_v18 }
 0x346   :  { %10408 = vst [vmem:[#allocation2 + $0x1b0] sm:$0xff] %v9801_v12   ;;  %v2701_v39 = vpop.f32.mrf.mxu0  ;;  %v2847_v38 = vpop.f32.mrf.mxu1 }
 0x347   :  { %10416 = vst [vmem:[#allocation2 + $0x110] sm:$0xff] %v9841_v59  }
 0x348   :  { %2992 = vmatmul.bf16.gmra.mxu2 %v10976_v0  ;;  %3138 = vmatmul.bf16.gmra.mxu3 %v10976_v0 }
 0x349   :  { %3284 = vmatmul.bf16.gmra.mxu0 %v10976_v0 }
 0x34b   :  { %v2409_v43 = vpop.f32.mrf.mxu2  ;;  %v2555_v15 = vpop.f32.mrf.mxu3 }
 0x34e   :  { %v2703_v26 = vpop.f32.mrf.mxu0  ;;  %v2849_v40 = vpop.f32.mrf.mxu1 }
 0x34f   :  { %v9886_v19 = vpack.c.bf16 %v2703_v26, %v2701_v39  ;;  %v9926_v27 = vpack.c.bf16 %v2849_v40, %v2847_v38 }
 0x351   :  { %10425 = vst [vmem:[#allocation2 + $0x138] sm:$0xff] %v9886_v19  }
 0x352   :  { %10433 = vst [vmem:[#allocation2 + $0x190] sm:$0xff] %v9926_v27  }
 0x353   :  { %v2411_v49 = vpop.f32.mrf.mxu2  ;;  %v2557_v17 = vpop.f32.mrf.mxu3 }
 0x354   :  { %v9806_v21 = vpack.c.bf16 %v2411_v49, %v2409_v43  ;;  %v9846_v35 = vpack.c.bf16 %v2557_v17, %v2555_v15 }
 0x356   :  { %10409 = vst [vmem:[#allocation2 + $0xd8] sm:$0xff] %v9806_v21   ;;  %v2706_v31 = vpop.f32.mrf.mxu0  ;;  %v2852_v37 = vpop.f32.mrf.mxu1 }
 0x357   :  { %10417 = vst [vmem:[#allocation2 + $0x118] sm:$0xff] %v9846_v35  }
 0x358   :  { %2997 = vmatmul.bf16.gmra.mxu2 %v10986_v2  ;;  %3143 = vmatmul.bf16.gmra.mxu3 %v10986_v2 }
 0x359   :  { %3289 = vmatmul.bf16.gmra.mxu0 %v10986_v2 }
 0x35b   :  { %v2414_v0 = vpop.f32.mrf.mxu2  ;;  %v2560_v23 = vpop.f32.mrf.mxu3 }
 0x35e   :  { %v2708_v44 = vpop.f32.mrf.mxu0  ;;  %v2854_v45 = vpop.f32.mrf.mxu1 }
 0x35f   :  { %v9891_v46 = vpack.c.bf16 %v2708_v44, %v2706_v31  ;;  %v9931_v36 = vpack.c.bf16 %v2854_v45, %v2852_v37 }
 0x361   :  { %10426 = vst [vmem:[#allocation2 + $0x140] sm:$0xff] %v9891_v46  }
 0x362   :  { %10434 = vst [vmem:[#allocation2 + $0xb8] sm:$0xff] %v9931_v36  }
 0x363   :  { %v2416_v7 = vpop.f32.mrf.mxu2  ;;  %v2562_v57 = vpop.f32.mrf.mxu3 }
 0x364   :  { %v9811_v61 = vpack.c.bf16 %v2416_v7, %v2414_v0  ;;  %v9851_v3 = vpack.c.bf16 %v2562_v57, %v2560_v23 }
 0x366   :  { %10410 = vst [vmem:[#allocation2 + $0x18] sm:$0xff] %v9811_v61   ;;  %v2711_v51 = vpop.f32.mrf.mxu0  ;;  %v2857_v20 = vpop.f32.mrf.mxu1 }
 0x367   :  { %10418 = vst [vmem:[#allocation2 + $0x98] sm:$0xff] %v9851_v3  }
 0x368   :  { %3002 = vmatmul.bf16.gmra.mxu2 %v10996_v22  ;;  %3148 = vmatmul.bf16.gmra.mxu3 %v10996_v22 }
 0x369   :  { %3294 = vmatmul.bf16.gmra.mxu0 %v10996_v22 }
 0x36b   :  { %v2419_v2 = vpop.f32.mrf.mxu2  ;;  %v2565_v52 = vpop.f32.mrf.mxu3 }
 0x36e   :  { %v2713_v53 = vpop.f32.mrf.mxu0  ;;  %v2859_v54 = vpop.f32.mrf.mxu1 }
 0x36f   :  { %v9896_v58 = vpack.c.bf16 %v2713_v53, %v2711_v51  ;;  %v9936_v62 = vpack.c.bf16 %v2859_v54, %v2857_v20 }
 0x371   :  { %10427 = vst [vmem:[#allocation2 + $0x80] sm:$0xff] %v9896_v58  }
 0x372   :  { %10435 = vst [vmem:[#allocation2 + $0x90] sm:$0xff] %v9936_v62  }
 0x373   :  { %v2421_v56 = vpop.f32.mrf.mxu2  ;;  %v2567_v5 = vpop.f32.mrf.mxu3 }
 0x374   :  { %v9816_v11 = vpack.c.bf16 %v2421_v56, %v2419_v2  ;;  %v9856_v13 = vpack.c.bf16 %v2567_v5, %v2565_v52  ;;  %v9308_v56 = vld [vmem:[#allocation2 + $0x140] sm:$0xff]  ;;  %v9316_v5 = vld [vmem:[#allocation2 + $0xb8] sm:$0xff] }
 0x376   :  { %10411 = vst [vmem:[#allocation2 + $0x50] sm:$0xff] %v9816_v11   ;;  %v2716_v63 = vpop.f32.mrf.mxu0  ;;  %v2862_v24 = vpop.f32.mrf.mxu1 }
 0x377   :  { %10419 = vst [vmem:[#allocation2 + $0x120] sm:$0xff] %v9856_v13  }
 0x378   :  { %3007 = vmatmul.bf16.gmra.mxu2 %v11006_v29  ;;  %3153 = vmatmul.bf16.gmra.mxu3 %v11006_v29  ;;  %v9309_v52 = vld [vmem:[#allocation2 + $0x80] sm:$0xff] }
 0x379   :  { %3299 = vmatmul.bf16.gmra.mxu0 %v11006_v29  ;;  %v9317_v53 = vld [vmem:[#allocation2 + $0x90] sm:$0xff] }
 0x37b   :  { %v2424_v22 = vpop.f32.mrf.mxu2  ;;  %v2570_v60 = vpop.f32.mrf.mxu3 }
 0x37d   :  { %v9293_v11 = vld [vmem:[#allocation2 + $0x50] sm:$0xff] }
 0x37e   :  { %v2718_v8 = vpop.f32.mrf.mxu0  ;;  %v2864_v42 = vpop.f32.mrf.mxu1  ;;  %v9301_v13 = vld [vmem:[#allocation2 + $0x120] sm:$0xff] }
 0x37f   :  { %v9901_v6 = vpack.c.bf16 %v2718_v8, %v2716_v63  ;;  %v9941_v41 = vpack.c.bf16 %v2864_v42, %v2862_v24  ;;  %v9292_v8 = vld [vmem:[#allocation2 + $0x18] sm:$0xff] }
 0x381   :  { %10428 = vst [vmem:[#allocation2 + $0x1a8] sm:$0xff] %v9901_v6   ;;  %v9300_v6 = vld [vmem:[#allocation2 + $0x98] sm:$0xff] }
 0x382   :  { %10436 = vst [vmem:[#allocation2 + $0xc0] sm:$0xff] %v9941_v41  }
 0x383   :  { %v2426_v50 = vpop.f32.mrf.mxu2  ;;  %v2572_v25 = vpop.f32.mrf.mxu3 }
 0x384   :  { %v9821_v14 = vpack.c.bf16 %v2426_v50, %v2424_v22  ;;  %v9861_v9 = vpack.c.bf16 %v2572_v25, %v2570_v60  ;;  %v9307_v22 = vld [vmem:[#allocation2 + $0x138] sm:$0xff]  ;;  %v9315_v60 = vld [vmem:[#allocation2 + $0x190] sm:$0xff]  ;;  %v9306_v50 = vld [vmem:[#allocation2 + $0x188] sm:$0xff] }
 0x385   :  { %v9314_v25 = vld [vmem:[#allocation2 + $0xf8] sm:$0xff] }
 0x386   :  { %10412 = vst [vmem:[#allocation2 + $0x168] sm:$0xff] %v9821_v14   ;;  %v2721_v10 = vpop.f32.mrf.mxu0  ;;  %v2867_v34 = vpop.f32.mrf.mxu1  ;;  %v9291_v14 = vld [vmem:[#allocation2 + $0xd8] sm:$0xff] }
 0x387   :  { %10420 = vst [vmem:[#allocation2 + $0x150] sm:$0xff] %v9861_v9   ;;  %v9299_v9 = vld [vmem:[#allocation2 + $0x118] sm:$0xff] }
 0x388   :  { %3012 = vmatmul.bf16.gmra.mxu2 %v11016_v48  ;;  %3158 = vmatmul.bf16.gmra.mxu3 %v11016_v48  ;;  %v9310_v36 = vld [vmem:[#allocation2 + $0x1a8] sm:$0xff] }
 0x389   :  { %3304 = vmatmul.bf16.gmra.mxu0 %v11016_v48  ;;  %v9318_v7 = vld [vmem:[#allocation2 + $0xc0] sm:$0xff] }
 0x38b   :  { %v2429_v29 = vpop.f32.mrf.mxu2  ;;  %v2575_v28 = vpop.f32.mrf.mxu3 }
 0x38d   :  { %v9294_v54 = vld [vmem:[#allocation2 + $0x168] sm:$0xff] }
 0x38e   :  { %v2723_v16 = vpop.f32.mrf.mxu0  ;;  %v2869_v18 = vpop.f32.mrf.mxu1  ;;  %v9302_v62 = vld [vmem:[#allocation2 + $0x150] sm:$0xff] }
 0x38f   :  { %v9906_v47 = vpack.c.bf16 %v2723_v16, %v2721_v10  ;;  %v9946_v30 = vpack.c.bf16 %v2869_v18, %v2867_v34  ;;  %v7899_v10 = vld [vmem:[#allocation6 + $0x8] sm:$0xf]  ;;  %v9237_v34 = vld [vmem:[#allocation6 + $0x20] sm:$0xf0]  ;;  %v9234_v16 = vld [vmem:[#allocation6 + $0xc] sm:$0xf] }
 0x390   :  { %v7901_v18 = vld [vmem:[#allocation6 + $0x24] sm:$0xf0] }
 0x391   :  { %10429 = vst [vmem:[#allocation2 + $0x1b8] sm:$0xff] %v9906_v47  }
 0x392   :  { %10437 = vst [vmem:[#allocation2 + $0x178] sm:$0xff] %v9946_v30  }
 0x393   :  { %v2431_v55 = vpop.f32.mrf.mxu2  ;;  %v2577_v32 = vpop.f32.mrf.mxu3 }
 0x394   :  { %v9826_v33 = vpack.c.bf16 %v2431_v55, %v2429_v29  ;;  %v9866_v4 = vpack.c.bf16 %v2577_v32, %v2575_v28  ;;  %v9305_v55 = vld [vmem:[#allocation2 + $0xe0] sm:$0xff]  ;;  %v9313_v32 = vld [vmem:[#allocation2 + $0xe8] sm:$0xff] }
 0x396   :  { %10413 = vst [vmem:[#allocation2 + $0x130] sm:$0xff] %v9826_v33   ;;  %v2726_v12 = vpop.f32.mrf.mxu0  ;;  %v2872_v59 = vpop.f32.mrf.mxu1  ;;  %v9290_v33 = vld [vmem:[#allocation2 + $0x1b0] sm:$0xff] }
 0x397   :  { %10421 = vst [vmem:[#allocation2 + $0x108] sm:$0xff] %v9866_v4   ;;  %v7900_v4 = vor.u32 %v9237_v34, %v7899_v10 }
 0x398   :  { %3017 = vmatmul.bf16.gmra.mxu2 %v11022_v1  ;;  %3163 = vmatmul.bf16.gmra.mxu3 %v11022_v1  ;;  %v9311_v37 = vld [vmem:[#allocation2 + $0x1b8] sm:$0xff] }
 0x399   :  { %3309 = vmatmul.bf16.gmra.mxu0 %v11022_v1  ;;  %v9319_v0 = vld [vmem:[#allocation2 + $0x178] sm:$0xff] }
 0x39b   :  { %v2434_v48 = vpop.f32.mrf.mxu2  ;;  %v2580_v39 = vpop.f32.mrf.mxu3 }
 0x39d   :  { %v9295_v57 = vld [vmem:[#allocation2 + $0x130] sm:$0xff] }
 0x39e   :  { %v2728_v38 = vpop.f32.mrf.mxu0  ;;  %v2874_v43 = vpop.f32.mrf.mxu1  ;;  %v9303_v61 = vld [vmem:[#allocation2 + $0x108] sm:$0xff] }
 0x39f   :  { %v9911_v15 = vpack.c.bf16 %v2728_v38, %v2726_v12  ;;  %v9951_v26 = vpack.c.bf16 %v2874_v43, %v2872_v59  ;;  %v9298_v59 = vld [vmem:[#allocation2 + $0x110] sm:$0xff]  ;;  %v9236_v38 = vld [vmem:[#allocation6 + $0x18] sm:$0xf0]  ;;  %v9233_v43 = vld [vmem:[#allocation6 + $0x4] sm:$0xf] }
 0x3a1   :  { %10430 = vst [vmem:[#allocation2 + $0x28] sm:$0xff] %v9911_v15   ;;  %v7893_v15 = vld [vmem:[#allocation6 + $0x1c] sm:$0xf0] }
 0x3a2   :  { %10438 = vst [vmem:[#allocation2 + $0xc8] sm:$0xff] %v9951_v26   ;;  %v9289_v26 = vld [vmem:[#allocation2 + $0xb0] sm:$0xff] }
 0x3a3   :  { %v2436_v40 = vpop.f32.mrf.mxu2  ;;  %v2582_v19 = vpop.f32.mrf.mxu3 }
 0x3a4   :  { %v9831_v27 = vpack.c.bf16 %v2436_v40, %v2434_v48  ;;  %v9871_v49 = vpack.c.bf16 %v2582_v19, %v2580_v39  ;;  %v7904_v48 = vor.u32 %v9234_v16, %v7901_v18  ;;  %v7891_v39 = vld [vmem:[#allocation6] sm:$0xf]  ;;  %v7983_v18 = vld [vmem:[#allocation6 + $0xb0] sm:$0xf] }
 0x3a5   :  { %v9297_v40 = vld [vmem:[#allocation2 + $0x180] sm:$0xff]  ;;  %v7892_v19 = vor.u32 %v9236_v38, %v7891_v39  ;;  %v7975_v38 = vld [vmem:[#allocation6 + $0xa8] sm:$0xf] }
 0x3a6   :  { %10414 = vst [vmem:[#allocation2 + $0x48] sm:$0xff] %v9831_v27   ;;  %v3275_v17 = vpop.f32.mrf.mxu0 }
 0x3a7   :  { %10422 = vst [vmem:[#allocation2 + $0x60] sm:$0xff] %v9871_v49  }
 0x3a8   :  { %v9312_v21 = vld [vmem:[#allocation2 + $0x28] sm:$0xff] }
 0x3a9   :  { %v9320_v35 = vld [vmem:[#allocation2 + $0xc8] sm:$0xff]  ;;  %4262 = vmatpush.bf16.msra.mxu3 %v9312_v21 }
 0x3aa   :  { %4311 = vmatpush.bf16.msra.mxu0 %v9320_v35 }
 0x3ab   :  { %v2983_v1 = vpop.f32.mrf.mxu2  ;;  %v3129_v31 = vpop.f32.mrf.mxu3 }
 0x3ad   :  { %v9296_v23 = vld [vmem:[#allocation2 + $0x48] sm:$0xff]  ;;  %4263 = vmatpush.bf16.msra.mxu3 %v9311_v37 }
 0x3ae   :  { %v3277_v44 = vpop.f32.mrf.mxu0  ;;  %v9304_v45 = vld [vmem:[#allocation2 + $0x60] sm:$0xff]  ;;  %4312 = vmatpush.bf16.msra.mxu0 %v9319_v0  ;;  %4164 = vmatpush.bf16.msrb.mxu1 %v9296_v23 }
 0x3af   :  { %v10036_v46 = vpack.c.bf16 %v3277_v44, %v3275_v17  ;;  %4213 = vmatpush.bf16.msra.mxu2 %v9304_v45  ;;  %v7896_v17 = vor.u32 %v9233_v43, %v7893_v15  ;;  %v9241_v23 = vld [vmem:[#allocation6 + $0x44] sm:$0xf]  ;;  %v7929_v44 = vld [vmem:[#allocation6 + $0x5c] sm:$0xf0]  ;;  %v9254_v15 = vld [vmem:[#allocation6 + $0xac] sm:$0xf] }
 0x3b0   :  { %v9257_v43 = vld [vmem:[#allocation6 + $0xc0] sm:$0xf0] }
 0x3b1   :  { %10455 = vst [vmem:[#allocation2 + $0x128] sm:$0xff] %v10036_v46   ;;  %4264 = vmatpush.bf16.msra.mxu3 %v9310_v36 }
 0x3b2   :  { %4313 = vmatpush.bf16.msra.mxu0 %v9318_v7  ;;  %4165 = vmatpush.bf16.msrb.mxu1 %v9295_v57  ;;  %v7932_v57 = vor.u32 %v9241_v23, %v7929_v44  ;;  %v8013_v23 = vld [vmem:[#allocation6 + $0x104] sm:$0xf0] }
 0x3b3   :  { %v2985_v3 = vpop.f32.mrf.mxu2  ;;  %v3131_v51 = vpop.f32.mrf.mxu3  ;;  %4214 = vmatpush.bf16.msra.mxu2 %v9303_v61  ;;  %v7919_v61 = vld [vmem:[#allocation6 + $0x38] sm:$0xf] }
 0x3b4   :  { %v9956_v20 = vpack.c.bf16 %v2985_v3, %v2983_v1  ;;  %v9996_v2 = vpack.c.bf16 %v3131_v51, %v3129_v31  ;;  %v7927_v1 = vld [vmem:[#allocation6 + $0x40] sm:$0xf]  ;;  %v9244_v31 = vld [vmem:[#allocation6 + $0x58] sm:$0xf0]  ;;  %v9243_v3 = vld [vmem:[#allocation6 + $0x50] sm:$0xf0] }
 0x3b5   :  { %4265 = vmatpush.bf16.msra.mxu3 %v9309_v52  ;;  %v7928_v36 = vor.u32 %v9244_v31, %v7927_v1  ;;  %v9240_v51 = vld [vmem:[#allocation6 + $0x3c] sm:$0xf]  ;;  %v9265_v1 = vld [vmem:[#allocation6 + $0x100] sm:$0xf0] }
 0x3b6   :  { %10439 = vst [vmem:[#allocation2] sm:$0xff] %v9956_v20   ;;  %v3280_v58 = vpop.f32.mrf.mxu0  ;;  %4314 = vmatpush.bf16.msra.mxu0 %v9317_v53  ;;  %4166 = vmatpush.bf16.msrb.mxu1 %v9294_v54  ;;  %v7921_v20 = vld [vmem:[#allocation6 + $0x54] sm:$0xf0] }
 0x3b7   :  { %10447 = vst [vmem:[#allocation2 + $0x10] sm:$0xff] %v9996_v2   ;;  %4215 = vmatpush.bf16.msra.mxu2 %v9302_v62  ;;  %v7920_v2 = vor.u32 %v9243_v3, %v7919_v61  ;;  %v7924_v54 = vor.u32 %v9240_v51, %v7921_v20  ;;  %v9264_v61 = vld [vmem:[#allocation6 + $0xf8] sm:$0xf0]  ;;  %v9261_v3 = vld [vmem:[#allocation6 + $0xe4] sm:$0xf] }
 0x3b8   :  { %v8005_v51 = vld [vmem:[#allocation6 + $0xfc] sm:$0xf0] }
 0x3b9   :  { %4266 = vmatpush.bf16.msra.mxu3 %v9308_v56  ;;  %v7955_v56 = vld [vmem:[#allocation6 + $0x78] sm:$0xf] }
 0x3ba   :  { %4315 = vmatpush.bf16.msra.mxu0 %v9316_v5  ;;  %4167 = vmatpush.bf16.msrb.mxu1 %v9293_v11  ;;  %v9251_v5 = vld [vmem:[#allocation6 + $0x90] sm:$0xf0] }
 0x3bb   :  { %v2988_v63 = vpop.f32.mrf.mxu2  ;;  %v3134_v24 = vpop.f32.mrf.mxu3  ;;  %4216 = vmatpush.bf16.msra.mxu2 %v9301_v13 }
 0x3bd   :  { %4267 = vmatpush.bf16.msra.mxu3 %v9307_v22 }
 0x3be   :  { %v3282_v42 = vpop.f32.mrf.mxu0  ;;  %4316 = vmatpush.bf16.msra.mxu0 %v9315_v60  ;;  %4168 = vmatpush.bf16.msrb.mxu1 %v9292_v8  ;;  %v7956_v8 = vor.u32 %v9251_v5, %v7955_v56  ;;  %v9272_v56 = vld [vmem:[#allocation6 + $0x138] sm:$0xf0] }
 0x3bf   :  { %v10041_v41 = vpack.c.bf16 %v3282_v42, %v3280_v58  ;;  %4217 = vmatpush.bf16.msra.mxu2 %v9300_v6 }
 0x3c1   :  { %10456 = vst [vmem:[#allocation2 + $0x38] sm:$0xff] %v10041_v41   ;;  %4268 = vmatpush.bf16.msra.mxu3 %v9306_v50  ;;  %v7947_v41 = vld [vmem:[#allocation6 + $0x70] sm:$0xf]  ;;  %v9250_v50 = vld [vmem:[#allocation6 + $0x88] sm:$0xf0] }
 0x3c2   :  { %4317 = vmatpush.bf16.msra.mxu0 %v9314_v25  ;;  %4169 = vmatpush.bf16.msrb.mxu1 %v9291_v14  ;;  %v9247_v25 = vld [vmem:[#allocation6 + $0x74] sm:$0xf]  ;;  %v7949_v14 = vld [vmem:[#allocation6 + $0x8c] sm:$0xf0] }
 0x3c3   :  { %v2990_v29 = vpop.f32.mrf.mxu2  ;;  %v3136_v28 = vpop.f32.mrf.mxu3  ;;  %4218 = vmatpush.bf16.msra.mxu2 %v9299_v9  ;;  %v7948_v9 = vor.u32 %v9250_v50, %v7947_v41  ;;  %v9271_v41 = vld [vmem:[#allocation6 + $0x130] sm:$0xf0]  ;;  %v9268_v50 = vld [vmem:[#allocation6 + $0x11c] sm:$0xf] }
 0x3c4   :  { %v9961_v47 = vpack.c.bf16 %v2990_v29, %v2988_v63  ;;  %v10001_v30 = vpack.c.bf16 %v3136_v28, %v3134_v24  ;;  %v9248_v63 = vld [vmem:[#allocation6 + $0x7c] sm:$0xf]  ;;  %v7957_v24 = vld [vmem:[#allocation6 + $0x94] sm:$0xf0]  ;;  %v7952_v29 = vor.u32 %v9247_v25, %v7949_v14 }
 0x3c5   :  { %4269 = vmatpush.bf16.msra.mxu3 %v9305_v55  ;;  %v7960_v6 = vor.u32 %v9248_v63, %v7957_v24  ;;  %v8041_v63 = vld [vmem:[#allocation6 + $0x13c] sm:$0xf0]  ;;  %v8033_v25 = vld [vmem:[#allocation6 + $0x134] sm:$0xf0] }
 0x3c6   :  { %10440 = vst [vmem:[#allocation2 + $0x68] sm:$0xff] %v9961_v47   ;;  %v3285_v12 = vpop.f32.mrf.mxu0  ;;  %4318 = vmatpush.bf16.msra.mxu0 %v9313_v32  ;;  %4170 = vmatpush.bf16.msrb.mxu1 %v9290_v33  ;;  %v9258_v47 = vld [vmem:[#allocation6 + $0xc8] sm:$0xf0]  ;;  %v9255_v32 = vld [vmem:[#allocation6 + $0xb4] sm:$0xf] }
 0x3c7   :  { %10448 = vst [vmem:[#allocation2 + $0x100] sm:$0xff] %v10001_v30   ;;  %4219 = vmatpush.bf16.msra.mxu2 %v9298_v59  ;;  %v7985_v33 = vld [vmem:[#allocation6 + $0xcc] sm:$0xf0]  ;;  %v7984_v59 = vor.u32 %v9258_v47, %v7983_v18  ;;  %v9279_v18 = vld [vmem:[#allocation6 + $0x170] sm:$0xf0] }
 0x3c8   :  { %4270 = vmatmul.bf16.vlgmr.msra.gmra.mxu3 %v7900_v4  ;;  %v7988_v39 = vor.u32 %v9255_v32, %v7985_v33  ;;  %v8069_v32 = vld [vmem:[#allocation6 + $0x174] sm:$0xf0] }
 0x3c9   :  { %4319 = vmatmul.bf16.vlgmr.msra.gmra.mxu0 %v7904_v48 }
 0x3ca   :  { %4171 = vmatpush.bf16.msrb.mxu1 %v9289_v26  ;;  %v7977_v26 = vld [vmem:[#allocation6 + $0xc4] sm:$0xf0] }
 0x3cb   :  { %v2993_v27 = vpop.f32.mrf.mxu2  ;;  %v3139_v49 = vpop.f32.mrf.mxu3  ;;  %4220 = vmatpush.bf16.msra.mxu2 %v9297_v40  ;;  %v7976_v40 = vor.u32 %v9257_v43, %v7975_v38  ;;  %v9275_v43 = vld [vmem:[#allocation6 + $0x154] sm:$0xf] }
 0x3cd   :  { %4172 = vmatmul.bf16.vlgmr.msrb.gmra.mxu1 %v7892_v19 }
 0x3ce   :  { %v3287_v21 = vpop.f32.mrf.mxu0  ;;  %4221 = vmatmul.bf16.vlgmr.msra.gmra.mxu2 %v7896_v17 }
 0x3cf   :  { %v10046_v35 = vpack.c.bf16 %v3287_v21, %v3285_v12 }
 0x3d1   :  { %10457 = vst [vmem:[#allocation2 + $0x88] sm:$0xff] %v10046_v35   ;;  %v8011_v35 = vld [vmem:[#allocation6 + $0xe8] sm:$0xf] }
 0x3d3   :  { %v2995_v37 = vpop.f32.mrf.mxu2  ;;  %v3141_v0 = vpop.f32.mrf.mxu3 }
 0x3d4   :  { %v9966_v45 = vpack.c.bf16 %v2995_v37, %v2993_v27  ;;  %v10006_v46 = vpack.c.bf16 %v3141_v0, %v3139_v49  ;;  %v7980_v49 = vor.u32 %v9254_v15, %v7977_v26  ;;  %v9262_v0 = vld [vmem:[#allocation6 + $0xec] sm:$0xf]  ;;  %v8061_v15 = vld [vmem:[#allocation6 + $0x16c] sm:$0xf0] }
 0x3d6   :  { %10441 = vst [vmem:[#allocation2 + $0x148] sm:$0xff] %v9966_v45   ;;  %v3290_v7 = vpop.f32.mrf.mxu0 }
 0x3d7   :  { %10449 = vst [vmem:[#allocation2 + $0x160] sm:$0xff] %v10006_v46   ;;  %v8012_v46 = vor.u32 %v9265_v1, %v8011_v35  ;;  %v8095_v1 = vld [vmem:[#allocation6 + $0x190] sm:$0xf] }
 0x3d8   :  { %4275 = vmatmul.bf16.gmra.mxu3 %v7928_v36 }
 0x3d9   :  { %4324 = vmatmul.bf16.gmra.mxu0 %v7932_v57  ;;  %v8003_v57 = vld [vmem:[#allocation6 + $0xe0] sm:$0xf] }
 0x3da   :  { %v8004_v20 = vor.u32 %v9264_v61, %v8003_v57  ;;  %v9285_v57 = vld [vmem:[#allocation6 + $0x1a0] sm:$0xf0] }
 0x3db   :  { %v2998_v52 = vpop.f32.mrf.mxu2  ;;  %v3144_v53 = vpop.f32.mrf.mxu3 }
 0x3dd   :  { %4177 = vmatmul.bf16.gmra.mxu1 %v7920_v2 }
 0x3de   :  { %v3292_v58 = vpop.f32.mrf.mxu0  ;;  %4226 = vmatmul.bf16.gmra.mxu2 %v7924_v54 }
 0x3df   :  { %v10051_v62 = vpack.c.bf16 %v3292_v58, %v3290_v7  ;;  %v8016_v7 = vor.u32 %v9262_v0, %v8013_v23  ;;  %v8097_v0 = vld [vmem:[#allocation6 + $0x1ac] sm:$0xf0] }
 0x3e1   :  { %10458 = vst [vmem:[#allocation2 + $0x170] sm:$0xff] %v10051_v62   ;;  %v8039_v62 = vld [vmem:[#allocation6 + $0x120] sm:$0xf] }
 0x3e3   :  { %v3000_v11 = vpop.f32.mrf.mxu2  ;;  %v3146_v13 = vpop.f32.mrf.mxu3 }
 0x3e4   :  { %v9971_v22 = vpack.c.bf16 %v3000_v11, %v2998_v52  ;;  %v10011_v60 = vpack.c.bf16 %v3146_v13, %v3144_v53  ;;  %v8008_v53 = vor.u32 %v9261_v3, %v8005_v51  ;;  %v9269_v13 = vld [vmem:[#allocation6 + $0x124] sm:$0xf]  ;;  %v9282_v3 = vld [vmem:[#allocation6 + $0x18c] sm:$0xf]  ;;  %v8089_v51 = vld [vmem:[#allocation6 + $0x1a4] sm:$0xf0] }
 0x3e6   :  { %10442 = vst [vmem:[#allocation2 + $0x8] sm:$0xff] %v9971_v22   ;;  %v3295_v42 = vpop.f32.mrf.mxu0 }
 0x3e7   :  { %10450 = vst [vmem:[#allocation2 + $0x20] sm:$0xff] %v10011_v60   ;;  %v8040_v60 = vor.u32 %v9272_v56, %v8039_v62  ;;  %v9338_v56 = vld [vmem:[#allocation2 + $0x38] sm:$0xff] }
 0x3e8   :  { %4280 = vmatmul.bf16.gmra.mxu3 %v7956_v8  ;;  %v9340_v61 = vld [vmem:[#allocation2 + $0x170] sm:$0xff] }
 0x3e9   :  { %4329 = vmatmul.bf16.gmra.mxu0 %v7960_v6  ;;  %v8031_v6 = vld [vmem:[#allocation6 + $0x118] sm:$0xf] }
 0x3ea   :  { %v8032_v14 = vor.u32 %v9271_v41, %v8031_v6  ;;  %v9238_v6 = vld [vmem:[#allocation6 + $0x28] sm:$0xf0]  ;;  %v9235_v41 = vld [vmem:[#allocation6 + $0x14] sm:$0xf] }
 0x3eb   :  { %v3003_v10 = vpop.f32.mrf.mxu2  ;;  %v3149_v34 = vpop.f32.mrf.mxu3 }
 0x3ed   :  { %4182 = vmatmul.bf16.gmra.mxu1 %v7948_v9 }
 0x3ee   :  { %v3297_v28 = vpop.f32.mrf.mxu0  ;;  %4231 = vmatmul.bf16.gmra.mxu2 %v7952_v29  ;;  %v9332_v62 = vld [vmem:[#allocation2 + $0x20] sm:$0xff] }
 0x3ef   :  { %v10056_v16 = vpack.c.bf16 %v3297_v28, %v3295_v42  ;;  %v8044_v42 = vor.u32 %v9269_v13, %v8041_v63  ;;  %v7915_v13 = vld [vmem:[#allocation6 + $0x18] sm:$0xf]  ;;  %v9239_v63 = vld [vmem:[#allocation6 + $0x30] sm:$0xf0] }
 0x3f1   :  { %10459 = vst [vmem:[#allocation2 + $0x58] sm:$0xff] %v10056_v16   ;;  %v8067_v16 = vld [vmem:[#allocation6 + $0x158] sm:$0xf] }
 0x3f3   :  { %v3005_v30 = vpop.f32.mrf.mxu2  ;;  %v3151_v55 = vpop.f32.mrf.mxu3 }
 0x3f4   :  { %v9976_v4 = vpack.c.bf16 %v3005_v30, %v3003_v10  ;;  %v10016_v12 = vpack.c.bf16 %v3151_v55, %v3149_v34  ;;  %v8036_v34 = vor.u32 %v9268_v50, %v8033_v25  ;;  %v9276_v55 = vld [vmem:[#allocation6 + $0x15c] sm:$0xf]  ;;  %v7909_v50 = vld [vmem:[#allocation6 + $0x2c] sm:$0xf0]  ;;  %v9321_v25 = vld [vmem:[#allocation2] sm:$0xff] }
 0x3f6   :  { %10443 = vst [vmem:[#allocation2 + $0x40] sm:$0xff] %v9976_v4   ;;  %v3300_v48 = vpop.f32.mrf.mxu0 }
 0x3f7   :  { %10451 = vst [vmem:[#allocation2 + $0x70] sm:$0xff] %v10016_v12   ;;  %v8068_v12 = vor.u32 %v9279_v18, %v8067_v16  ;;  %v7943_v16 = vld [vmem:[#allocation6 + $0x50] sm:$0xf]  ;;  %v9246_v18 = vld [vmem:[#allocation6 + $0x68] sm:$0xf0] }
 0x3f8   :  { %4285 = vmatmul.bf16.gmra.mxu3 %v7984_v59  ;;  %v8072_v59 = vor.u32 %v9276_v55, %v8069_v32  ;;  %v9341_v23 = vld [vmem:[#allocation2 + $0x58] sm:$0xff] }
 0x3f9   :  { %4334 = vmatmul.bf16.gmra.mxu0 %v7988_v39  ;;  %v9278_v39 = vld [vmem:[#allocation6 + $0x168] sm:$0xf0] }
 0x3fb   :  { %v3008_v19 = vpop.f32.mrf.mxu2  ;;  %v3154_v27 = vpop.f32.mrf.mxu3 }
 0x3fd   :  { %4187 = vmatmul.bf16.gmra.mxu1 %v7976_v40  ;;  %v8064_v40 = vor.u32 %v9275_v43, %v8061_v15 }
 0x3fe   :  { %v3302_v17 = vpop.f32.mrf.mxu0  ;;  %4236 = vmatmul.bf16.gmra.mxu2 %v7980_v49 }
 0x3ff   :  { %v10061_v21 = vpack.c.bf16 %v3302_v17, %v3300_v48  ;;  %v8059_v48 = vld [vmem:[#allocation6 + $0x150] sm:$0xf] }
 0x400   :  { %v8060_v26 = vor.u32 %v9278_v39, %v8059_v48  ;;  %v7937_v48 = vld [vmem:[#allocation6 + $0x64] sm:$0xf0] }
 0x401   :  { %10460 = vst [vmem:[#allocation2 + $0xf0] sm:$0xff] %v10061_v21  }
 0x403   :  { %v3010_v31 = vpop.f32.mrf.mxu2  ;;  %v3156_v37 = vpop.f32.mrf.mxu3 }
 0x404   :  { %v9981_v44 = vpack.c.bf16 %v3010_v31, %v3008_v19  ;;  %v10021_v45 = vpack.c.bf16 %v3156_v37, %v3154_v27  ;;  %v9286_v31 = vld [vmem:[#allocation6 + $0x1a8] sm:$0xf0]  ;;  %v9283_v37 = vld [vmem:[#allocation6 + $0x194] sm:$0xf] }
 0x406   :  { %10444 = vst [vmem:[#allocation2 + $0xa8] sm:$0xff] %v9981_v44   ;;  %v3305_v36 = vpop.f32.mrf.mxu0 }
 0x407   :  { %10452 = vst [vmem:[#allocation2 + $0x78] sm:$0xff] %v10021_v45   ;;  %v8096_v45 = vor.u32 %v9286_v31, %v8095_v1 }
 0x408   :  { %4290 = vmatmul.bf16.gmra.mxu3 %v8012_v46  ;;  %v9342_v17 = vld [vmem:[#allocation2 + $0xf0] sm:$0xff] }
 0x409   :  { %4339 = vmatmul.bf16.gmra.mxu0 %v8016_v7  ;;  %v8087_v7 = vld [vmem:[#allocation6 + $0x188] sm:$0xf] }
 0x40b   :  { %v3013_v2 = vpop.f32.mrf.mxu2  ;;  %v3159_v52 = vpop.f32.mrf.mxu3 }
 0x40d   :  { %4192 = vmatmul.bf16.gmra.mxu1 %v8004_v20  ;;  %v9326_v44 = vld [vmem:[#allocation2 + $0xa8] sm:$0xff]  ;;  %v9325_v20 = vld [vmem:[#allocation2 + $0x40] sm:$0xff] }
 0x40e   :  { %v3307_v54 = vpop.f32.mrf.mxu0  ;;  %4241 = vmatmul.bf16.gmra.mxu2 %v8008_v53  ;;  %v9334_v46 = vld [vmem:[#allocation2 + $0x78] sm:$0xff]  ;;  %v8092_v53 = vor.u32 %v9282_v3, %v8089_v51 }
 0x40f   :  { %v10066_v58 = vpack.c.bf16 %v3307_v54, %v3305_v36  ;;  %v8100_v36 = vor.u32 %v9283_v37, %v8097_v0  ;;  %v9339_v54 = vld [vmem:[#allocation2 + $0x88] sm:$0xff]  ;;  %v7963_v0 = vld [vmem:[#allocation6 + $0x80] sm:$0xf] }
 0x411   :  { %10461 = vst [vmem:[#allocation2 + $0x30] sm:$0xff] %v10066_v58   ;;  %v9324_v58 = vld [vmem:[#allocation2 + $0x8] sm:$0xff] }
 0x413   :  { %v3015_v5 = vpop.f32.mrf.mxu2  ;;  %v3161_v11 = vpop.f32.mrf.mxu3 }
 0x414   :  { %v9986_v24 = vpack.c.bf16 %v3015_v5, %v3013_v2  ;;  %v10026_v22 = vpack.c.bf16 %v3161_v11, %v3159_v52  ;;  %v9333_v2 = vld [vmem:[#allocation2 + $0x70] sm:$0xff]  ;;  %v8088_v52 = vor.u32 %v9285_v57, %v8087_v7  ;;  %v9323_v5 = vld [vmem:[#allocation2 + $0x148] sm:$0xff]  ;;  %v9331_v11 = vld [vmem:[#allocation2 + $0x160] sm:$0xff] }
 0x416   :  { %10445 = vst [vmem:[#allocation2 + $0xd0] sm:$0xff] %v9986_v24   ;;  %v3310_v8 = vpop.f32.mrf.mxu0  ;;  %v9337_v24 = vld [vmem:[#allocation2 + $0x128] sm:$0xff] }
 0x417   :  { %10453 = vst [vmem:[#allocation2 + $0xa0] sm:$0xff] %v10026_v22   ;;  %v9322_v22 = vld [vmem:[#allocation2 + $0x68] sm:$0xff] }
 0x418   :  { %4295 = vmatmul.bf16.gmra.mxu3 %v8040_v60  ;;  %v9343_v19 = vld [vmem:[#allocation2 + $0x30] sm:$0xff]  ;;  %v7916_v60 = vor.u32 %v9239_v63, %v7915_v13  ;;  %v9256_v13 = vld [vmem:[#allocation6 + $0xbc] sm:$0xf]  ;;  %v7993_v63 = vld [vmem:[#allocation6 + $0xd4] sm:$0xf0] }
 0x419   :  { %4344 = vmatmul.bf16.gmra.mxu0 %v8044_v42  ;;  %v7907_v42 = vld [vmem:[#allocation6 + $0x10] sm:$0xf] }
 0x41b   :  { %v3018_v9 = vpop.f32.mrf.mxu2  ;;  %v3164_v10 = vpop.f32.mrf.mxu3 }
 0x41d   :  { %4197 = vmatmul.bf16.gmra.mxu1 %v8032_v14  ;;  %v9327_v21 = vld [vmem:[#allocation2 + $0xd0] sm:$0xff] }
 0x41e   :  { %v3312_v29 = vpop.f32.mrf.mxu0  ;;  %4246 = vmatmul.bf16.gmra.mxu2 %v8036_v34  ;;  %v9335_v35 = vld [vmem:[#allocation2 + $0xa0] sm:$0xff]  ;;  %v9329_v14 = vld [vmem:[#allocation2 + $0x10] sm:$0xff]  ;;  %v7912_v34 = vor.u32 %v9235_v41, %v7909_v50 }
 0x41f   :  { %v10071_v28 = vpack.c.bf16 %v3312_v29, %v3310_v8  ;;  %v9330_v8 = vld [vmem:[#allocation2 + $0x100] sm:$0xff] }
 0x421   :  { %10462 = vst [vmem:[#allocation2 + $0x198] sm:$0xff] %v10071_v28  }
 0x423   :  { %v3020_v47 = vpop.f32.mrf.mxu2  ;;  %v3166_v30 = vpop.f32.mrf.mxu3 }
 0x424   :  { %v9991_v33 = vpack.c.bf16 %v3020_v47, %v3018_v9  ;;  %v10031_v4 = vpack.c.bf16 %v3166_v30, %v3164_v10  ;;  %v7908_v9 = vor.u32 %v9238_v6, %v7907_v42  ;;  %v7996_v42 = vor.u32 %v9256_v13, %v7993_v63  ;;  %v9277_v13 = vld [vmem:[#allocation6 + $0x164] sm:$0xf]  ;;  %v8077_v63 = vld [vmem:[#allocation6 + $0x17c] sm:$0xf0] }
 0x426   :  { %10446 = vst [vmem:[#allocation2 + $0x1a0] sm:$0xff] %v9991_v33   ;;  %v7944_v33 = vor.u32 %v9246_v18, %v7943_v16  ;;  %v8019_v16 = vld [vmem:[#allocation6 + $0xf0] sm:$0xf]  ;;  %v9266_v18 = vld [vmem:[#allocation6 + $0x108] sm:$0xf0] }
 0x427   :  { %10454 = vst [vmem:[#allocation2 + $0x158] sm:$0xff] %v10031_v4   ;;  %v7935_v4 = vld [vmem:[#allocation6 + $0x48] sm:$0xf] }
 0x428   :  { %v9344_v38 = vld [vmem:[#allocation2 + $0x198] sm:$0xff]  ;;  %4300 = vmatmul.bf16.gmra.mxu3 %v8068_v12  ;;  %v9245_v12 = vld [vmem:[#allocation6 + $0x60] sm:$0xf0] }
 0x429   :  { %4458 = vmatpush.bf16.msrb.mxu3 %v9344_v38  ;;  %4349 = vmatmul.bf16.gmra.mxu0 %v8072_v59  ;;  %v9242_v59 = vld [vmem:[#allocation6 + $0x4c] sm:$0xf]  ;;  %v7936_v38 = vor.u32 %v9245_v12, %v7935_v4 }
 0x42d   :  { %v9328_v27 = vld [vmem:[#allocation2 + $0x1a0] sm:$0xff]  ;;  %4459 = vmatpush.bf16.msrb.mxu3 %v9343_v19  ;;  %4202 = vmatmul.bf16.gmra.mxu1 %v8060_v26  ;;  %v7940_v26 = vor.u32 %v9242_v59, %v7937_v48 }
 0x42e   :  { %v9336_v49 = vld [vmem:[#allocation2 + $0x158] sm:$0xff]  ;;  %4251 = vmatmul.bf16.gmra.mxu2 %v8064_v40  ;;  %4360 = vmatpush.bf16.msra.mxu1 %v9328_v27 }
 0x42f   :  { %4409 = vmatpush.bf16.msrb.mxu2 %v9336_v49  ;;  %v7971_v49 = vld [vmem:[#allocation6 + $0x88] sm:$0xf] }
 0x431   :  { %4460 = vmatpush.bf16.msrb.mxu3 %v9342_v17  ;;  %v9253_v17 = vld [vmem:[#allocation6 + $0xa0] sm:$0xf0] }
 0x432   :  { %4361 = vmatpush.bf16.msra.mxu1 %v9327_v21  ;;  %v7972_v37 = vor.u32 %v9253_v17, %v7971_v49 }
 0x433   :  { %4410 = vmatpush.bf16.msrb.mxu2 %v9335_v35 }
 0x435   :  { %4461 = vmatpush.bf16.msrb.mxu3 %v9341_v23  ;;  %v9252_v23 = vld [vmem:[#allocation6 + $0x98] sm:$0xf0] }
 0x436   :  { %4362 = vmatpush.bf16.msra.mxu1 %v9326_v44  ;;  %v9249_v44 = vld [vmem:[#allocation6 + $0x84] sm:$0xf] }
 0x437   :  { %4411 = vmatpush.bf16.msrb.mxu2 %v9334_v46 }
 0x438   :  { %4305 = vmatmul.bf16.gmra.mxu3 %v8096_v45  ;;  %v7965_v45 = vld [vmem:[#allocation6 + $0x9c] sm:$0xf0] }
 0x439   :  { %4462 = vmatpush.bf16.msrb.mxu3 %v9340_v61  ;;  %4354 = vmatmul.bf16.gmra.mxu0 %v8100_v36  ;;  %v7964_v36 = vor.u32 %v9252_v23, %v7963_v0  ;;  %v7968_v61 = vor.u32 %v9249_v44, %v7965_v45 }
 0x43a   :  { %4363 = vmatpush.bf16.msra.mxu1 %v9325_v20 }
 0x43b   :  { %4412 = vmatpush.bf16.msrb.mxu2 %v9333_v2  ;;  %v7999_v2 = vld [vmem:[#allocation6 + $0xc0] sm:$0xf] }
 0x43d   :  { %4463 = vmatpush.bf16.msrb.mxu3 %v9339_v54  ;;  %4207 = vmatmul.bf16.gmra.mxu1 %v8088_v52  ;;  %v9260_v52 = vld [vmem:[#allocation6 + $0xd8] sm:$0xf0] }
 0x43e   :  { %4256 = vmatmul.bf16.gmra.mxu2 %v8092_v53  ;;  %4364 = vmatpush.bf16.msra.mxu1 %v9324_v58 }
 0x43f   :  { %4413 = vmatpush.bf16.msrb.mxu2 %v9332_v62 }
 0x441   :  { %4464 = vmatpush.bf16.msrb.mxu3 %v9338_v56  ;;  %v8000_v56 = vor.u32 %v9260_v52, %v7999_v2 }
 0x442   :  { %4365 = vmatpush.bf16.msra.mxu1 %v9323_v5  ;;  %v7991_v5 = vld [vmem:[#allocation6 + $0xb8] sm:$0xf] }
 0x443   :  { %4414 = vmatpush.bf16.msrb.mxu2 %v9331_v11  ;;  %v9259_v11 = vld [vmem:[#allocation6 + $0xd0] sm:$0xf0] }
 0x445   :  { %4465 = vmatpush.bf16.msrb.mxu3 %v9337_v24 }
 0x446   :  { %4366 = vmatpush.bf16.msra.mxu1 %v9322_v22  ;;  %v7992_v22 = vor.u32 %v9259_v11, %v7991_v5  ;;  %v8075_v5 = vld [vmem:[#allocation6 + $0x160] sm:$0xf]  ;;  %v9280_v11 = vld [vmem:[#allocation6 + $0x178] sm:$0xf0] }
 0x447   :  { %4415 = vmatpush.bf16.msrb.mxu2 %v9330_v8 }
 0x448   :  { %4466 = vmatmul.bf16.vlgmr.msrb.gmra.mxu3 %v7916_v60 }
 0x44a   :  { %v4173_v10 = vpop.f32.mrf.mxu1  ;;  %4367 = vmatpush.bf16.msra.mxu1 %v9321_v25  ;;  %v8027_v25 = vld [vmem:[#allocation6 + $0xf8] sm:$0xf] }
 0x44b   :  { %v4271_v29 = vpop.f32.mrf.mxu3  ;;  %4416 = vmatpush.bf16.msrb.mxu2 %v9329_v14  ;;  %v9267_v14 = vld [vmem:[#allocation6 + $0x110] sm:$0xf0] }
 0x44d   :  { %4368 = vmatmul.bf16.vlgmr.msra.gmra.mxu1 %v7908_v9 }
 0x44e   :  { %4417 = vmatmul.bf16.vlgmr.msrb.gmra.mxu2 %v7912_v34 }
 0x451   :  { %v4222_v28 = vpop.f32.mrf.mxu2 }
 0x452   :  { %v4223_v47 = vadd.f32 %v4222_v28, %v4173_v10  ;;  %v4175_v30 = vpop.f32.mrf.mxu1  ;;  %v8028_v28 = vor.u32 %v9267_v14, %v8027_v25  ;;  %v8080_v25 = vor.u32 %v9277_v13, %v8077_v63  ;;  %v9370_v13 = vld [vmem:[#allocation8 + $0x448] sm:$0xff]  ;;  %v9345_v63 = vld [vmem:[#allocation8 + $0x380] sm:$0xff] }
 0x453   :  { %v4273_v55 = vpop.f32.mrf.mxu3 }
 0x454   :  { %v11052_v32 = vadd.f32 %v4271_v29, %v4223_v47  ;;  %v9263_v47 = vld [vmem:[#allocation6 + $0xf4] sm:$0xf] }
 0x458   :  { %4471 = vmatmul.bf16.gmra.mxu3 %v7944_v33  ;;  %v8020_v33 = vor.u32 %v9266_v18, %v8019_v16  ;;  %v9374_v16 = vld [vmem:[#allocation8 + $0x468] sm:$0xff]  ;;  %v9349_v18 = vld [vmem:[#allocation8 + $0x3a0] sm:$0xff] }
 0x459   :  { %v4224_v39 = vpop.f32.mrf.mxu2 }
 0x45a   :  { %v4225_v43 = vadd.f32 %v4224_v39, %v4175_v30  ;;  %v4178_v15 = vpop.f32.mrf.mxu1  ;;  %v8021_v30 = vld [vmem:[#allocation6 + $0x10c] sm:$0xf0] }
 0x45b   :  { %v4276_v40 = vpop.f32.mrf.mxu3  ;;  %v8024_v59 = vor.u32 %v9263_v47, %v8021_v30  ;;  %v9357_v47 = vld [vmem:[#allocation8 + $0x3e0] sm:$0xff] }
 0x45c   :  { %v11054_v19 = vadd.f32 %v4273_v55, %v4225_v43  ;;  %v8055_v43 = vld [vmem:[#allocation6 + $0x130] sm:$0xf]  ;;  %v9365_v30 = vld [vmem:[#allocation8 + $0x420] sm:$0xff] }
 0x45d   :  { %4373 = vmatmul.bf16.gmra.mxu1 %v7936_v38 }
 0x45e   :  { %4422 = vmatmul.bf16.gmra.mxu2 %v7940_v26 }
 0x461   :  { %v4227_v27 = vpop.f32.mrf.mxu2 }
 0x462   :  { %v4228_v21 = vadd.f32 %v4227_v27, %v4178_v15  ;;  %v4180_v35 = vpop.f32.mrf.mxu1  ;;  %v9274_v15 = vld [vmem:[#allocation6 + $0x148] sm:$0xf0] }
 0x463   :  { %v4278_v1 = vpop.f32.mrf.mxu3  ;;  %v8056_v17 = vor.u32 %v9274_v15, %v8055_v43 }
 0x464   :  { %v11056_v31 = vadd.f32 %v4276_v40, %v4228_v21  ;;  %v8047_v21 = vld [vmem:[#allocation6 + $0x128] sm:$0xf] }
 0x468   :  { %4476 = vmatmul.bf16.gmra.mxu3 %v7972_v37  ;;  %v8049_v37 = vld [vmem:[#allocation6 + $0x144] sm:$0xf0] }
 0x469   :  { %v4229_v46 = vpop.f32.mrf.mxu2 }
 0x46a   :  { %v4230_v7 = vadd.f32 %v4229_v46, %v4180_v35  ;;  %v4183_v57 = vpop.f32.mrf.mxu1  ;;  %v9273_v35 = vld [vmem:[#allocation6 + $0x140] sm:$0xf0] }
 0x46b   :  { %v4281_v3 = vpop.f32.mrf.mxu3  ;;  %v8048_v23 = vor.u32 %v9273_v35, %v8047_v21  ;;  %v9364_v21 = vld [vmem:[#allocation8 + $0x418] sm:$0xff] }
 0x46c   :  { %v11058_v51 = vadd.f32 %v4278_v1, %v4230_v7  ;;  %v9270_v1 = vld [vmem:[#allocation6 + $0x12c] sm:$0xf]  ;;  %v8083_v7 = vld [vmem:[#allocation6 + $0x168] sm:$0xf]  ;;  %v9372_v35 = vld [vmem:[#allocation8 + $0x458] sm:$0xff] }
 0x46d   :  { %4378 = vmatmul.bf16.gmra.mxu1 %v7964_v36  ;;  %v8052_v45 = vor.u32 %v9270_v1, %v8049_v37  ;;  %v8103_v1 = vld [vmem:[#allocation6 + $0x198] sm:$0xf]  ;;  %v9287_v37 = vld [vmem:[#allocation6 + $0x1b0] sm:$0xf0] }
 0x46e   :  { %4427 = vmatmul.bf16.gmra.mxu2 %v7968_v61 }
 0x471   :  { %v4232_v20 = vpop.f32.mrf.mxu2 }
 0x472   :  { %v4233_v53 = vadd.f32 %v4232_v20, %v4183_v57  ;;  %v4185_v54 = vpop.f32.mrf.mxu1  ;;  %v9281_v57 = vld [vmem:[#allocation6 + $0x180] sm:$0xf0] }
 0x473   :  { %v4283_v58 = vpop.f32.mrf.mxu3  ;;  %v8084_v52 = vor.u32 %v9281_v57, %v8083_v7  ;;  %v8104_v57 = vor.u32 %v9287_v37, %v8103_v1 }
 0x474   :  { %v11060_v62 = vadd.f32 %v4281_v3, %v4233_v53  ;;  %v9352_v53 = vld [vmem:[#allocation8 + $0x3b8] sm:$0xff] }
 0x475   :  { %4612 = vmatpush.bf16.msrb.mxu0 %v9352_v53 }
 0x478   :  { %4481 = vmatmul.bf16.gmra.mxu3 %v8000_v56  ;;  %v9376_v56 = vld [vmem:[#allocation8 + $0x478] sm:$0xff] }
 0x479   :  { %v4234_v24 = vpop.f32.mrf.mxu2  ;;  %5050 = vmatpush.bf16.msra.mxu3 %v9376_v56  ;;  %v9346_v56 = vld [vmem:[#allocation8 + $0x388] sm:$0xff] }
 0x47a   :  { %v4235_v60 = vadd.f32 %v4234_v24, %v4185_v54  ;;  %v4188_v8 = vpop.f32.mrf.mxu1  ;;  %v9360_v54 = vld [vmem:[#allocation8 + $0x3f8] sm:$0xff]  ;;  %v9351_v24 = vld [vmem:[#allocation8 + $0x3b0] sm:$0xff] }
 0x47b   :  { %v4286_v6 = vpop.f32.mrf.mxu3  ;;  %4758 = vmatpush.bf16.msrb.mxu1 %v9360_v54  ;;  %4613 = vmatpush.bf16.msrb.mxu0 %v9351_v24  ;;  %v9353_v24 = vld [vmem:[#allocation8 + $0x3c0] sm:$0xff] }
 0x47c   :  { %v11062_v41 = vadd.f32 %v4283_v58, %v4235_v60  ;;  %v9368_v58 = vld [vmem:[#allocation8 + $0x438] sm:$0xff]  ;;  %v9367_v60 = vld [vmem:[#allocation8 + $0x430] sm:$0xff] }
 0x47d   :  { %4383 = vmatmul.bf16.gmra.mxu1 %v7992_v22  ;;  %4904 = vmatpush.bf16.msra.mxu2 %v9368_v58  ;;  %v9359_v22 = vld [vmem:[#allocation8 + $0x3f0] sm:$0xff] }
 0x47e   :  { %4432 = vmatmul.bf16.gmra.mxu2 %v7996_v42  ;;  %v8076_v42 = vor.u32 %v9280_v11, %v8075_v5  ;;  %v9354_v5 = vld [vmem:[#allocation8 + $0x3c8] sm:$0xff] }
 0x47f   :  { %4759 = vmatpush.bf16.msrb.mxu1 %v9359_v22  ;;  %v9362_v11 = vld [vmem:[#allocation8 + $0x408] sm:$0xff]  ;;  %v9361_v22 = vld [vmem:[#allocation8 + $0x400] sm:$0xff] }
 0x481   :  { %v4237_v50 = vpop.f32.mrf.mxu2  ;;  %4905 = vmatpush.bf16.msra.mxu2 %v9367_v60 }
 0x482   :  { %v4238_v9 = vadd.f32 %v4237_v50, %v4188_v8  ;;  %v4190_v10 = vpop.f32.mrf.mxu1 }
 0x483   :  { %v4288_v34 = vpop.f32.mrf.mxu3 }
 0x484   :  { %v11064_v29 = vadd.f32 %v4286_v6, %v4238_v9  ;;  %v9375_v6 = vld [vmem:[#allocation8 + $0x470] sm:$0xff]  ;;  %v9350_v9 = vld [vmem:[#allocation8 + $0x3a8] sm:$0xff] }
 0x485   :  { %5051 = vmatpush.bf16.msra.mxu3 %v9375_v6  ;;  %4614 = vmatpush.bf16.msrb.mxu0 %v9350_v9  ;;  %v9369_v6 = vld [vmem:[#allocation8 + $0x440] sm:$0xff] }
 0x488   :  { %4486 = vmatmul.bf16.gmra.mxu3 %v8028_v28  ;;  %v11084_v28 = vpop.f32.mrf.mxu0 }
 0x489   :  { %v4239_v55 = vpop.f32.mrf.mxu2  ;;  %5052 = vmatpush.bf16.msra.mxu3 %v9374_v16  ;;  %4615 = vmatpush.bf16.msrb.mxu0 %v9349_v18 }
 0x48a   :  { %v4240_v4 = vadd.f32 %v4239_v55, %v4190_v10  ;;  %v4193_v12 = vpop.f32.mrf.mxu1  ;;  %v9358_v10 = vld [vmem:[#allocation8 + $0x3e8] sm:$0xff] }
 0x48b   :  { %v4291_v48 = vpop.f32.mrf.mxu3  ;;  %4760 = vmatpush.bf16.msrb.mxu1 %v9358_v10 }
 0x48c   :  { %v11066_v39 = vadd.f32 %v4288_v34, %v4240_v4  ;;  %v9366_v34 = vld [vmem:[#allocation8 + $0x428] sm:$0xff]  ;;  %v9288_v4 = vld [vmem:[#allocation6 + $0x1b8] sm:$0xf0] }
 0x48d   :  { %4388 = vmatmul.bf16.gmra.mxu1 %v8020_v33  ;;  %4906 = vmatpush.bf16.msra.mxu2 %v9366_v34  ;;  %v8111_v33 = vld [vmem:[#allocation6 + $0x1a0] sm:$0xf] }
 0x48e   :  { %4437 = vmatmul.bf16.gmra.mxu2 %v8024_v59  ;;  %v8112_v15 = vor.u32 %v9288_v4, %v8111_v33 }
 0x48f   :  { %4761 = vmatpush.bf16.msrb.mxu1 %v9357_v47  ;;  %v4321_v47 = vadd.f32 %v11084_v28, %v11052_v32 }
 0x491   :  { %v4242_v38 = vpop.f32.mrf.mxu2  ;;  %4907 = vmatpush.bf16.msra.mxu2 %v9365_v30 }
 0x492   :  { %v4243_v26 = vadd.f32 %v4242_v38, %v4193_v12  ;;  %v11068_v40 = vpop.f32.mrf.mxu1  ;;  %v9373_v12 = vld [vmem:[#allocation8 + $0x460] sm:$0xff] }
 0x493   :  { %v11070_v27 = vpop.f32.mrf.mxu3  ;;  %5053 = vmatpush.bf16.msra.mxu3 %v9373_v12 }
 0x494   :  { %v11072_v49 = vadd.f32 %v4291_v48, %v4243_v26  ;;  %v9348_v26 = vld [vmem:[#allocation8 + $0x398] sm:$0xff] }
 0x495   :  { %4616 = vmatpush.bf16.msrb.mxu0 %v9348_v26  ;;  %4908 = vmatpush.bf16.msra.mxu2 %v9364_v21  ;;  %v3348_v21 = vld [vmem:[#allocation9 + $0x80] sm:$0xff] }
 0x497   :  { %5054 = vmatpush.bf16.msra.mxu3 %v9372_v35 }
 0x498   :  { %4491 = vmatmul.bf16.gmra.mxu3 %v8056_v17  ;;  %v9356_v17 = vld [vmem:[#allocation8 + $0x3d8] sm:$0xff] }
 0x499   :  { %v11074_v0 = vpop.f32.mrf.mxu2  ;;  %4762 = vmatpush.bf16.msrb.mxu1 %v9356_v17 }
 0x49a   :  { %v4198_v44 = vpop.f32.mrf.mxu1 }
 0x49b   :  { %v4296_v46 = vpop.f32.mrf.mxu3 }
 0x49d   :  { %4393 = vmatmul.bf16.gmra.mxu1 %v8048_v23  ;;  %v4322_v23 = vpop.f32.mrf.mxu0 }
 0x49e   :  { %4442 = vmatmul.bf16.gmra.mxu2 %v8052_v45  ;;  %v8105_v45 = vld [vmem:[#allocation6 + $0x1b4] sm:$0xf0] }
 0x4a1   :  { %v4247_v36 = vpop.f32.mrf.mxu2 }
 0x4a2   :  { %v4248_v61 = vadd.f32 %v4247_v36, %v4198_v44  ;;  %v11076_v3 = vpop.f32.mrf.mxu1  ;;  %v9284_v44 = vld [vmem:[#allocation6 + $0x19c] sm:$0xf]  ;;  %v9355_v36 = vld [vmem:[#allocation8 + $0x3d0] sm:$0xff] }
 0x4a3   :  { %v11078_v20 = vpop.f32.mrf.mxu3  ;;  %v8108_v54 = vor.u32 %v9284_v44, %v8105_v45  ;;  %4763 = vmatpush.bf16.msrb.mxu1 %v9355_v36  ;;  %v3349_v44 = vld [vmem:[#allocation9 + $0x88] sm:$0xff] }
 0x4a4   :  { %v11080_v2 = vadd.f32 %v4296_v46, %v4248_v61  ;;  %v9347_v46 = vld [vmem:[#allocation8 + $0x390] sm:$0xff] }
 0x4a5   :  { %v9363_v61 = vld [vmem:[#allocation8 + $0x410] sm:$0xff]  ;;  %4617 = vmatpush.bf16.msrb.mxu0 %v9347_v46  ;;  %v4325_v60 = vpop.f32.mrf.mxu0 }
 0x4a6   :  { %4909 = vmatpush.bf16.msra.mxu2 %v9363_v61  ;;  %v4326_v28 = vadd.f32 %v4325_v60, %v11056_v31 }
 0x4a7   :  { %4764 = vmatpush.bf16.msrb.mxu1 %v9354_v5 }
 0x4a8   :  { %4496 = vmatmul.bf16.gmra.mxu3 %v8084_v52  ;;  %v9371_v52 = vld [vmem:[#allocation8 + $0x450] sm:$0xff] }
 0x4a9   :  { %v11082_v8 = vpop.f32.mrf.mxu2  ;;  %5055 = vmatpush.bf16.msra.mxu3 %v9371_v52  ;;  %4618 = vmatpush.bf16.msrb.mxu0 %v9346_v56 }
 0x4aa   :  { %v4203_v50 = vpop.f32.mrf.mxu1  ;;  %4910 = vmatpush.bf16.msra.mxu2 %v9362_v11 }
 0x4ab   :  { %v4301_v14 = vpop.f32.mrf.mxu3  ;;  %4765 = vmatpush.bf16.msrb.mxu1 %v9353_v24 }
 0x4ad   :  { %4398 = vmatmul.bf16.gmra.mxu1 %v8076_v42  ;;  %5056 = vmatpush.bf16.msra.mxu3 %v9370_v13  ;;  %v4327_v16 = vpop.f32.mrf.mxu0 }
 0x4ae   :  { %4447 = vmatmul.bf16.gmra.mxu2 %v8080_v25  ;;  %4619 = vmatpush.bf16.msrb.mxu0 %v9345_v63  ;;  %v4328_v5 = vadd.f32 %v4327_v16, %v11058_v51  ;;  %v3350_v63 = vld [vmem:[#allocation9 + $0x90] sm:$0xff] }
 0x4af   :  { %4911 = vmatpush.bf16.msra.mxu2 %v9361_v22 }
 0x4b1   :  { %v4252_v55 = vpop.f32.mrf.mxu2  ;;  %5057 = vmatpush.bf16.msra.mxu3 %v9369_v6 }
 0x4b2   :  { %v4253_v59 = vadd.f32 %v4252_v55, %v4203_v50  ;;  %v11086_v48 = vpop.f32.mrf.mxu1 }
 0x4b3   :  { %v11088_v38 = vpop.f32.mrf.mxu3 }
 0x4b4   :  { %v11090_v43 = vadd.f32 %v4301_v14, %v4253_v59 }
 0x4b5   :  { %v4330_v59 = vpop.f32.mrf.mxu0 }
 0x4b8   :  { %4501 = vmatmul.bf16.gmra.mxu3 %v8112_v15  ;;  %v4323_v15 = vadd.f32 %v4322_v23, %v11054_v19 }
 0x4b9   :  { %v11092_v7 = vpop.f32.mrf.mxu2 }
 0x4ba   :  { %v4208_v53 = vpop.f32.mrf.mxu1 }
 0x4bb   :  { %v4306_v58 = vpop.f32.mrf.mxu3 }
 0x4bd   :  { %4403 = vmatmul.bf16.gmra.mxu1 %v8104_v57  ;;  %v4332_v32 = vpop.f32.mrf.mxu0 }
 0x4be   :  { %4452 = vmatmul.bf16.gmra.mxu2 %v8108_v54 }
 0x4c1   :  { %v4257_v42 = vpop.f32.mrf.mxu2 }
 0x4c2   :  { %v4258_v50 = vadd.f32 %v4257_v42, %v4208_v53  ;;  %v11094_v25 = vpop.f32.mrf.mxu1  ;;  %v3351_v42 = vld [vmem:[#allocation9 + $0x98] sm:$0xff] }
 0x4c3   :  { %v11096_v14 = vpop.f32.mrf.mxu3 }
 0x4c4   :  { %v11098_v9 = vadd.f32 %v4306_v58, %v4258_v50 }
 0x4c5   :  { %v4335_v13 = vpop.f32.mrf.mxu0 }
 0x4c9   :  { %v11100_v10 = vpop.f32.mrf.mxu2 }
 0x4ca   :  { %v4369_v34 = vpop.f32.mrf.mxu1 }
 0x4cb   :  { %v4467_v18 = vpop.f32.mrf.mxu3  ;;  %v4370_v55 = vadd.f32 %v4369_v34, %v4321_v47  ;;  %v4331_v47 = vadd.f32 %v4330_v59, %v11060_v62  ;;  %v4333_v62 = vadd.f32 %v4332_v32, %v11062_v41 }
 0x4d1   :  { %v4418_v30 = vpop.f32.mrf.mxu2 }
 0x4d2   :  { %v4371_v33 = vpop.f32.mrf.mxu1  ;;  %v4419_v12 = vadd.f32 %v4418_v30, %v4370_v55 }
 0x4d3   :  { %v4469_v4 = vpop.f32.mrf.mxu3  ;;  %v4372_v17 = vadd.f32 %v4371_v33, %v4323_v15 }
 0x4d4   :  { %v4468_v26 = vadd.f32 %v4467_v18, %v4419_v12  ;;  %v4337_v12 = vpop.f32.mrf.mxu0 }
 0x4d6   :  { %v4507_v46 = vadd.f32 %v4468_v26, %v3348_v21  ;;  %v3352_v21 = vld [vmem:[#allocation9 + $0xa0] sm:$0xff] }
 0x4d8   :  { %v4523_v61 = vmax.f32 %v4507_v46, 0.0 }
 0x4d9   :  { %v4420_v35 = vpop.f32.mrf.mxu2 }
 0x4da   :  { %v4421_v1 = vadd.f32 %v4420_v35, %v4372_v17  ;;  %v4374_v37 = vpop.f32.mrf.mxu1 }
 0x4db   :  { %v4472_v45 = vpop.f32.mrf.mxu3  ;;  %v4375_v19 = vadd.f32 %v4374_v37, %v4326_v28 }
 0x4dc   :  { %v4470_v36 = vadd.f32 %v4469_v4, %v4421_v1 }
 0x4de   :  { %v4508_v57 = vadd.f32 %v4470_v36, %v3349_v44  ;;  %v3353_v44 = vld [vmem:[#allocation9 + $0xa8] sm:$0xff] }
 0x4e0   :  { %v4524_v52 = vmax.f32 %v4508_v57, 0.0  ;;  %v4340_v57 = vpop.f32.mrf.mxu0 }
 0x4e1   :  { %v4423_v53 = vpop.f32.mrf.mxu2 }
 0x4e2   :  { %v11106_v54 = vpack.c.bf16 %v4524_v52, %v4523_v61  ;;  %v4376_v23 = vpop.f32.mrf.mxu1  ;;  %v4424_v56 = vadd.f32 %v4423_v53, %v4375_v19  ;;  %v4336_v61 = vadd.f32 %v4335_v13, %v11064_v29  ;;  %v3354_v13 = vld [vmem:[#allocation9 + $0xb0] sm:$0xff] }
 0x4e3   :  { %v4474_v58 = vpop.f32.mrf.mxu3  ;;  %v4377_v11 = vadd.f32 %v4376_v23, %v4328_v5  ;;  %v4338_v5 = vadd.f32 %v4337_v12, %v11066_v39 }
 0x4e4   :  { %4620 = vmatmul.bf16.vlgmr.msrb.gmra.mxu0 %v11106_v54  ;;  %4766 = vmatmul.bf16.vlgmr.msrb.gmra.mxu1 %v11106_v54  ;;  %v4473_v31 = vadd.f32 %v4472_v45, %v4424_v56 }
 0x4e5   :  { %4912 = vmatmul.bf16.vlgmr.msra.gmra.mxu2 %v11106_v54  ;;  %5058 = vmatmul.bf16.vlgmr.msra.gmra.mxu3 %v11106_v54 }
 0x4e6   :  { %v4509_v50 = vadd.f32 %v4473_v31, %v3350_v63 }
 0x4e8   :  { %v4525_v30 = vmax.f32 %v4509_v50, 0.0  ;;  %v4342_v29 = vpop.f32.mrf.mxu0 }
 0x4e9   :  { %v4425_v24 = vpop.f32.mrf.mxu2 }
 0x4ea   :  { %v4426_v22 = vadd.f32 %v4425_v24, %v4377_v11  ;;  %v4379_v60 = vpop.f32.mrf.mxu1 }
 0x4eb   :  { %v4477_v6 = vpop.f32.mrf.mxu3  ;;  %v4380_v51 = vadd.f32 %v4379_v60, %v4331_v47  ;;  %v3355_v60 = vld [vmem:[#allocation9 + $0xb8] sm:$0xff]  ;;  %v4341_v47 = vadd.f32 %v4340_v57, %v11072_v49 }
 0x4ec   :  { %v4475_v34 = vadd.f32 %v4474_v58, %v4426_v22 }
 0x4ee   :  { %v4510_v18 = vadd.f32 %v4475_v34, %v3351_v42  ;;  %v4245_v34 = vadd.f32 %v11074_v0, %v11068_v40 }
 0x4f0   :  { %v4526_v55 = vmax.f32 %v4510_v18, 0.0  ;;  %v4345_v39 = vpop.f32.mrf.mxu0 }
 0x4f1   :  { %v4428_v33 = vpop.f32.mrf.mxu2  ;;  %v4346_v57 = vadd.f32 %v4345_v39, %v11080_v2  ;;  %v4255_v39 = vadd.f32 %v11092_v7, %v11086_v48  ;;  %v9388_v7 = vld [vmem:[#allocation8 + $0x4d8] sm:$0xff] }
 0x4f2   :  { %v11114_v4 = vpack.c.bf16 %v4526_v55, %v4525_v30  ;;  %v4381_v16 = vpop.f32.mrf.mxu1  ;;  %v4429_v26 = vadd.f32 %v4428_v33, %v4380_v51  ;;  %v4294_v51 = vadd.f32 %v11070_v27, %v4245_v34 }
 0x4f3   :  { %v4479_v15 = vpop.f32.mrf.mxu3  ;;  %v4382_v17 = vadd.f32 %v4381_v16, %v4333_v62 }
 0x4f4   :  { %4625 = vmatmul.bf16.gmra.mxu0 %v11114_v4  ;;  %4771 = vmatmul.bf16.gmra.mxu1 %v11114_v4  ;;  %v4478_v59 = vadd.f32 %v4477_v6, %v4429_v26  ;;  %v4343_v40 = vadd.f32 %v4342_v29, %v4294_v51 }
 0x4f5   :  { %4917 = vmatmul.bf16.gmra.mxu2 %v11114_v4  ;;  %5063 = vmatmul.bf16.gmra.mxu3 %v11114_v4 }
 0x4f6   :  { %v4511_v46 = vadd.f32 %v4478_v59, %v3352_v21  ;;  %v3356_v59 = vld [vmem:[#allocation9 + $0xc0] sm:$0xff] }
 0x4f8   :  { %v4527_v52 = vmax.f32 %v4511_v46, 0.0  ;;  %v4250_v46 = vadd.f32 %v11082_v8, %v11076_v3  ;;  %v9392_v3 = vld [vmem:[#allocation8 + $0x4f8] sm:$0xff] }
 0x4f9   :  { %v4430_v35 = vpop.f32.mrf.mxu2  ;;  %v9400_v8 = vld [vmem:[#allocation8 + $0x538] sm:$0xff]  ;;  %5342 = vmatpush.bf16.msra.mxu1 %v9392_v3 }
 0x4fa   :  { %v4431_v1 = vadd.f32 %v4430_v35, %v4382_v17  ;;  %v4384_v37 = vpop.f32.mrf.mxu1  ;;  %v4347_v35 = vpop.f32.mrf.mxu0  ;;  %5488 = vmatpush.bf16.msrb.mxu2 %v9400_v8  ;;  %v4260_v8 = vadd.f32 %v11100_v10, %v11094_v25 }
 0x4fb   :  { %v4482_v45 = vpop.f32.mrf.mxu3  ;;  %v4385_v41 = vadd.f32 %v4384_v37, %v4336_v61 }
 0x4fc   :  { %v4480_v36 = vadd.f32 %v4479_v15, %v4431_v1  ;;  %v3357_v1 = vld [vmem:[#allocation9 + $0xc8] sm:$0xff] }
 0x4fe   :  { %v4512_v28 = vadd.f32 %v4480_v36, %v3353_v44 }
 0x500   :  { %v4528_v53 = vmax.f32 %v4512_v28, 0.0 }
 0x501   :  { %v4433_v19 = vpop.f32.mrf.mxu2 }
 0x502   :  { %v11122_v23 = vpack.c.bf16 %v4528_v53, %v4527_v52  ;;  %v4386_v32 = vpop.f32.mrf.mxu1  ;;  %v4434_v56 = vadd.f32 %v4433_v19, %v4385_v41  ;;  %v4299_v53 = vadd.f32 %v11078_v20, %v4250_v46  ;;  %v4350_v29 = vpop.f32.mrf.mxu0 }
 0x503   :  { %v4484_v58 = vpop.f32.mrf.mxu3  ;;  %v4387_v11 = vadd.f32 %v4386_v32, %v4338_v5  ;;  %v9384_v5 = vld [vmem:[#allocation8 + $0x4b8] sm:$0xff] }
 0x504   :  { %4630 = vmatmul.bf16.gmra.mxu0 %v11122_v23  ;;  %4776 = vmatmul.bf16.gmra.mxu1 %v11122_v23  ;;  %v4483_v31 = vadd.f32 %v4482_v45, %v4434_v56  ;;  %v4348_v2 = vadd.f32 %v4347_v35, %v4299_v53  ;;  %v9396_v35 = vld [vmem:[#allocation8 + $0x518] sm:$0xff]  ;;  %v9378_v53 = vld [vmem:[#allocation8 + $0x488] sm:$0xff] }
 0x505   :  { %4922 = vmatmul.bf16.gmra.mxu2 %v11122_v23  ;;  %5068 = vmatmul.bf16.gmra.mxu3 %v11122_v23 }
 0x506   :  { %v4513_v6 = vadd.f32 %v4483_v31, %v3354_v13  ;;  %5196 = vmatpush.bf16.msra.mxu0 %v9384_v5  ;;  %v9391_v13 = vld [vmem:[#allocation8 + $0x4f0] sm:$0xff] }
 0x507   :  { %5343 = vmatpush.bf16.msra.mxu1 %v9391_v13  ;;  %v9385_v13 = vld [vmem:[#allocation8 + $0x4c0] sm:$0xff] }
 0x508   :  { %v4529_v30 = vmax.f32 %v4513_v6, 0.0  ;;  %v3359_v6 = vld [vmem:[#allocation9 + $0xd8] sm:$0xff] }
 0x509   :  { %v4435_v63 = vpop.f32.mrf.mxu2 }
 0x50a   :  { %v4436_v24 = vadd.f32 %v4435_v63, %v4387_v11  ;;  %v4389_v22 = vpop.f32.mrf.mxu1  ;;  %v9383_v11 = vld [vmem:[#allocation8 + $0x4b0] sm:$0xff]  ;;  %v4352_v51 = vpop.f32.mrf.mxu0 }
 0x50b   :  { %v4487_v42 = vpop.f32.mrf.mxu3  ;;  %v4390_v12 = vadd.f32 %v4389_v22, %v4341_v47  ;;  %v3358_v63 = vld [vmem:[#allocation9 + $0xd0] sm:$0xff]  ;;  %5197 = vmatpush.bf16.msra.mxu0 %v9383_v11  ;;  %v9390_v47 = vld [vmem:[#allocation8 + $0x4e8] sm:$0xff]  ;;  %v9377_v11 = vld [vmem:[#allocation8 + $0x480] sm:$0xff] }
 0x50c   :  { %v4485_v50 = vadd.f32 %v4484_v58, %v4436_v24  ;;  %v9399_v22 = vld [vmem:[#allocation8 + $0x530] sm:$0xff]  ;;  %5344 = vmatpush.bf16.msra.mxu1 %v9390_v47 }
 0x50d   :  { %5489 = vmatpush.bf16.msrb.mxu2 %v9399_v22 }
 0x50e   :  { %v4514_v18 = vadd.f32 %v4485_v50, %v3355_v60 }
 0x510   :  { %v4530_v55 = vmax.f32 %v4514_v18, 0.0  ;;  %v9382_v18 = vld [vmem:[#allocation8 + $0x4a8] sm:$0xff] }
 0x511   :  { %v4438_v33 = vpop.f32.mrf.mxu2  ;;  %5198 = vmatpush.bf16.msra.mxu0 %v9382_v18  ;;  %v3362_v18 = vld [vmem:[#allocation9 + $0xf0] sm:$0xff] }
 0x512   :  { %v11133_v16 = vpack.c.bf16 %v4530_v55, %v4529_v30  ;;  %v4391_v15 = vpop.f32.mrf.mxu1  ;;  %v4439_v62 = vadd.f32 %v4438_v33, %v4390_v12  ;;  %v9398_v30 = vld [vmem:[#allocation8 + $0x528] sm:$0xff]  ;;  %v4351_v12 = vadd.f32 %v4350_v29, %v11090_v43  ;;  %v9380_v43 = vld [vmem:[#allocation8 + $0x498] sm:$0xff] }
 0x513   :  { %v4489_v26 = vpop.f32.mrf.mxu3  ;;  %v4392_v0 = vadd.f32 %v4391_v15, %v4343_v40  ;;  %5490 = vmatpush.bf16.msrb.mxu2 %v9398_v30  ;;  %v9389_v40 = vld [vmem:[#allocation8 + $0x4e0] sm:$0xff] }
 0x514   :  { %4635 = vmatmul.bf16.gmra.mxu0 %v11133_v16  ;;  %4781 = vmatmul.bf16.gmra.mxu1 %v11133_v16  ;;  %v4488_v49 = vadd.f32 %v4487_v42, %v4439_v62  ;;  %v9381_v62 = vld [vmem:[#allocation8 + $0x4a0] sm:$0xff] }
 0x515   :  { %4927 = vmatmul.bf16.gmra.mxu2 %v11133_v16  ;;  %5073 = vmatmul.bf16.gmra.mxu3 %v11133_v16 }
 0x516   :  { %v4515_v44 = vadd.f32 %v4488_v49, %v3356_v59  ;;  %v9397_v49 = vld [vmem:[#allocation8 + $0x520] sm:$0xff]  ;;  %v4304_v59 = vadd.f32 %v11088_v38, %v4255_v39  ;;  %5199 = vmatpush.bf16.msra.mxu0 %v9381_v62  ;;  %5345 = vmatpush.bf16.msra.mxu1 %v9389_v40  ;;  %v3363_v39 = vld [vmem:[#allocation9 + $0xf8] sm:$0xff] }
 0x517   :  { %5491 = vmatpush.bf16.msrb.mxu2 %v9397_v49 }
 0x518   :  { %v4531_v28 = vmax.f32 %v4515_v44, 0.0  ;;  %v4353_v38 = vadd.f32 %v4352_v51, %v4304_v59 }
 0x519   :  { %v4440_v17 = vpop.f32.mrf.mxu2 }
 0x51a   :  { %v4441_v27 = vadd.f32 %v4440_v17, %v4392_v0  ;;  %v4394_v21 = vpop.f32.mrf.mxu1  ;;  %5200 = vmatpush.bf16.msra.mxu0 %v9380_v43  ;;  %5346 = vmatpush.bf16.msra.mxu1 %v9388_v7 }
 0x51b   :  { %v4492_v37 = vpop.f32.mrf.mxu3  ;;  %v4395_v41 = vadd.f32 %v4394_v21, %v4346_v57  ;;  %5492 = vmatpush.bf16.msrb.mxu2 %v9396_v35  ;;  %v4355_v57 = vpop.f32.mrf.mxu0 }
 0x51c   :  { %v4490_v45 = vadd.f32 %v4489_v26, %v4441_v27 }
 0x51e   :  { %v4516_v36 = vadd.f32 %v4490_v45, %v3357_v1  ;;  %v9379_v1 = vld [vmem:[#allocation8 + $0x490] sm:$0xff] }
 0x51f   :  { %v9395_v45 = vld [vmem:[#allocation8 + $0x510] sm:$0xff]  ;;  %5201 = vmatpush.bf16.msra.mxu0 %v9379_v1 }
 0x520   :  { %v4532_v61 = vmax.f32 %v4516_v36, 0.0  ;;  %5493 = vmatpush.bf16.msrb.mxu2 %v9395_v45 }
 0x521   :  { %v4443_v52 = vpop.f32.mrf.mxu2 }
 0x522   :  { %v11143_v19 = vpack.c.bf16 %v4532_v61, %v4531_v28  ;;  %v4396_v32 = vpop.f32.mrf.mxu1  ;;  %v4444_v56 = vadd.f32 %v4443_v52, %v4395_v41  ;;  %v3360_v28 = vld [vmem:[#allocation9 + $0xe0] sm:$0xff]  ;;  %v9386_v41 = vld [vmem:[#allocation8 + $0x4c8] sm:$0xff] }
 0x523   :  { %v4494_v58 = vpop.f32.mrf.mxu3  ;;  %v4397_v31 = vadd.f32 %v4396_v32, %v4348_v2  ;;  %v3361_v32 = vld [vmem:[#allocation9 + $0xe8] sm:$0xff]  ;;  %5202 = vmatpush.bf16.msra.mxu0 %v9378_v53  ;;  %v4356_v2 = vadd.f32 %v4355_v57, %v11098_v9  ;;  %v4357_v25 = vpop.f32.mrf.mxu0 }
 0x524   :  { %4640 = vmatmul.bf16.gmra.mxu0 %v11143_v19  ;;  %4786 = vmatmul.bf16.gmra.mxu1 %v11143_v19  ;;  %v4493_v20 = vadd.f32 %v4492_v37, %v4444_v56  ;;  %v9387_v37 = vld [vmem:[#allocation8 + $0x4d0] sm:$0xff]  ;;  %v9394_v56 = vld [vmem:[#allocation8 + $0x508] sm:$0xff] }
 0x525   :  { %4932 = vmatmul.bf16.gmra.mxu2 %v11143_v19  ;;  %5078 = vmatmul.bf16.gmra.mxu3 %v11143_v19 }
 0x526   :  { %v4517_v50 = vadd.f32 %v4493_v20, %v3358_v63  ;;  %5347 = vmatpush.bf16.msra.mxu1 %v9387_v37  ;;  %5494 = vmatpush.bf16.msrb.mxu2 %v9394_v56  ;;  %v9393_v63 = vld [vmem:[#allocation8 + $0x500] sm:$0xff] }
 0x527   :  { %5203 = vmatpush.bf16.msra.mxu0 %v9377_v11 }
 0x528   :  { %v4533_v15 = vmax.f32 %v4517_v50, 0.0 }
 0x529   :  { %v4445_v24 = vpop.f32.mrf.mxu2 }
 0x52a   :  { %v4446_v60 = vadd.f32 %v4445_v24, %v4397_v31  ;;  %v4399_v42 = vpop.f32.mrf.mxu1  ;;  %5348 = vmatpush.bf16.msra.mxu1 %v9386_v41  ;;  %5495 = vmatpush.bf16.msrb.mxu2 %v9393_v63 }
 0x52b   :  { %v4497_v55 = vpop.f32.mrf.mxu3  ;;  %v4400_v27 = vadd.f32 %v4399_v42, %v4351_v12 }
 0x52c   :  { %v4495_v34 = vadd.f32 %v4494_v58, %v4446_v60  ;;  %v4309_v60 = vadd.f32 %v11096_v14, %v4260_v8 }
 0x52e   :  { %v4518_v33 = vadd.f32 %v4495_v34, %v3359_v6  ;;  %5349 = vmatpush.bf16.msra.mxu1 %v9385_v13  ;;  %v4358_v50 = vadd.f32 %v4357_v25, %v4309_v60 }
 0x530   :  { %v4534_v26 = vmax.f32 %v4518_v33, 0.0 }
 0x531   :  { %v4448_v0 = vpop.f32.mrf.mxu2 }
 0x532   :  { %v11153_v17 = vpack.c.bf16 %v4534_v26, %v4533_v15  ;;  %v4401_v21 = vpop.f32.mrf.mxu1  ;;  %v4449_v48 = vadd.f32 %v4448_v0, %v4400_v27 }
 0x533   :  { %v4499_v44 = vpop.f32.mrf.mxu3  ;;  %v4402_v36 = vadd.f32 %v4401_v21, %v4353_v38 }
 0x534   :  { %4645 = vmatmul.bf16.gmra.mxu0 %v11153_v17  ;;  %4791 = vmatmul.bf16.gmra.mxu1 %v11153_v17  ;;  %v4498_v46 = vadd.f32 %v4497_v55, %v4449_v48 }
 0x535   :  { %4937 = vmatmul.bf16.gmra.mxu2 %v11153_v17  ;;  %5083 = vmatmul.bf16.gmra.mxu3 %v11153_v17 }
 0x536   :  { %v4519_v5 = vadd.f32 %v4498_v46, %v3360_v28 }
 0x538   :  { %v4535_v20 = vmax.f32 %v4519_v5, 0.0 }
 0x539   :  { %v4450_v61 = vpop.f32.mrf.mxu2 }
 0x53a   :  { %v4451_v52 = vadd.f32 %v4450_v61, %v4402_v36  ;;  %v4404_v58 = vpop.f32.mrf.mxu1 }
 0x53b   :  { %v4502_v24 = vpop.f32.mrf.mxu3  ;;  %v4405_v6 = vadd.f32 %v4404_v58, %v4356_v2 }
 0x53c   :  { %v4500_v3 = vadd.f32 %v4499_v44, %v4451_v52 }
 0x53e   :  { %v4520_v29 = vadd.f32 %v4500_v3, %v3361_v32 }
 0x540   :  { %v4536_v31 = vmax.f32 %v4520_v29, 0.0 }
 0x541   :  { %v4453_v22 = vpop.f32.mrf.mxu2 }
 0x542   :  { %v11163_v42 = vpack.c.bf16 %v4536_v31, %v4535_v20  ;;  %v4454_v10 = vadd.f32 %v4453_v22, %v4405_v6  ;;  %v4406_v9 = vpop.f32.mrf.mxu1 }
 0x543   :  { %v4407_v14 = vadd.f32 %v4406_v9, %v4358_v50  ;;  %v4504_v55 = vpop.f32.mrf.mxu3 }
 0x544   :  { %4650 = vmatmul.bf16.gmra.mxu0 %v11163_v42  ;;  %4796 = vmatmul.bf16.gmra.mxu1 %v11163_v42  ;;  %v4503_v34 = vadd.f32 %v4502_v24, %v4454_v10 }
 0x545   :  { %4942 = vmatmul.bf16.gmra.mxu2 %v11163_v42  ;;  %5088 = vmatmul.bf16.gmra.mxu3 %v11163_v42 }
 0x546   :  { %v4521_v33 = vadd.f32 %v4503_v34, %v3362_v18 }
 0x548   :  { %v4537_v15 = vmax.f32 %v4521_v33, 0.0 }
 0x549   :  { %v4455_v47 = vpop.f32.mrf.mxu2 }
 0x54a   :  { %v4456_v30 = vadd.f32 %v4455_v47, %v4407_v14 }
 0x54c   :  { %v4505_v51 = vadd.f32 %v4504_v55, %v4456_v30 }
 0x54e   :  { %v4522_v12 = vadd.f32 %v4505_v51, %v3363_v39 }
 0x550   :  { %v4538_v26 = vmax.f32 %v4522_v12, 0.0 }
 0x552   :  { %v11169_v62 = vpack.c.bf16 %v4538_v26, %v4537_v15 }
 0x554   :  { %4655 = vmatmul.bf16.gmra.mxu0 %v11169_v62  ;;  %4801 = vmatmul.bf16.gmra.mxu1 %v11169_v62 }
 0x555   :  { %4947 = vmatmul.bf16.gmra.mxu2 %v11169_v62  ;;  %5093 = vmatmul.bf16.gmra.mxu3 %v11169_v62 }
 0x561   :  { %v4621_v40 = vpop.f32.mrf.mxu0  ;;  %v4767_v49 = vpop.f32.mrf.mxu1 }
 0x564   :  { %5204 = vmatmul.bf16.vlgmr.msra.gmra.mxu0 %v11106_v54  ;;  %5350 = vmatmul.bf16.vlgmr.msra.gmra.mxu1 %v11106_v54 }
 0x565   :  { %5496 = vmatmul.bf16.vlgmr.msrb.gmra.mxu2 %v11106_v54 }
 0x568   :  { %v4913_v0 = vpop.f32.mrf.mxu2  ;;  %v5059_v59 = vpop.f32.mrf.mxu3 }
 0x569   :  { %v4623_v27 = vpop.f32.mrf.mxu0  ;;  %v4769_v21 = vpop.f32.mrf.mxu1 }
 0x56a   :  { %v10076_v48 = vpack.c.bf16 %v4623_v27, %v4621_v40  ;;  %v10116_v43 = vpack.c.bf16 %v4769_v21, %v4767_v49 }
 0x56c   :  { %10077 = vst [vmem:[#allocation2 + $0xb0] sm:$0xff] %v10076_v48  }
 0x56d   :  { %10470 = vst [vmem:[#allocation2 + $0x180] sm:$0xff] %v10116_v43  }
 0x570   :  { %v4915_v7 = vpop.f32.mrf.mxu2  ;;  %v5061_v35 = vpop.f32.mrf.mxu3 }
 0x571   :  { %v10156_v38 = vpack.c.bf16 %v4915_v7, %v4913_v0  ;;  %v10196_v1 = vpack.c.bf16 %v5061_v35, %v5059_v59  ;;  %v4626_v37 = vpop.f32.mrf.mxu0  ;;  %v4772_v44 = vpop.f32.mrf.mxu1 }
 0x573   :  { %10478 = vst [vmem:[#allocation2 + $0xe0] sm:$0xff] %v10156_v38  }
 0x574   :  { %10486 = vst [vmem:[#allocation2 + $0xe8] sm:$0xff] %v10196_v1   ;;  %5209 = vmatmul.bf16.gmra.mxu0 %v11114_v4  ;;  %5355 = vmatmul.bf16.gmra.mxu1 %v11114_v4 }
 0x575   :  { %5501 = vmatmul.bf16.gmra.mxu2 %v11114_v4 }
 0x578   :  { %v4918_v54 = vpop.f32.mrf.mxu2  ;;  %v5064_v45 = vpop.f32.mrf.mxu3 }
 0x579   :  { %v4628_v46 = vpop.f32.mrf.mxu0  ;;  %v4774_v36 = vpop.f32.mrf.mxu1 }
 0x57a   :  { %v10081_v57 = vpack.c.bf16 %v4628_v46, %v4626_v37  ;;  %v10121_v28 = vpack.c.bf16 %v4774_v36, %v4772_v44 }
 0x57c   :  { %10463 = vst [vmem:[#allocation2 + $0x1b0] sm:$0xff] %v10081_v57  }
 0x57d   :  { %10471 = vst [vmem:[#allocation2 + $0x110] sm:$0xff] %v10121_v28  }
 0x580   :  { %v4920_v61 = vpop.f32.mrf.mxu2  ;;  %v5066_v52 = vpop.f32.mrf.mxu3 }
 0x581   :  { %v10161_v53 = vpack.c.bf16 %v4920_v61, %v4918_v54  ;;  %v10201_v41 = vpack.c.bf16 %v5066_v52, %v5064_v45  ;;  %v4631_v32 = vpop.f32.mrf.mxu0  ;;  %v4777_v58 = vpop.f32.mrf.mxu1 }
 0x583   :  { %10479 = vst [vmem:[#allocation2 + $0x188] sm:$0xff] %v10161_v53  }
 0x584   :  { %10487 = vst [vmem:[#allocation2 + $0xf8] sm:$0xff] %v10201_v41   ;;  %5214 = vmatmul.bf16.gmra.mxu0 %v11122_v23  ;;  %5360 = vmatmul.bf16.gmra.mxu1 %v11122_v23 }
 0x585   :  { %5506 = vmatmul.bf16.gmra.mxu2 %v11122_v23 }
 0x588   :  { %v4923_v4 = vpop.f32.mrf.mxu2  ;;  %v5069_v56 = vpop.f32.mrf.mxu3 }
 0x589   :  { %v4633_v5 = vpop.f32.mrf.mxu0  ;;  %v4779_v3 = vpop.f32.mrf.mxu1 }
 0x58a   :  { %v10086_v8 = vpack.c.bf16 %v4633_v5, %v4631_v32  ;;  %v10126_v29 = vpack.c.bf16 %v4779_v3, %v4777_v58 }
 0x58c   :  { %10464 = vst [vmem:[#allocation2 + $0xd8] sm:$0xff] %v10086_v8  }
 0x58d   :  { %10472 = vst [vmem:[#allocation2 + $0x118] sm:$0xff] %v10126_v29  }
 0x590   :  { %v4925_v2 = vpop.f32.mrf.mxu2  ;;  %v5071_v20 = vpop.f32.mrf.mxu3 }
 0x591   :  { %v10166_v31 = vpack.c.bf16 %v4925_v2, %v4923_v4  ;;  %v10206_v11 = vpack.c.bf16 %v5071_v20, %v5069_v56  ;;  %v4636_v13 = vpop.f32.mrf.mxu0  ;;  %v4782_v63 = vpop.f32.mrf.mxu1 }
 0x593   :  { %10480 = vst [vmem:[#allocation2 + $0x138] sm:$0xff] %v10166_v31  }
 0x594   :  { %10488 = vst [vmem:[#allocation2 + $0x190] sm:$0xff] %v10206_v11   ;;  %5219 = vmatmul.bf16.gmra.mxu0 %v11133_v16  ;;  %5365 = vmatmul.bf16.gmra.mxu1 %v11133_v16 }
 0x595   :  { %5511 = vmatmul.bf16.gmra.mxu2 %v11133_v16 }
 0x598   :  { %v4928_v23 = vpop.f32.mrf.mxu2  ;;  %v5074_v24 = vpop.f32.mrf.mxu3 }
 0x599   :  { %v4638_v22 = vpop.f32.mrf.mxu0  ;;  %v4784_v60 = vpop.f32.mrf.mxu1 }
 0x59a   :  { %v10091_v6 = vpack.c.bf16 %v4638_v22, %v4636_v13  ;;  %v10131_v25 = vpack.c.bf16 %v4784_v60, %v4782_v63 }
 0x59c   :  { %10465 = vst [vmem:[#allocation2 + $0x18] sm:$0xff] %v10091_v6  }
 0x59d   :  { %10473 = vst [vmem:[#allocation2 + $0x98] sm:$0xff] %v10131_v25  }
 0x5a0   :  { %v4930_v10 = vpop.f32.mrf.mxu2  ;;  %v5076_v9 = vpop.f32.mrf.mxu3 }
 0x5a1   :  { %v10171_v50 = vpack.c.bf16 %v4930_v10, %v4928_v23  ;;  %v10211_v34 = vpack.c.bf16 %v5076_v9, %v5074_v24  ;;  %v4641_v14 = vpop.f32.mrf.mxu0  ;;  %v4787_v18 = vpop.f32.mrf.mxu1 }
 0x5a3   :  { %10481 = vst [vmem:[#allocation2 + $0x140] sm:$0xff] %v10171_v50  }
 0x5a4   :  { %10489 = vst [vmem:[#allocation2 + $0xb8] sm:$0xff] %v10211_v34   ;;  %5224 = vmatmul.bf16.gmra.mxu0 %v11143_v19  ;;  %5370 = vmatmul.bf16.gmra.mxu1 %v11143_v19 }
 0x5a5   :  { %5516 = vmatmul.bf16.gmra.mxu2 %v11143_v19 }
 0x5a8   :  { %v4933_v16 = vpop.f32.mrf.mxu2  ;;  %v5079_v47 = vpop.f32.mrf.mxu3 }
 0x5a9   :  { %v4643_v30 = vpop.f32.mrf.mxu0  ;;  %v4789_v55 = vpop.f32.mrf.mxu1 }
 0x5aa   :  { %v10096_v39 = vpack.c.bf16 %v4643_v30, %v4641_v14  ;;  %v10136_v33 = vpack.c.bf16 %v4789_v55, %v4787_v18 }
 0x5ac   :  { %10466 = vst [vmem:[#allocation2 + $0x50] sm:$0xff] %v10096_v39  }
 0x5ad   :  { %10474 = vst [vmem:[#allocation2 + $0x120] sm:$0xff] %v10136_v33  }
 0x5b0   :  { %v4935_v51 = vpop.f32.mrf.mxu2  ;;  %v5081_v12 = vpop.f32.mrf.mxu3 }
 0x5b1   :  { %v10176_v15 = vpack.c.bf16 %v4935_v51, %v4933_v16  ;;  %v10216_v26 = vpack.c.bf16 %v5081_v12, %v5079_v47  ;;  %v4646_v40 = vpop.f32.mrf.mxu0  ;;  %v4792_v49 = vpop.f32.mrf.mxu1  ;;  %v9460_v12 = vld [vmem:[#allocation2 + $0x18] sm:$0xff] }
 0x5b3   :  { %10482 = vst [vmem:[#allocation2 + $0x80] sm:$0xff] %v10176_v15   ;;  %v9461_v18 = vld [vmem:[#allocation2 + $0x50] sm:$0xff]  ;;  %v9468_v15 = vld [vmem:[#allocation2 + $0x98] sm:$0xff] }
 0x5b4   :  { %10490 = vst [vmem:[#allocation2 + $0x90] sm:$0xff] %v10216_v26   ;;  %5229 = vmatmul.bf16.gmra.mxu0 %v11153_v17  ;;  %5375 = vmatmul.bf16.gmra.mxu1 %v11153_v17  ;;  %v9469_v47 = vld [vmem:[#allocation2 + $0x120] sm:$0xff] }
 0x5b5   :  { %5521 = vmatmul.bf16.gmra.mxu2 %v11153_v17 }
 0x5b8   :  { %v4938_v19 = vpop.f32.mrf.mxu2  ;;  %v5084_v0 = vpop.f32.mrf.mxu3 }
 0x5b9   :  { %v4648_v59 = vpop.f32.mrf.mxu0  ;;  %v4794_v27 = vpop.f32.mrf.mxu1 }
 0x5ba   :  { %v10101_v21 = vpack.c.bf16 %v4648_v59, %v4646_v40  ;;  %v10141_v48 = vpack.c.bf16 %v4794_v27, %v4792_v49  ;;  %v9477_v26 = vld [vmem:[#allocation2 + $0x80] sm:$0xff]  ;;  %v9459_v49 = vld [vmem:[#allocation2 + $0xd8] sm:$0xff] }
 0x5bb   :  { %v9485_v40 = vld [vmem:[#allocation2 + $0x90] sm:$0xff] }
 0x5bc   :  { %10467 = vst [vmem:[#allocation2 + $0x168] sm:$0xff] %v10101_v21  }
 0x5bd   :  { %10475 = vst [vmem:[#allocation2 + $0x150] sm:$0xff] %v10141_v48  }
 0x5c0   :  { %v4940_v43 = vpop.f32.mrf.mxu2  ;;  %v5086_v7 = vpop.f32.mrf.mxu3 }
 0x5c1   :  { %v10181_v35 = vpack.c.bf16 %v4940_v43, %v4938_v19  ;;  %v10221_v38 = vpack.c.bf16 %v5086_v7, %v5084_v0  ;;  %v4651_v1 = vpop.f32.mrf.mxu0  ;;  %v4797_v37 = vpop.f32.mrf.mxu1  ;;  %v9467_v0 = vld [vmem:[#allocation2 + $0x118] sm:$0xff]  ;;  %v9476_v43 = vld [vmem:[#allocation2 + $0x140] sm:$0xff] }
 0x5c2   :  { %v9484_v7 = vld [vmem:[#allocation2 + $0xb8] sm:$0xff] }
 0x5c3   :  { %10483 = vst [vmem:[#allocation2 + $0x1a8] sm:$0xff] %v10181_v35   ;;  %v9462_v9 = vld [vmem:[#allocation2 + $0x168] sm:$0xff]  ;;  %v9458_v35 = vld [vmem:[#allocation2 + $0x1b0] sm:$0xff] }
 0x5c4   :  { %10491 = vst [vmem:[#allocation2 + $0xc0] sm:$0xff] %v10221_v38   ;;  %5234 = vmatmul.bf16.gmra.mxu0 %v11163_v42  ;;  %5380 = vmatmul.bf16.gmra.mxu1 %v11163_v42  ;;  %v9470_v50 = vld [vmem:[#allocation2 + $0x150] sm:$0xff] }
 0x5c5   :  { %5526 = vmatmul.bf16.gmra.mxu2 %v11163_v42  ;;  %v9466_v38 = vld [vmem:[#allocation2 + $0x110] sm:$0xff] }
 0x5c8   :  { %v4943_v17 = vpop.f32.mrf.mxu2  ;;  %v5089_v44 = vpop.f32.mrf.mxu3 }
 0x5c9   :  { %v4653_v54 = vpop.f32.mrf.mxu0  ;;  %v4799_v45 = vpop.f32.mrf.mxu1 }
 0x5ca   :  { %v10106_v46 = vpack.c.bf16 %v4653_v54, %v4651_v1  ;;  %v10146_v36 = vpack.c.bf16 %v4799_v45, %v4797_v37  ;;  %v9478_v33 = vld [vmem:[#allocation2 + $0x1a8] sm:$0xff]  ;;  %v8563_v1 = vld [vmem:[#allocation6] sm:$0xf]  ;;  %v9404_v37 = vld [vmem:[#allocation6 + $0x18] sm:$0xf0] }
 0x5cb   :  { %v9486_v51 = vld [vmem:[#allocation2 + $0xc0] sm:$0xff]  ;;  %v9483_v45 = vld [vmem:[#allocation2 + $0x190] sm:$0xff] }
 0x5cc   :  { %10468 = vst [vmem:[#allocation2 + $0x130] sm:$0xff] %v10106_v46   ;;  %v8565_v54 = vld [vmem:[#allocation6 + $0x1c] sm:$0xf0]  ;;  %v9457_v46 = vld [vmem:[#allocation2 + $0xb0] sm:$0xff] }
 0x5cd   :  { %10476 = vst [vmem:[#allocation2 + $0x108] sm:$0xff] %v10146_v36  }
 0x5d0   :  { %v4945_v57 = vpop.f32.mrf.mxu2  ;;  %v5091_v28 = vpop.f32.mrf.mxu3 }
 0x5d1   :  { %v10186_v61 = vpack.c.bf16 %v4945_v57, %v4943_v17  ;;  %v10226_v52 = vpack.c.bf16 %v5091_v28, %v5089_v44  ;;  %v4656_v53 = vpop.f32.mrf.mxu0  ;;  %v4802_v41 = vpop.f32.mrf.mxu1  ;;  %v9475_v17 = vld [vmem:[#allocation2 + $0x138] sm:$0xff]  ;;  %v9401_v44 = vld [vmem:[#allocation6 + $0x4] sm:$0xf]  ;;  %v8564_v28 = vor.u32 %v9404_v37, %v8563_v1 }
 0x5d2   :  { %v9465_v57 = vld [vmem:[#allocation2 + $0x180] sm:$0xff] }
 0x5d3   :  { %10484 = vst [vmem:[#allocation2 + $0x1b8] sm:$0xff] %v10186_v61  }
 0x5d4   :  { %10492 = vst [vmem:[#allocation2 + $0x178] sm:$0xff] %v10226_v52   ;;  %5239 = vmatmul.bf16.gmra.mxu0 %v11169_v62  ;;  %5385 = vmatmul.bf16.gmra.mxu1 %v11169_v62  ;;  %v9471_v23 = vld [vmem:[#allocation2 + $0x108] sm:$0xff] }
 0x5d5   :  { %5531 = vmatmul.bf16.gmra.mxu2 %v11169_v62  ;;  %v9463_v62 = vld [vmem:[#allocation2 + $0x130] sm:$0xff] }
 0x5d8   :  { %v4948_v42 = vpop.f32.mrf.mxu2  ;;  %v5094_v32 = vpop.f32.mrf.mxu3 }
 0x5d9   :  { %v4658_v58 = vpop.f32.mrf.mxu0  ;;  %v4804_v4 = vpop.f32.mrf.mxu1 }
 0x5da   :  { %v10111_v56 = vpack.c.bf16 %v4658_v58, %v4656_v53  ;;  %v10151_v5 = vpack.c.bf16 %v4804_v4, %v4802_v41  ;;  %v9479_v34 = vld [vmem:[#allocation2 + $0x1b8] sm:$0xff]  ;;  %v8568_v41 = vor.u32 %v9401_v44, %v8565_v54  ;;  %v8571_v58 = vld [vmem:[#allocation6 + $0x8] sm:$0xf]  ;;  %v9405_v4 = vld [vmem:[#allocation6 + $0x20] sm:$0xf0] }
 0x5db   :  { %v9487_v14 = vld [vmem:[#allocation2 + $0x178] sm:$0xff] }
 0x5dc   :  { %10469 = vst [vmem:[#allocation2 + $0x48] sm:$0xff] %v10111_v56   ;;  %v9402_v56 = vld [vmem:[#allocation6 + $0xc] sm:$0xf] }
 0x5dd   :  { %10477 = vst [vmem:[#allocation2 + $0x60] sm:$0xff] %v10151_v5   ;;  %v8573_v5 = vld [vmem:[#allocation6 + $0x24] sm:$0xf0] }
 0x5e0   :  { %v4950_v3 = vpop.f32.mrf.mxu2  ;;  %v5096_v8 = vpop.f32.mrf.mxu3 }
 0x5e1   :  { %v10191_v29 = vpack.c.bf16 %v4950_v3, %v4948_v42  ;;  %v10231_v2 = vpack.c.bf16 %v5096_v8, %v5094_v32  ;;  %v5205_v20 = vpop.f32.mrf.mxu0  ;;  %v5351_v31 = vpop.f32.mrf.mxu1  ;;  %v9474_v42 = vld [vmem:[#allocation2 + $0x188] sm:$0xff]  ;;  %v9482_v32 = vld [vmem:[#allocation2 + $0xf8] sm:$0xff]  ;;  %v9473_v3 = vld [vmem:[#allocation2 + $0xe0] sm:$0xff] }
 0x5e2   :  { %v9481_v8 = vld [vmem:[#allocation2 + $0xe8] sm:$0xff] }
 0x5e3   :  { %10485 = vst [vmem:[#allocation2 + $0x28] sm:$0xff] %v10191_v29   ;;  %v9464_v11 = vld [vmem:[#allocation2 + $0x48] sm:$0xff]  ;;  %v8572_v29 = vor.u32 %v9405_v4, %v8571_v58  ;;  %v8655_v4 = vld [vmem:[#allocation6 + $0xb0] sm:$0xf] }
 0x5e4   :  { %10493 = vst [vmem:[#allocation2 + $0xc8] sm:$0xff] %v10231_v2   ;;  %v9472_v13 = vld [vmem:[#allocation2 + $0x60] sm:$0xff]  ;;  %6386 = vmatpush.bf16.msrb.mxu3 %v9464_v11 }
 0x5e5   :  { %6435 = vmatpush.bf16.msrb.mxu0 %v9472_v13 }
 0x5e8   :  { %v5497_v63 = vpop.f32.mrf.mxu2  ;;  %6387 = vmatpush.bf16.msrb.mxu3 %v9463_v62 }
 0x5e9   :  { %v5207_v24 = vpop.f32.mrf.mxu0  ;;  %v5353_v22 = vpop.f32.mrf.mxu1  ;;  %6436 = vmatpush.bf16.msrb.mxu0 %v9471_v23  ;;  %v9411_v23 = vld [vmem:[#allocation6 + $0x50] sm:$0xf0] }
 0x5ea   :  { %v10236_v60 = vpack.c.bf16 %v5207_v24, %v5205_v20  ;;  %v10276_v6 = vpack.c.bf16 %v5353_v22, %v5351_v31  ;;  %v9480_v25 = vld [vmem:[#allocation2 + $0x28] sm:$0xff]  ;;  %v8576_v20 = vor.u32 %v9402_v56, %v8573_v5  ;;  %v9408_v24 = vld [vmem:[#allocation6 + $0x3c] sm:$0xf]  ;;  %v8593_v22 = vld [vmem:[#allocation6 + $0x54] sm:$0xf0] }
 0x5eb   :  { %v9488_v10 = vld [vmem:[#allocation2 + $0xc8] sm:$0xff]  ;;  %6484 = vmatpush.bf16.msrb.mxu1 %v9480_v25  ;;  %v9423_v5 = vld [vmem:[#allocation6 + $0xb4] sm:$0xf] }
 0x5ec   :  { %10494 = vst [vmem:[#allocation2] sm:$0xff] %v10236_v60   ;;  %6533 = vmatpush.bf16.msra.mxu2 %v9488_v10  ;;  %6388 = vmatpush.bf16.msrb.mxu3 %v9462_v9  ;;  %v9426_v56 = vld [vmem:[#allocation6 + $0xc8] sm:$0xf0] }
 0x5ed   :  { %10502 = vst [vmem:[#allocation2 + $0x10] sm:$0xff] %v10276_v6   ;;  %6437 = vmatpush.bf16.msrb.mxu0 %v9470_v50  ;;  %v8596_v50 = vor.u32 %v9408_v24, %v8593_v22  ;;  %v8677_v24 = vld [vmem:[#allocation6 + $0xfc] sm:$0xf0] }
 0x5ef   :  { %6485 = vmatpush.bf16.msrb.mxu1 %v9479_v34  ;;  %v8599_v34 = vld [vmem:[#allocation6 + $0x40] sm:$0xf] }
 0x5f0   :  { %v5499_v16 = vpop.f32.mrf.mxu2  ;;  %6534 = vmatpush.bf16.msra.mxu2 %v9487_v14  ;;  %6389 = vmatpush.bf16.msrb.mxu3 %v9461_v18  ;;  %v9412_v14 = vld [vmem:[#allocation6 + $0x58] sm:$0xf0]  ;;  %v9409_v18 = vld [vmem:[#allocation6 + $0x44] sm:$0xf] }
 0x5f1   :  { %v10316_v30 = vpack.c.bf16 %v5499_v16, %v5497_v63  ;;  %v5210_v55 = vpop.f32.mrf.mxu0  ;;  %v5356_v39 = vpop.f32.mrf.mxu1  ;;  %6438 = vmatpush.bf16.msrb.mxu0 %v9469_v47  ;;  %v8591_v63 = vld [vmem:[#allocation6 + $0x38] sm:$0xf]  ;;  %v8601_v16 = vld [vmem:[#allocation6 + $0x5c] sm:$0xf0]  ;;  %v8600_v47 = vor.u32 %v9412_v14, %v8599_v34  ;;  %v9433_v34 = vld [vmem:[#allocation6 + $0x100] sm:$0xf0] }
 0x5f2   :  { %v8592_v6 = vor.u32 %v9411_v23, %v8591_v63  ;;  %v9432_v63 = vld [vmem:[#allocation6 + $0xf8] sm:$0xf0]  ;;  %v9429_v23 = vld [vmem:[#allocation6 + $0xe4] sm:$0xf]  ;;  %v9430_v14 = vld [vmem:[#allocation6 + $0xec] sm:$0xf] }
 0x5f3   :  { %10510 = vst [vmem:[#allocation2 + $0x128] sm:$0xff] %v10316_v30   ;;  %6486 = vmatpush.bf16.msrb.mxu1 %v9478_v33 }
 0x5f4   :  { %6535 = vmatpush.bf16.msra.mxu2 %v9486_v51  ;;  %6390 = vmatpush.bf16.msrb.mxu3 %v9460_v12 }
 0x5f5   :  { %6439 = vmatpush.bf16.msrb.mxu0 %v9468_v15  ;;  %v8619_v15 = vld [vmem:[#allocation6 + $0x70] sm:$0xf] }
 0x5f7   :  { %6487 = vmatpush.bf16.msrb.mxu1 %v9477_v26  ;;  %v9418_v26 = vld [vmem:[#allocation6 + $0x88] sm:$0xf0] }
 0x5f8   :  { %v5502_v19 = vpop.f32.mrf.mxu2  ;;  %6536 = vmatpush.bf16.msra.mxu2 %v9485_v40  ;;  %6391 = vmatpush.bf16.msrb.mxu3 %v9459_v49  ;;  %v9415_v40 = vld [vmem:[#allocation6 + $0x74] sm:$0xf]  ;;  %v8621_v49 = vld [vmem:[#allocation6 + $0x8c] sm:$0xf0] }
 0x5f9   :  { %v5212_v59 = vpop.f32.mrf.mxu0  ;;  %v5358_v27 = vpop.f32.mrf.mxu1  ;;  %6440 = vmatpush.bf16.msrb.mxu0 %v9467_v0  ;;  %v8620_v0 = vor.u32 %v9418_v26, %v8619_v15  ;;  %v9439_v15 = vld [vmem:[#allocation6 + $0x130] sm:$0xf0]  ;;  %v9436_v26 = vld [vmem:[#allocation6 + $0x11c] sm:$0xf] }
 0x5fa   :  { %v10241_v21 = vpack.c.bf16 %v5212_v59, %v5210_v55  ;;  %v10281_v48 = vpack.c.bf16 %v5358_v27, %v5356_v39  ;;  %v8604_v55 = vor.u32 %v9409_v18, %v8601_v16  ;;  %v8685_v18 = vld [vmem:[#allocation6 + $0x104] sm:$0xf0] }
 0x5fb   :  { %6488 = vmatpush.bf16.msrb.mxu1 %v9476_v43  ;;  %v8627_v43 = vld [vmem:[#allocation6 + $0x78] sm:$0xf] }
 0x5fc   :  { %10495 = vst [vmem:[#allocation2 + $0x68] sm:$0xff] %v10241_v21   ;;  %6537 = vmatpush.bf16.msra.mxu2 %v9484_v7  ;;  %6392 = vmatpush.bf16.msrb.mxu3 %v9458_v35  ;;  %v9419_v7 = vld [vmem:[#allocation6 + $0x90] sm:$0xf0]  ;;  %v9416_v35 = vld [vmem:[#allocation6 + $0x7c] sm:$0xf] }
 0x5fd   :  { %10503 = vst [vmem:[#allocation2 + $0x100] sm:$0xff] %v10281_v48   ;;  %6441 = vmatpush.bf16.msrb.mxu0 %v9466_v38  ;;  %v8624_v48 = vor.u32 %v9415_v40, %v8621_v49  ;;  %v8629_v38 = vld [vmem:[#allocation6 + $0x94] sm:$0xf0]  ;;  %v8628_v1 = vor.u32 %v9419_v7, %v8627_v43  ;;  %v9440_v43 = vld [vmem:[#allocation6 + $0x138] sm:$0xf0] }
 0x5fe   :  { %v8705_v40 = vld [vmem:[#allocation6 + $0x134] sm:$0xf0]  ;;  %v9437_v7 = vld [vmem:[#allocation6 + $0x124] sm:$0xf] }
 0x5ff   :  { %6489 = vmatpush.bf16.msrb.mxu1 %v9475_v17  ;;  %v8632_v17 = vor.u32 %v9416_v35, %v8629_v38  ;;  %v8713_v35 = vld [vmem:[#allocation6 + $0x13c] sm:$0xf0] }
 0x600   :  { %v5504_v36 = vpop.f32.mrf.mxu2  ;;  %6538 = vmatpush.bf16.msra.mxu2 %v9483_v45  ;;  %6393 = vmatpush.bf16.msrb.mxu3 %v9457_v46 }
 0x601   :  { %v10321_v61 = vpack.c.bf16 %v5504_v36, %v5502_v19  ;;  %v5215_v52 = vpop.f32.mrf.mxu0  ;;  %v5361_v53 = vpop.f32.mrf.mxu1  ;;  %6442 = vmatpush.bf16.msrb.mxu0 %v9465_v57  ;;  %v8647_v36 = vld [vmem:[#allocation6 + $0xa8] sm:$0xf]  ;;  %v9425_v57 = vld [vmem:[#allocation6 + $0xc0] sm:$0xf0] }
 0x603   :  { %10511 = vst [vmem:[#allocation2 + $0x38] sm:$0xff] %v10321_v61   ;;  %6490 = vmatpush.bf16.msrb.mxu1 %v9474_v42  ;;  %6394 = vmatmul.bf16.vlgmr.msrb.gmra.mxu3 %v8564_v28  ;;  %v9422_v28 = vld [vmem:[#allocation6 + $0xac] sm:$0xf]  ;;  %v8649_v61 = vld [vmem:[#allocation6 + $0xc4] sm:$0xf0] }
 0x604   :  { %6539 = vmatpush.bf16.msra.mxu2 %v9482_v32  ;;  %6443 = vmatmul.bf16.vlgmr.msrb.gmra.mxu0 %v8568_v41  ;;  %v8652_v58 = vor.u32 %v9422_v28, %v8649_v61  ;;  %v8733_v28 = vld [vmem:[#allocation6 + $0x16c] sm:$0xf0] }
 0x607   :  { %6491 = vmatpush.bf16.msrb.mxu1 %v9473_v3  ;;  %v8657_v3 = vld [vmem:[#allocation6 + $0xcc] sm:$0xf0] }
 0x608   :  { %v5507_v2 = vpop.f32.mrf.mxu2  ;;  %6540 = vmatpush.bf16.msra.mxu2 %v9481_v8  ;;  %v8656_v8 = vor.u32 %v9426_v56, %v8655_v4  ;;  %v9447_v4 = vld [vmem:[#allocation6 + $0x170] sm:$0xf0]  ;;  %v9444_v56 = vld [vmem:[#allocation6 + $0x15c] sm:$0xf] }
 0x609   :  { %v5217_v31 = vpop.f32.mrf.mxu0  ;;  %v5363_v11 = vpop.f32.mrf.mxu1 }
 0x60a   :  { %v10246_v13 = vpack.c.bf16 %v5217_v31, %v5215_v52  ;;  %v10286_v62 = vpack.c.bf16 %v5363_v11, %v5361_v53  ;;  %6492 = vmatmul.bf16.vlgmr.msrb.gmra.mxu1 %v8572_v29  ;;  %v8648_v53 = vor.u32 %v9425_v57, %v8647_v36  ;;  %v9446_v36 = vld [vmem:[#allocation6 + $0x168] sm:$0xf0]  ;;  %v9443_v57 = vld [vmem:[#allocation6 + $0x154] sm:$0xf] }
 0x60b   :  { %6541 = vmatmul.bf16.vlgmr.msra.gmra.mxu2 %v8576_v20 }
 0x60c   :  { %10496 = vst [vmem:[#allocation2 + $0x148] sm:$0xff] %v10246_v13  }
 0x60d   :  { %10504 = vst [vmem:[#allocation2 + $0x160] sm:$0xff] %v10286_v62   ;;  %v8675_v62 = vld [vmem:[#allocation6 + $0xe0] sm:$0xf] }
 0x610   :  { %v5509_v60 = vpop.f32.mrf.mxu2 }
 0x611   :  { %v10326_v25 = vpack.c.bf16 %v5509_v60, %v5507_v2  ;;  %v5220_v10 = vpop.f32.mrf.mxu0  ;;  %v5366_v9 = vpop.f32.mrf.mxu1  ;;  %v8660_v2 = vor.u32 %v9423_v5, %v8657_v3  ;;  %v8676_v60 = vor.u32 %v9432_v63, %v8675_v62  ;;  %v8741_v5 = vld [vmem:[#allocation6 + $0x174] sm:$0xf0]  ;;  %v9453_v62 = vld [vmem:[#allocation6 + $0x1a0] sm:$0xf0] }
 0x613   :  { %10512 = vst [vmem:[#allocation2 + $0x88] sm:$0xff] %v10326_v25   ;;  %6399 = vmatmul.bf16.gmra.mxu3 %v8592_v6 }
 0x614   :  { %6448 = vmatmul.bf16.gmra.mxu0 %v8596_v50  ;;  %v8683_v50 = vld [vmem:[#allocation6 + $0xe8] sm:$0xf] }
 0x615   :  { %v8684_v16 = vor.u32 %v9433_v34, %v8683_v50  ;;  %v8767_v34 = vld [vmem:[#allocation6 + $0x190] sm:$0xf] }
 0x618   :  { %v5512_v30 = vpop.f32.mrf.mxu2 }
 0x619   :  { %v5222_v39 = vpop.f32.mrf.mxu0  ;;  %v5368_v33 = vpop.f32.mrf.mxu1 }
 0x61a   :  { %v10251_v51 = vpack.c.bf16 %v5222_v39, %v5220_v10  ;;  %v10291_v12 = vpack.c.bf16 %v5368_v33, %v5366_v9  ;;  %6497 = vmatmul.bf16.gmra.mxu1 %v8600_v47  ;;  %v8680_v9 = vor.u32 %v9429_v23, %v8677_v24  ;;  %v9450_v23 = vld [vmem:[#allocation6 + $0x18c] sm:$0xf]  ;;  %v8761_v24 = vld [vmem:[#allocation6 + $0x1a4] sm:$0xf0] }
 0x61b   :  { %6546 = vmatmul.bf16.gmra.mxu2 %v8604_v55 }
 0x61c   :  { %10497 = vst [vmem:[#allocation2 + $0x8] sm:$0xff] %v10251_v51  }
 0x61d   :  { %10505 = vst [vmem:[#allocation2 + $0x20] sm:$0xff] %v10291_v12   ;;  %v8703_v12 = vld [vmem:[#allocation6 + $0x118] sm:$0xf] }
 0x620   :  { %v5514_v19 = vpop.f32.mrf.mxu2 }
 0x621   :  { %v10331_v59 = vpack.c.bf16 %v5514_v19, %v5512_v30  ;;  %v5225_v27 = vpop.f32.mrf.mxu0  ;;  %v5371_v21 = vpop.f32.mrf.mxu1  ;;  %v8688_v30 = vor.u32 %v9430_v14, %v8685_v18  ;;  %v8704_v19 = vor.u32 %v9439_v15, %v8703_v12  ;;  %v9454_v14 = vld [vmem:[#allocation6 + $0x1a8] sm:$0xf0]  ;;  %v9451_v18 = vld [vmem:[#allocation6 + $0x194] sm:$0xf]  ;;  %v9498_v15 = vld [vmem:[#allocation2 + $0x100] sm:$0xff] }
 0x622   :  { %v9490_v12 = vld [vmem:[#allocation2 + $0x68] sm:$0xff] }
 0x623   :  { %10513 = vst [vmem:[#allocation2 + $0x170] sm:$0xff] %v10331_v59   ;;  %6404 = vmatmul.bf16.gmra.mxu3 %v8620_v0 }
 0x624   :  { %6453 = vmatmul.bf16.gmra.mxu0 %v8624_v48  ;;  %v8711_v48 = vld [vmem:[#allocation6 + $0x120] sm:$0xf] }
 0x625   :  { %v8712_v38 = vor.u32 %v9440_v43, %v8711_v48  ;;  %v9500_v50 = vld [vmem:[#allocation2 + $0x20] sm:$0xff]  ;;  %v9506_v43 = vld [vmem:[#allocation2 + $0x38] sm:$0xff] }
 0x628   :  { %v5517_v37 = vpop.f32.mrf.mxu2 }
 0x629   :  { %v5227_v44 = vpop.f32.mrf.mxu0  ;;  %v5373_v54 = vpop.f32.mrf.mxu1 }
 0x62a   :  { %v10256_v45 = vpack.c.bf16 %v5227_v44, %v5225_v27  ;;  %v10296_v46 = vpack.c.bf16 %v5373_v54, %v5371_v21  ;;  %6502 = vmatmul.bf16.gmra.mxu1 %v8628_v1  ;;  %v8708_v21 = vor.u32 %v9436_v26, %v8705_v40  ;;  %v8579_v26 = vld [vmem:[#allocation6 + $0x10] sm:$0xf]  ;;  %v9406_v40 = vld [vmem:[#allocation6 + $0x28] sm:$0xf0] }
 0x62b   :  { %6551 = vmatmul.bf16.gmra.mxu2 %v8632_v17 }
 0x62c   :  { %10498 = vst [vmem:[#allocation2 + $0x40] sm:$0xff] %v10256_v45  }
 0x62d   :  { %10506 = vst [vmem:[#allocation2 + $0x70] sm:$0xff] %v10296_v46   ;;  %v8731_v46 = vld [vmem:[#allocation6 + $0x150] sm:$0xf] }
 0x630   :  { %v5519_v52 = vpop.f32.mrf.mxu2 }
 0x631   :  { %v10336_v41 = vpack.c.bf16 %v5519_v52, %v5517_v37  ;;  %v5230_v42 = vpop.f32.mrf.mxu0  ;;  %v5376_v32 = vpop.f32.mrf.mxu1  ;;  %v8716_v37 = vor.u32 %v9437_v7, %v8713_v35  ;;  %v8732_v52 = vor.u32 %v9446_v36, %v8731_v46  ;;  %v8587_v35 = vld [vmem:[#allocation6 + $0x18] sm:$0xf]  ;;  %v8607_v36 = vld [vmem:[#allocation6 + $0x48] sm:$0xf] }
 0x633   :  { %10514 = vst [vmem:[#allocation2 + $0x58] sm:$0xff] %v10336_v41   ;;  %6409 = vmatmul.bf16.gmra.mxu3 %v8648_v53  ;;  %v8736_v41 = vor.u32 %v9443_v57, %v8733_v28  ;;  %v9413_v57 = vld [vmem:[#allocation6 + $0x60] sm:$0xf0]  ;;  %v9410_v28 = vld [vmem:[#allocation6 + $0x4c] sm:$0xf] }
 0x634   :  { %6458 = vmatmul.bf16.gmra.mxu0 %v8652_v58  ;;  %v8739_v58 = vld [vmem:[#allocation6 + $0x158] sm:$0xf] }
 0x638   :  { %v5522_v29 = vpop.f32.mrf.mxu2 }
 0x639   :  { %v5232_v20 = vpop.f32.mrf.mxu0  ;;  %v5378_v31 = vpop.f32.mrf.mxu1 }
 0x63a   :  { %v10261_v11 = vpack.c.bf16 %v5232_v20, %v5230_v42  ;;  %v10301_v13 = vpack.c.bf16 %v5378_v31, %v5376_v32  ;;  %6507 = vmatmul.bf16.gmra.mxu1 %v8656_v8  ;;  %v8740_v8 = vor.u32 %v9447_v4, %v8739_v58 }
 0x63b   :  { %6556 = vmatmul.bf16.gmra.mxu2 %v8660_v2  ;;  %v8744_v2 = vor.u32 %v9444_v56, %v8741_v5  ;;  %v8615_v56 = vld [vmem:[#allocation6 + $0x50] sm:$0xf]  ;;  %v9414_v5 = vld [vmem:[#allocation6 + $0x68] sm:$0xf0] }
 0x63c   :  { %10499 = vst [vmem:[#allocation2 + $0xa8] sm:$0xff] %v10261_v11  }
 0x63d   :  { %10507 = vst [vmem:[#allocation2 + $0x78] sm:$0xff] %v10301_v13   ;;  %v8759_v13 = vld [vmem:[#allocation6 + $0x188] sm:$0xf] }
 0x640   :  { %v5524_v22 = vpop.f32.mrf.mxu2 }
 0x641   :  { %v10341_v6 = vpack.c.bf16 %v5524_v22, %v5522_v29  ;;  %v5235_v25 = vpop.f32.mrf.mxu0  ;;  %v5381_v10 = vpop.f32.mrf.mxu1  ;;  %v9493_v22 = vld [vmem:[#allocation2 + $0x40] sm:$0xff] }
 0x643   :  { %10515 = vst [vmem:[#allocation2 + $0xf0] sm:$0xff] %v10341_v6   ;;  %6414 = vmatmul.bf16.gmra.mxu3 %v8676_v60  ;;  %v9494_v31 = vld [vmem:[#allocation2 + $0xa8] sm:$0xff]  ;;  %v9501_v60 = vld [vmem:[#allocation2 + $0x70] sm:$0xff]  ;;  %v8760_v6 = vor.u32 %v9453_v62, %v8759_v13  ;;  %v9420_v13 = vld [vmem:[#allocation6 + $0x98] sm:$0xf0] }
 0x644   :  { %6463 = vmatmul.bf16.gmra.mxu0 %v8680_v9  ;;  %v9502_v11 = vld [vmem:[#allocation2 + $0x78] sm:$0xff]  ;;  %v9492_v9 = vld [vmem:[#allocation2 + $0x8] sm:$0xff]  ;;  %v9417_v62 = vld [vmem:[#allocation6 + $0x84] sm:$0xf] }
 0x648   :  { %v5527_v47 = vpop.f32.mrf.mxu2 }
 0x649   :  { %v5237_v55 = vpop.f32.mrf.mxu0  ;;  %v5383_v39 = vpop.f32.mrf.mxu1 }
 0x64a   :  { %v10266_v33 = vpack.c.bf16 %v5237_v55, %v5235_v25  ;;  %v10306_v51 = vpack.c.bf16 %v5383_v39, %v5381_v10  ;;  %6512 = vmatmul.bf16.gmra.mxu1 %v8684_v16  ;;  %v8764_v25 = vor.u32 %v9450_v23, %v8761_v24  ;;  %v9510_v10 = vld [vmem:[#allocation2 + $0xf0] sm:$0xff]  ;;  %v8768_v55 = vor.u32 %v9454_v14, %v8767_v34  ;;  %v9499_v39 = vld [vmem:[#allocation2 + $0x160] sm:$0xff] }
 0x64b   :  { %6561 = vmatmul.bf16.gmra.mxu2 %v8688_v30  ;;  %v8769_v16 = vld [vmem:[#allocation6 + $0x1ac] sm:$0xf0]  ;;  %v9491_v30 = vld [vmem:[#allocation2 + $0x148] sm:$0xff] }
 0x64c   :  { %10500 = vst [vmem:[#allocation2 + $0xd0] sm:$0xff] %v10266_v33   ;;  %v8772_v33 = vor.u32 %v9451_v18, %v8769_v16 }
 0x64d   :  { %10508 = vst [vmem:[#allocation2 + $0xa0] sm:$0xff] %v10306_v51   ;;  %v9508_v51 = vld [vmem:[#allocation2 + $0x170] sm:$0xff] }
 0x650   :  { %v5529_v49 = vpop.f32.mrf.mxu2 }
 0x651   :  { %v10346_v0 = vpack.c.bf16 %v5529_v49, %v5527_v47  ;;  %v5240_v59 = vpop.f32.mrf.mxu0  ;;  %v5386_v27 = vpop.f32.mrf.mxu1  ;;  %v9509_v47 = vld [vmem:[#allocation2 + $0x58] sm:$0xff]  ;;  %v9507_v49 = vld [vmem:[#allocation2 + $0x88] sm:$0xff] }
 0x653   :  { %10516 = vst [vmem:[#allocation2 + $0x30] sm:$0xff] %v10346_v0   ;;  %6419 = vmatmul.bf16.gmra.mxu3 %v8704_v19  ;;  %v9495_v3 = vld [vmem:[#allocation2 + $0xd0] sm:$0xff] }
 0x654   :  { %6468 = vmatmul.bf16.gmra.mxu0 %v8708_v21  ;;  %v9503_v29 = vld [vmem:[#allocation2 + $0xa0] sm:$0xff]  ;;  %v9403_v19 = vld [vmem:[#allocation6 + $0x14] sm:$0xf]  ;;  %v8581_v0 = vld [vmem:[#allocation6 + $0x2c] sm:$0xf0]  ;;  %v8580_v21 = vor.u32 %v9406_v40, %v8579_v26 }
 0x655   :  { %v8584_v48 = vor.u32 %v9403_v19, %v8581_v0 }
 0x658   :  { %v5532_v1 = vpop.f32.mrf.mxu2 }
 0x659   :  { %v5242_v17 = vpop.f32.mrf.mxu0  ;;  %v5388_v44 = vpop.f32.mrf.mxu1 }
 0x65a   :  { %v10271_v54 = vpack.c.bf16 %v5242_v17, %v5240_v59  ;;  %v10311_v45 = vpack.c.bf16 %v5388_v44, %v5386_v27  ;;  %6517 = vmatmul.bf16.gmra.mxu1 %v8712_v38  ;;  %v9511_v63 = vld [vmem:[#allocation2 + $0x30] sm:$0xff]  ;;  %v9489_v59 = vld [vmem:[#allocation2] sm:$0xff] }
 0x65b   :  { %6566 = vmatmul.bf16.gmra.mxu2 %v8716_v37  ;;  %v9497_v27 = vld [vmem:[#allocation2 + $0x10] sm:$0xff] }
 0x65c   :  { %10501 = vst [vmem:[#allocation2 + $0x1a0] sm:$0xff] %v10271_v54   ;;  %v9407_v38 = vld [vmem:[#allocation6 + $0x30] sm:$0xf0] }
 0x65d   :  { %10509 = vst [vmem:[#allocation2 + $0x158] sm:$0xff] %v10311_v45   ;;  %v8588_v17 = vor.u32 %v9407_v38, %v8587_v35 }
 0x660   :  { %v5534_v61 = vpop.f32.mrf.mxu2 }
 0x661   :  { %v10351_v53 = vpack.c.bf16 %v5534_v61, %v5532_v1  ;;  %v9505_v1 = vld [vmem:[#allocation2 + $0x128] sm:$0xff] }
 0x662   :  { %v8609_v61 = vld [vmem:[#allocation6 + $0x64] sm:$0xf0] }
 0x663   :  { %10517 = vst [vmem:[#allocation2 + $0x198] sm:$0xff] %v10351_v53   ;;  %v9496_v42 = vld [vmem:[#allocation2 + $0x1a0] sm:$0xff]  ;;  %6424 = vmatmul.bf16.gmra.mxu3 %v8732_v52 }
 0x664   :  { %v9504_v32 = vld [vmem:[#allocation2 + $0x158] sm:$0xff]  ;;  %6582 = vmatpush.bf16.msra.mxu3 %v9496_v42  ;;  %6473 = vmatmul.bf16.gmra.mxu0 %v8736_v41  ;;  %v8608_v42 = vor.u32 %v9413_v57, %v8607_v36 }
 0x665   :  { %6631 = vmatpush.bf16.msra.mxu0 %v9504_v32  ;;  %v8612_v32 = vor.u32 %v9410_v28, %v8609_v61 }
 0x668   :  { %6583 = vmatpush.bf16.msra.mxu3 %v9495_v3 }
 0x669   :  { %6632 = vmatpush.bf16.msra.mxu0 %v9503_v29 }
 0x66a   :  { %v9512_v20 = vld [vmem:[#allocation2 + $0x198] sm:$0xff]  ;;  %6522 = vmatmul.bf16.gmra.mxu1 %v8740_v8  ;;  %v8616_v8 = vor.u32 %v9414_v5, %v8615_v56 }
 0x66b   :  { %6680 = vmatpush.bf16.msra.mxu1 %v9512_v20  ;;  %6571 = vmatmul.bf16.gmra.mxu2 %v8744_v2 }
 0x66c   :  { %6584 = vmatpush.bf16.msra.mxu3 %v9494_v31 }
 0x66d   :  { %6633 = vmatpush.bf16.msra.mxu0 %v9502_v11  ;;  %v8635_v11 = vld [vmem:[#allocation6 + $0x80] sm:$0xf] }
 0x66f   :  { %6681 = vmatpush.bf16.msra.mxu1 %v9511_v63  ;;  %v8637_v63 = vld [vmem:[#allocation6 + $0x9c] sm:$0xf0] }
 0x670   :  { %6585 = vmatpush.bf16.msra.mxu3 %v9493_v22 }
 0x671   :  { %6634 = vmatpush.bf16.msra.mxu0 %v9501_v60  ;;  %v8636_v60 = vor.u32 %v9420_v13, %v8635_v11 }
 0x673   :  { %6682 = vmatpush.bf16.msra.mxu1 %v9510_v10  ;;  %6429 = vmatmul.bf16.gmra.mxu3 %v8760_v6  ;;  %v8640_v6 = vor.u32 %v9417_v62, %v8637_v63 }
 0x674   :  { %6586 = vmatpush.bf16.msra.mxu3 %v9492_v9  ;;  %6478 = vmatmul.bf16.gmra.mxu0 %v8764_v25  ;;  %v8643_v9 = vld [vmem:[#allocation6 + $0x88] sm:$0xf] }
 0x675   :  { %6635 = vmatpush.bf16.msra.mxu0 %v9500_v50  ;;  %v9421_v50 = vld [vmem:[#allocation6 + $0xa0] sm:$0xf0] }
 0x676   :  { %v8644_v14 = vor.u32 %v9421_v50, %v8643_v9 }
 0x677   :  { %6683 = vmatpush.bf16.msra.mxu1 %v9509_v47 }
 0x678   :  { %6587 = vmatpush.bf16.msra.mxu3 %v9491_v30 }
 0x679   :  { %6636 = vmatpush.bf16.msra.mxu0 %v9499_v39  ;;  %v9427_v39 = vld [vmem:[#allocation6 + $0xd0] sm:$0xf0] }
 0x67a   :  { %6527 = vmatmul.bf16.gmra.mxu1 %v8768_v55  ;;  %v8663_v55 = vld [vmem:[#allocation6 + $0xb8] sm:$0xf] }
 0x67b   :  { %6684 = vmatpush.bf16.msra.mxu1 %v9508_v51  ;;  %6576 = vmatmul.bf16.gmra.mxu2 %v8772_v33  ;;  %v9424_v33 = vld [vmem:[#allocation6 + $0xbc] sm:$0xf]  ;;  %v8665_v51 = vld [vmem:[#allocation6 + $0xd4] sm:$0xf0]  ;;  %v8664_v40 = vor.u32 %v9427_v39, %v8663_v55  ;;  %v9445_v55 = vld [vmem:[#allocation6 + $0x164] sm:$0xf] }
 0x67c   :  { %6588 = vmatpush.bf16.msra.mxu3 %v9490_v12  ;;  %v8749_v39 = vld [vmem:[#allocation6 + $0x17c] sm:$0xf0] }
 0x67d   :  { %6637 = vmatpush.bf16.msra.mxu0 %v9498_v15 }
 0x67f   :  { %6685 = vmatpush.bf16.msra.mxu1 %v9507_v49  ;;  %v8668_v49 = vor.u32 %v9424_v33, %v8665_v51 }
 0x680   :  { %6589 = vmatpush.bf16.msra.mxu3 %v9489_v59  ;;  %v8671_v59 = vld [vmem:[#allocation6 + $0xc0] sm:$0xf] }
 0x681   :  { %6638 = vmatpush.bf16.msra.mxu0 %v9497_v27  ;;  %v6444_v7 = vpop.f32.mrf.mxu0  ;;  %v9428_v27 = vld [vmem:[#allocation6 + $0xd8] sm:$0xf0] }
 0x683   :  { %6686 = vmatpush.bf16.msra.mxu1 %v9506_v43  ;;  %6590 = vmatmul.bf16.vlgmr.msra.gmra.mxu3 %v8580_v21 }
 0x684   :  { %6639 = vmatmul.bf16.vlgmr.msra.gmra.mxu0 %v8584_v48  ;;  %v8672_v48 = vor.u32 %v9428_v27, %v8671_v59  ;;  %v9449_v59 = vld [vmem:[#allocation6 + $0x180] sm:$0xf0] }
 0x686   :  { %v6395_v37 = vpop.f32.mrf.mxu3 }
 0x687   :  { %6687 = vmatpush.bf16.msra.mxu1 %v9505_v1  ;;  %v6445_v44 = vadd.f32 %v6444_v7, %v6395_v37  ;;  %v6493_v54 = vpop.f32.mrf.mxu1  ;;  %v8691_v1 = vld [vmem:[#allocation6 + $0xf0] sm:$0xf]  ;;  %v9434_v37 = vld [vmem:[#allocation6 + $0x108] sm:$0xf0] }
 0x688   :  { %v8692_v57 = vor.u32 %v9434_v37, %v8691_v1  ;;  %v8775_v37 = vld [vmem:[#allocation6 + $0x198] sm:$0xf] }
 0x689   :  { %v11199_v45 = vadd.f32 %v6493_v54, %v6445_v44  ;;  %v6446_v46 = vpop.f32.mrf.mxu0  ;;  %v8693_v44 = vld [vmem:[#allocation6 + $0x10c] sm:$0xf0] }
 0x68a   :  { %6688 = vmatmul.bf16.vlgmr.msra.gmra.mxu1 %v8588_v17  ;;  %v9431_v17 = vld [vmem:[#allocation6 + $0xf4] sm:$0xf] }
 0x68b   :  { %v8696_v28 = vor.u32 %v9431_v17, %v8693_v44  ;;  %v9455_v17 = vld [vmem:[#allocation6 + $0x1b0] sm:$0xf0]  ;;  %v9452_v44 = vld [vmem:[#allocation6 + $0x19c] sm:$0xf] }
 0x68e   :  { %v6397_v52 = vpop.f32.mrf.mxu3  ;;  %v6542_v27 = vpop.f32.mrf.mxu2 }
 0x68f   :  { %v6447_v53 = vadd.f32 %v6446_v46, %v6397_v52  ;;  %v6495_v41 = vpop.f32.mrf.mxu1 }
 0x691   :  { %v11201_v58 = vadd.f32 %v6495_v41, %v6447_v53  ;;  %v6449_v4 = vpop.f32.mrf.mxu0  ;;  %v8699_v53 = vld [vmem:[#allocation6 + $0xf8] sm:$0xf]  ;;  %v9435_v41 = vld [vmem:[#allocation6 + $0x110] sm:$0xf0] }
 0x693   :  { %6595 = vmatmul.bf16.gmra.mxu3 %v8608_v42 }
 0x694   :  { %6644 = vmatmul.bf16.gmra.mxu0 %v8612_v32  ;;  %v8700_v32 = vor.u32 %v9435_v41, %v8699_v53 }
 0x696   :  { %v6400_v3 = vpop.f32.mrf.mxu3 }
 0x697   :  { %v6450_v29 = vadd.f32 %v6449_v4, %v6400_v3  ;;  %v6498_v2 = vpop.f32.mrf.mxu1 }
 0x699   :  { %v11203_v20 = vadd.f32 %v6498_v2, %v6450_v29  ;;  %v6451_v31 = vpop.f32.mrf.mxu0  ;;  %v9441_v29 = vld [vmem:[#allocation6 + $0x140] sm:$0xf0]  ;;  %v9438_v2 = vld [vmem:[#allocation6 + $0x12c] sm:$0xf] }
 0x69a   :  { %6693 = vmatmul.bf16.gmra.mxu1 %v8616_v8  ;;  %v8719_v8 = vld [vmem:[#allocation6 + $0x128] sm:$0xf] }
 0x69b   :  { %v8720_v63 = vor.u32 %v9441_v29, %v8719_v8 }
 0x69e   :  { %v6402_v23 = vpop.f32.mrf.mxu3 }
 0x69f   :  { %v6452_v24 = vadd.f32 %v6451_v31, %v6402_v23  ;;  %v6500_v22 = vpop.f32.mrf.mxu1  ;;  %v8721_v31 = vld [vmem:[#allocation6 + $0x144] sm:$0xf0] }
 0x6a0   :  { %v8724_v23 = vor.u32 %v9438_v2, %v8721_v31 }
 0x6a1   :  { %v11205_v25 = vadd.f32 %v6500_v22, %v6452_v24  ;;  %v6454_v10 = vpop.f32.mrf.mxu0 }
 0x6a3   :  { %6600 = vmatmul.bf16.gmra.mxu3 %v8636_v60  ;;  %v8727_v60 = vld [vmem:[#allocation6 + $0x130] sm:$0xf] }
 0x6a4   :  { %6649 = vmatmul.bf16.gmra.mxu0 %v8640_v6  ;;  %v9442_v6 = vld [vmem:[#allocation6 + $0x148] sm:$0xf0] }
 0x6a5   :  { %v8728_v9 = vor.u32 %v9442_v6, %v8727_v60  ;;  %v6745_v6 = vlaneseq }
 0x6a6   :  { %v6405_v34 = vpop.f32.mrf.mxu3 }
 0x6a7   :  { %v6455_v18 = vadd.f32 %v6454_v10, %v6405_v34  ;;  %v6503_v16 = vpop.f32.mrf.mxu1 }
 0x6a9   :  { %v11207_v47 = vadd.f32 %v6503_v16, %v6455_v18  ;;  %v6456_v30 = vpop.f32.mrf.mxu0  ;;  %v8747_v16 = vld [vmem:[#allocation6 + $0x160] sm:$0xf] }
 0x6aa   :  { %6698 = vmatmul.bf16.gmra.mxu1 %v8644_v14 }
 0x6ae   :  { %v6407_v12 = vpop.f32.mrf.mxu3 }
 0x6af   :  { %v6457_v15 = vadd.f32 %v6456_v30, %v6407_v12  ;;  %v6505_v26 = vpop.f32.mrf.mxu1  ;;  %v9448_v30 = vld [vmem:[#allocation6 + $0x178] sm:$0xf0] }
 0x6b1   :  { %v11209_v19 = vadd.f32 %v6505_v26, %v6457_v15  ;;  %v6459_v0 = vpop.f32.mrf.mxu0  ;;  %v8748_v15 = vor.u32 %v9448_v30, %v8747_v16  ;;  %v8752_v26 = vor.u32 %v9445_v55, %v8749_v39  ;;  %v5570_v55 = vld [vmem:[#allocation9 + $0x100] sm:$0xff] }
 0x6b3   :  { %6605 = vmatmul.bf16.gmra.mxu3 %v8664_v40 }
 0x6b4   :  { %6654 = vmatmul.bf16.gmra.mxu0 %v8668_v49 }
 0x6b6   :  { %v6410_v21 = vpop.f32.mrf.mxu3 }
 0x6b7   :  { %v6460_v43 = vadd.f32 %v6459_v0, %v6410_v21  ;;  %v6508_v7 = vpop.f32.mrf.mxu1  ;;  %v8755_v0 = vld [vmem:[#allocation6 + $0x168] sm:$0xf] }
 0x6b9   :  { %v11211_v35 = vadd.f32 %v6508_v7, %v6460_v43  ;;  %v6461_v38 = vpop.f32.mrf.mxu0 }
 0x6ba   :  { %6703 = vmatmul.bf16.gmra.mxu1 %v8672_v48  ;;  %v8756_v48 = vor.u32 %v9449_v59, %v8755_v0 }
 0x6be   :  { %v6412_v54 = vpop.f32.mrf.mxu3 }
 0x6bf   :  { %v6462_v46 = vadd.f32 %v6461_v38, %v6412_v54  ;;  %v6510_v36 = vpop.f32.mrf.mxu1  ;;  %v8777_v54 = vld [vmem:[#allocation6 + $0x1b4] sm:$0xf0] }
 0x6c0   :  { %v8780_v53 = vor.u32 %v9452_v44, %v8777_v54 }
 0x6c1   :  { %v11213_v61 = vadd.f32 %v6510_v36, %v6462_v46  ;;  %v6464_v52 = vpop.f32.mrf.mxu0  ;;  %v6544_v46 = vpop.f32.mrf.mxu2 }
 0x6c3   :  { %6610 = vmatmul.bf16.gmra.mxu3 %v8692_v57 }
 0x6c4   :  { %6659 = vmatmul.bf16.gmra.mxu0 %v8696_v28 }
 0x6c6   :  { %v6415_v42 = vpop.f32.mrf.mxu3 }
 0x6c7   :  { %v6465_v4 = vadd.f32 %v6464_v52, %v6415_v42  ;;  %v6513_v56 = vpop.f32.mrf.mxu1  ;;  %v8776_v52 = vor.u32 %v9455_v17, %v8775_v37 }
 0x6c9   :  { %v11215_v5 = vadd.f32 %v6513_v56, %v6465_v4  ;;  %v6466_v3 = vpop.f32.mrf.mxu0  ;;  %v9456_v4 = vld [vmem:[#allocation6 + $0x1b8] sm:$0xf0]  ;;  %v6547_v2 = vpop.f32.mrf.mxu2 }
 0x6ca   :  { %6708 = vmatmul.bf16.gmra.mxu1 %v8700_v32  ;;  %v8783_v32 = vld [vmem:[#allocation6 + $0x1a0] sm:$0xf] }
 0x6ce   :  { %v6417_v11 = vpop.f32.mrf.mxu3 }
 0x6cf   :  { %v6467_v13 = vadd.f32 %v6466_v3, %v6417_v11  ;;  %v6515_v62 = vpop.f32.mrf.mxu1  ;;  %v8784_v3 = vor.u32 %v9456_v4, %v8783_v32 }
 0x6d1   :  { %v11217_v24 = vadd.f32 %v6515_v62, %v6467_v13  ;;  %v6469_v22 = vpop.f32.mrf.mxu0  ;;  %v6549_v60 = vpop.f32.mrf.mxu2 }
 0x6d3   :  { %6615 = vmatmul.bf16.gmra.mxu3 %v8720_v63 }
 0x6d4   :  { %6664 = vmatmul.bf16.gmra.mxu0 %v8724_v23 }
 0x6d6   :  { %v6420_v10 = vpop.f32.mrf.mxu3 }
 0x6d7   :  { %v6470_v50 = vadd.f32 %v6469_v22, %v6420_v10  ;;  %v6518_v34 = vpop.f32.mrf.mxu1  ;;  %v6543_v10 = vadd.f32 %v6542_v27, %v11199_v45  ;;  %v5571_v27 = vld [vmem:[#allocation9 + $0x108] sm:$0xff] }
 0x6d9   :  { %v11219_v14 = vadd.f32 %v6518_v34, %v6470_v50  ;;  %v6471_v18 = vpop.f32.mrf.mxu0 }
 0x6da   :  { %6713 = vmatmul.bf16.gmra.mxu1 %v8728_v9 }
 0x6de   :  { %v6422_v33 = vpop.f32.mrf.mxu3 }
 0x6df   :  { %v6472_v51 = vadd.f32 %v6471_v18, %v6422_v33  ;;  %v6520_v12 = vpop.f32.mrf.mxu1  ;;  %v11232_v18 = vand.u32 127, %v6745_v6  ;;  %v6552_v33 = vpop.f32.mrf.mxu2  ;;  %v5574_v6 = vld [vmem:[#allocation9 + $0x120] sm:$0xff] }
 0x6e1   :  { %v11221_v40 = vadd.f32 %v6520_v12, %v6472_v51  ;;  %v6474_v49 = vpop.f32.mrf.mxu0  ;;  %vm6747_vm0 = vcmp.lt.s32.totalorder %v11232_v18, 8  ;;  %v6545_v51 = vadd.f32 %v6544_v46, %v11201_v58  ;;  %v5572_v46 = vld [vmem:[#allocation9 + $0x110] sm:$0xff] }
 0x6e3   :  { %6620 = vmatmul.bf16.gmra.mxu3 %v8748_v15 }
 0x6e4   :  { %6669 = vmatmul.bf16.gmra.mxu0 %v8752_v26 }
 0x6e6   :  { %v6425_v21 = vpop.f32.mrf.mxu3 }
 0x6e7   :  { %v6475_v43 = vadd.f32 %v6474_v49, %v6425_v21  ;;  %v6523_v7 = vpop.f32.mrf.mxu1  ;;  %v6554_v58 = vpop.f32.mrf.mxu2 }
 0x6e9   :  { %v11223_v38 = vadd.f32 %v6523_v7, %v6475_v43  ;;  %v6476_v1 = vpop.f32.mrf.mxu0 }
 0x6ea   :  { %6718 = vmatmul.bf16.gmra.mxu1 %v8756_v48  ;;  %v6548_v48 = vadd.f32 %v6547_v2, %v11203_v20 }
 0x6ee   :  { %v6427_v36 = vpop.f32.mrf.mxu3 }
 0x6ef   :  { %v6477_v57 = vadd.f32 %v6476_v1, %v6427_v36  ;;  %v6525_v28 = vpop.f32.mrf.mxu1  ;;  %v6557_v32 = vpop.f32.mrf.mxu2 }
 0x6f1   :  { %v11225_v41 = vadd.f32 %v6525_v28, %v6477_v57  ;;  %v6479_v42 = vpop.f32.mrf.mxu0  ;;  %v6550_v57 = vadd.f32 %v6549_v60, %v11205_v25 }
 0x6f3   :  { %6625 = vmatmul.bf16.gmra.mxu3 %v8776_v52 }
 0x6f4   :  { %6674 = vmatmul.bf16.gmra.mxu0 %v8780_v53 }
 0x6f6   :  { %v6430_v56 = vpop.f32.mrf.mxu3 }
 0x6f7   :  { %v6480_v8 = vadd.f32 %v6479_v42, %v6430_v56  ;;  %v6528_v29 = vpop.f32.mrf.mxu1  ;;  %v6559_v60 = vpop.f32.mrf.mxu2 }
 0x6f9   :  { %v11227_v31 = vadd.f32 %v6528_v29, %v6480_v8  ;;  %v6481_v11 = vpop.f32.mrf.mxu0  ;;  %v6553_v29 = vadd.f32 %v6552_v33, %v11207_v47  ;;  %v5575_v33 = vld [vmem:[#allocation9 + $0x128] sm:$0xff] }
 0x6fa   :  { %6723 = vmatmul.bf16.gmra.mxu1 %v8784_v3  ;;  %v5573_v3 = vld [vmem:[#allocation9 + $0x118] sm:$0xff] }
 0x6fe   :  { %v6432_v13 = vpop.f32.mrf.mxu3 }
 0x6ff   :  { %v6482_v62 = vadd.f32 %v6481_v11, %v6432_v13  ;;  %v6530_v63 = vpop.f32.mrf.mxu1 }
 0x701   :  { %v11229_v23 = vadd.f32 %v6530_v63, %v6482_v62  ;;  %v6640_v22 = vpop.f32.mrf.mxu0 }
 0x706   :  { %v6591_v9 = vpop.f32.mrf.mxu3 }
 0x707   :  { %v6592_v50 = vadd.f32 %v6591_v9, %v6543_v10  ;;  %v6689_v34 = vpop.f32.mrf.mxu1  ;;  %v6555_v9 = vadd.f32 %v6554_v58, %v11209_v19  ;;  %v5576_v58 = vld [vmem:[#allocation9 + $0x130] sm:$0xff] }
 0x709   :  { %v6641_v16 = vadd.f32 %v6640_v22, %v6592_v50  ;;  %v6642_v30 = vpop.f32.mrf.mxu0 }
 0x70b   :  { %v6690_v39 = vadd.f32 %v6689_v34, %v6641_v16 }
 0x70d   :  { %v11236_v12 = vadd.f32 %v6690_v39, %v5570_v55 }
 0x70e   :  { %v6593_v15 = vpop.f32.mrf.mxu3 }
 0x70f   :  { %v6594_v26 = vadd.f32 %v6593_v15, %v6545_v51  ;;  %v11241_v45 = vsel %vm6747_vm0, %v11236_v12, -inf  ;;  %v6691_v49 = vpop.f32.mrf.mxu1  ;;  %v6562_v15 = vpop.f32.mrf.mxu2 }
 0x710   :  { %6764 = vmax.xlane.f32.xlu0 %v11241_v45 }
 0x711   :  { %v6643_v0 = vadd.f32 %v6642_v30, %v6594_v26  ;;  %v6645_v59 = vpop.f32.mrf.mxu0  ;;  %v6558_v26 = vadd.f32 %v6557_v32, %v11211_v35  ;;  %v6563_v32 = vadd.f32 %v6562_v15, %v11215_v5 }
 0x713   :  { %v6692_v21 = vadd.f32 %v6691_v49, %v6643_v0 }
 0x715   :  { %v11245_v43 = vadd.f32 %v6692_v21, %v5571_v27 }
 0x716   :  { %v6596_v7 = vpop.f32.mrf.mxu3 }
 0x717   :  { %v6597_v1 = vadd.f32 %v6596_v7, %v6548_v48  ;;  %v11250_v37 = vsel %vm6747_vm0, %v11245_v43, -inf  ;;  %v6694_v17 = vpop.f32.mrf.mxu1  ;;  %v6564_v35 = vpop.f32.mrf.mxu2 }
 0x718   :  { %6766 = vmax.xlane.f32.xlu0 %v11250_v37 }
 0x719   :  { %v6646_v44 = vadd.f32 %v6645_v59, %v6597_v1  ;;  %v6647_v54 = vpop.f32.mrf.mxu0  ;;  %v6560_v1 = vadd.f32 %v6559_v60, %v11213_v61 }
 0x71b   :  { %v6695_v36 = vadd.f32 %v6694_v17, %v6646_v44 }
 0x71d   :  { %v11254_v20 = vadd.f32 %v6695_v36, %v5572_v46 }
 0x71e   :  { %v6598_v28 = vpop.f32.mrf.mxu3 }
 0x71f   :  { %v6599_v52 = vadd.f32 %v6598_v28, %v6550_v57  ;;  %v11259_v53 = vsel %vm6747_vm0, %v11254_v20, -inf  ;;  %v6696_v42 = vpop.f32.mrf.mxu1 }
 0x720   :  { %6768 = vmax.xlane.f32.xlu1 %v11259_v53 }
 0x721   :  { %v6648_v4 = vadd.f32 %v6647_v54, %v6599_v52  ;;  %v6650_v56 = vpop.f32.mrf.mxu0  ;;  %v5577_v52 = vld [vmem:[#allocation9 + $0x138] sm:$0xff] }
 0x723   :  { %v6697_v8 = vadd.f32 %v6696_v42, %v6648_v4 }
 0x725   :  { %v11263_v25 = vadd.f32 %v6697_v8, %v5573_v3 }
 0x726   :  { %v6601_v2 = vpop.f32.mrf.mxu3 }
 0x727   :  { %v6602_v11 = vadd.f32 %v6601_v2, %v6553_v29  ;;  %v11268_v13 = vsel %vm6747_vm0, %v11263_v25, -inf  ;;  %v6699_v62 = vpop.f32.mrf.mxu1  ;;  %v6567_v29 = vpop.f32.mrf.mxu2 }
 0x728   :  { %6770 = vmax.xlane.f32.xlu1 %v11268_v13 }
 0x729   :  { %v6651_v63 = vadd.f32 %v6650_v56, %v6602_v11  ;;  %v6652_v22 = vpop.f32.mrf.mxu0 }
 0x72b   :  { %v6700_v10 = vadd.f32 %v6699_v62, %v6651_v63  ;;  %v5578_v62 = vld [vmem:[#allocation9 + $0x140] sm:$0xff] }
 0x72d   :  { %v11272_v47 = vadd.f32 %v6700_v10, %v5574_v6 }
 0x72e   :  { %v6603_v50 = vpop.f32.mrf.mxu3 }
 0x72f   :  { %v6604_v34 = vadd.f32 %v6603_v50, %v6555_v9  ;;  %v11277_v16 = vsel %vm6747_vm0, %v11272_v47, -inf  ;;  %v6701_v30 = vpop.f32.mrf.mxu1 }
 0x730   :  { %6772 = vmax.xlane.f32.xlu2 %v11277_v16 }
 0x731   :  { %v6653_v55 = vadd.f32 %v6652_v22, %v6604_v34  ;;  %v6655_v39 = vpop.f32.mrf.mxu0  ;;  %v6565_v22 = vadd.f32 %v6564_v35, %v11217_v24 }
 0x733   :  { %v6702_v51 = vadd.f32 %v6701_v30, %v6653_v55  ;;  %v6569_v30 = vpop.f32.mrf.mxu2  ;;  %v5579_v55 = vld [vmem:[#allocation9 + $0x148] sm:$0xff] }
 0x735   :  { %v11281_v19 = vadd.f32 %v6702_v51, %v5575_v33  ;;  %v6568_v33 = vadd.f32 %v6567_v29, %v11219_v14 }
 0x736   :  { %v6606_v49 = vpop.f32.mrf.mxu3 }
 0x737   :  { %v6607_v0 = vadd.f32 %v6606_v49, %v6558_v26  ;;  %v11286_v59 = vsel %vm6747_vm0, %v11281_v19, -inf  ;;  %v6704_v27 = vpop.f32.mrf.mxu1 }
 0x738   :  { %6774 = vmax.xlane.f32.xlu2 %v11286_v59 }
 0x739   :  { %v6656_v21 = vadd.f32 %v6655_v39, %v6607_v0  ;;  %v6657_v48 = vpop.f32.mrf.mxu0 }
 0x73b   :  { %v6705_v7 = vadd.f32 %v6704_v27, %v6656_v21  ;;  %v5580_v21 = vld [vmem:[#allocation9 + $0x150] sm:$0xff] }
 0x73d   :  { %v11290_v17 = vadd.f32 %v6705_v7, %v5576_v58  ;;  %v6572_v58 = vpop.f32.mrf.mxu2  ;;  %v6570_v7 = vadd.f32 %v6569_v30, %v11221_v40 }
 0x73e   :  { %v6608_v44 = vpop.f32.mrf.mxu3 }
 0x73f   :  { %v6609_v54 = vadd.f32 %v6608_v44, %v6560_v1  ;;  %v11295_v46 = vsel %vm6747_vm0, %v11290_v17, -inf  ;;  %v6706_v36 = vpop.f32.mrf.mxu1 }
 0x740   :  { %6776 = vmax.xlane.f32.xlu0 %v11295_v46 }
 0x741   :  { %v6658_v57 = vadd.f32 %v6657_v48, %v6609_v54  ;;  %v6660_v28 = vpop.f32.mrf.mxu0 }
 0x743   :  { %v6707_v42 = vadd.f32 %v6706_v36, %v6658_v57 }
 0x745   :  { %v11299_v61 = vadd.f32 %v6707_v42, %v5577_v52  ;;  %v6573_v42 = vadd.f32 %v6572_v58, %v11223_v38  ;;  %v6574_v40 = vpop.f32.mrf.mxu2  ;;  %v5584_v58 = vld [vmem:[#allocation9 + $0x170] sm:$0xff] }
 0x746   :  { %v6611_v4 = vpop.f32.mrf.mxu3 }
 0x747   :  { %v6612_v56 = vadd.f32 %v6611_v4, %v6563_v32  ;;  %v11304_v3 = vsel %vm6747_vm0, %v11299_v61, -inf  ;;  %v6709_v8 = vpop.f32.mrf.mxu1 }
 0x748   :  { %6778 = vmax.xlane.f32.xlu1 %v11304_v3 }
 0x749   :  { %v6661_v2 = vadd.f32 %v6660_v28, %v6612_v56  ;;  %v6662_v11 = vpop.f32.mrf.mxu0  ;;  %v5581_v28 = vld [vmem:[#allocation9 + $0x158] sm:$0xff] }
 0x74b   :  { %v6710_v63 = vadd.f32 %v6709_v8, %v6661_v2 }
 0x74d   :  { %v11308_v5 = vadd.f32 %v6710_v63, %v5578_v62 }
 0x74e   :  { %v6613_v60 = vpop.f32.mrf.mxu3 }
 0x74f   :  { %v6614_v6 = vadd.f32 %v6613_v60, %v6565_v22  ;;  %v11313_v10 = vsel %vm6747_vm0, %v11308_v5, -inf  ;;  %v6711_v9 = vpop.f32.mrf.mxu1  ;;  %v6575_v22 = vadd.f32 %v6574_v40, %v11225_v41 }
 0x750   :  { %6780 = vmax.xlane.f32.xlu2 %v11313_v10 }
 0x751   :  { %v6663_v50 = vadd.f32 %v6662_v11, %v6614_v6  ;;  %v6665_v34 = vpop.f32.mrf.mxu0  ;;  %v5582_v11 = vld [vmem:[#allocation9 + $0x160] sm:$0xff] }
 0x753   :  { %v6712_v39 = vadd.f32 %v6711_v9, %v6663_v50 }
 0x755   :  { %v11317_v24 = vadd.f32 %v6712_v39, %v5579_v55  ;;  %v5583_v55 = vld [vmem:[#allocation9 + $0x168] sm:$0xff] }
 0x756   :  { %v6616_v51 = vpop.f32.mrf.mxu3 }
 0x757   :  { %v6617_v15 = vadd.f32 %v6616_v51, %v6568_v33  ;;  %v11322_v26 = vsel %vm6747_vm0, %v11317_v24, -inf  ;;  %v6714_v49 = vpop.f32.mrf.mxu1 }
 0x758   :  { %6782 = vmax.xlane.f32.xlu0 %v11322_v26 }
 0x759   :  { %v6666_v0 = vadd.f32 %v6665_v34, %v6617_v15  ;;  %v6667_v27 = vpop.f32.mrf.mxu0  ;;  %v6577_v34 = vpop.f32.mrf.mxu2 }
 0x75a   :  { %v6578_v33 = vadd.f32 %v6577_v34, %v11227_v31 }
 0x75b   :  { %v6715_v48 = vadd.f32 %v6714_v49, %v6666_v0 }
 0x75d   :  { %v11326_v14 = vadd.f32 %v6715_v48, %v5580_v21 }
 0x75e   :  { %v6618_v1 = vpop.f32.mrf.mxu3 }
 0x75f   :  { %v6619_v35 = vadd.f32 %v6618_v1, %v6570_v7  ;;  %v11331_v44 = vsel %vm6747_vm0, %v11326_v14, -inf  ;;  %v6716_v54 = vpop.f32.mrf.mxu1 }
 0x760   :  { %6784 = vmax.xlane.f32.xlu1 %v11331_v44 }
 0x761   :  { %v6668_v36 = vadd.f32 %v6667_v27, %v6619_v35  ;;  %v6670_v57 = vpop.f32.mrf.mxu0  ;;  %v6579_v48 = vpop.f32.mrf.mxu2 }
 0x762   :  { %v6580_v1 = vadd.f32 %v6579_v48, %v11229_v23 }
 0x763   :  { %v6717_v52 = vadd.f32 %v6716_v54, %v6668_v36 }
 0x765   :  { %v11335_v32 = vadd.f32 %v6717_v52, %v5581_v28 }
 0x766   :  { %v6621_v4 = vpop.f32.mrf.mxu3 }
 0x767   :  { %v6622_v56 = vadd.f32 %v6621_v4, %v6573_v42  ;;  %v11340_v8 = vsel %vm6747_vm0, %v11335_v32, -inf  ;;  %v6719_v29 = vpop.f32.mrf.mxu1  ;;  %v5585_v42 = vld [vmem:[#allocation9 + $0x178] sm:$0xff] }
 0x768   :  { %6786 = vmax.xlane.f32.xlu2 %v11340_v8 }
 0x769   :  { %v6671_v2 = vadd.f32 %v6670_v57, %v6622_v56  ;;  %v6672_v63 = vpop.f32.mrf.mxu0 }
 0x76b   :  { %v6720_v62 = vadd.f32 %v6719_v29, %v6671_v2 }
 0x76d   :  { %v11344_v38 = vadd.f32 %v6720_v62, %v5582_v11 }
 0x76e   :  { %v6623_v60 = vpop.f32.mrf.mxu3 }
 0x76f   :  { %v6624_v6 = vadd.f32 %v6623_v60, %v6575_v22  ;;  %v11349_v9 = vsel %vm6747_vm0, %v11344_v38, -inf  ;;  %v6721_v50 = vpop.f32.mrf.mxu1 }
 0x770   :  { %6788 = vmax.xlane.f32.xlu0 %v11349_v9 }
 0x771   :  { %v6673_v30 = vadd.f32 %v6672_v63, %v6624_v6  ;;  %v6675_v15 = vpop.f32.mrf.mxu0 }
 0x773   :  { %v6722_v39 = vadd.f32 %v6721_v50, %v6673_v30 }
 0x775   :  { %v11353_v51 = vadd.f32 %v6722_v39, %v5583_v55 }
 0x776   :  { %v6626_v41 = vpop.f32.mrf.mxu3 }
 0x777   :  { %v6627_v49 = vadd.f32 %v6626_v41, %v6578_v33  ;;  %v11358_v0 = vsel %vm6747_vm0, %v11353_v51, -inf  ;;  %v6724_v27 = vpop.f32.mrf.mxu1 }
 0x778   :  { %6790 = vmax.xlane.f32.xlu1 %v11358_v0 }
 0x779   :  { %v6676_v21 = vadd.f32 %v6675_v15, %v6627_v49  ;;  %v6677_v57 = vpop.f32.mrf.mxu0 }
 0x77b   :  { %v6725_v7 = vadd.f32 %v6724_v27, %v6676_v21 }
 0x77d   :  { %v11362_v31 = vadd.f32 %v6725_v7, %v5584_v58 }
 0x77e   :  { %v6628_v35 = vpop.f32.mrf.mxu3 }
 0x77f   :  { %v6629_v54 = vadd.f32 %v6628_v35, %v6580_v1  ;;  %v11367_v36 = vsel %vm6747_vm0, %v11362_v31, -inf  ;;  %v6726_v52 = vpop.f32.mrf.mxu1 }
 0x780   :  { %6792 = vmax.xlane.f32.xlu2 %v11367_v36 }
 0x781   :  { %v6678_v28 = vadd.f32 %v6677_v57, %v6629_v54 }
 0x783   :  { %v6727_v40 = vadd.f32 %v6726_v52, %v6678_v28  ;;  %v11370_v4 = vpop.xlane.xlu0 %6764 }
 0x784   :  { %v6796_v23 = vsub.f32 %v11241_v45, %v11370_v4 }
 0x785   :  { %v11374_v56 = vadd.f32 %v6727_v40, %v5585_v42 }
 0x786   :  { %v6812_v29 = vmul.f32 1.442695, %v6796_v23 }
 0x787   :  { %v11379_v2 = vsel %vm6747_vm0, %v11374_v56, -inf }
 0x788   :  { %10545 = vpow2.f32 %v6812_v29  ;;  %6794 = vmax.xlane.f32.xlu0 %v11379_v2 }
 0x78b   :  { %v11382_v11 = vpop.xlane.xlu0 %6766 }
 0x78c   :  { %v6797_v62 = vsub.f32 %v11250_v37, %v11382_v11 }
 0x78e   :  { %v10546_v63 = vpop.eup %10545  ;;  %v6814_v22 = vmul.f32 1.442695, %v6797_v62 }
 0x78f   :  { %6844 = vadd.xlane.f32.xlu1 %v10546_v63 }
 0x790   :  { %10547 = vpow2.f32 %v6814_v22 }
 0x793   :  { %v11386_v45 = vpop.xlane.xlu1 %6768 }
 0x794   :  { %v6798_v60 = vsub.f32 %v11259_v53, %v11386_v45 }
 0x796   :  { %v10548_v6 = vpop.eup %10547  ;;  %v6816_v50 = vmul.f32 1.442695, %v6798_v60 }
 0x797   :  { %6846 = vadd.xlane.f32.xlu2 %v10548_v6 }
 0x798   :  { %10549 = vpow2.f32 %v6816_v50 }
 0x79b   :  { %v11390_v34 = vpop.xlane.xlu1 %6770 }
 0x79c   :  { %v6799_v30 = vsub.f32 %v11268_v13, %v11390_v34 }
 0x79e   :  { %v10550_v55 = vpop.eup %10549  ;;  %v6818_v37 = vmul.f32 1.442695, %v6799_v30 }
 0x79f   :  { %6848 = vadd.xlane.f32.xlu0 %v10550_v55 }
 0x7a0   :  { %10551 = vpow2.f32 %v6818_v37 }
 0x7a3   :  { %v11394_v39 = vpop.xlane.xlu2 %6772 }
 0x7a4   :  { %v6800_v33 = vsub.f32 %v11277_v16, %v11394_v39 }
 0x7a6   :  { %v10552_v41 = vpop.eup %10551  ;;  %v6820_v53 = vmul.f32 1.442695, %v6800_v33 }
 0x7a7   :  { %6850 = vadd.xlane.f32.xlu1 %v10552_v41 }
 0x7a8   :  { %10553 = vpow2.f32 %v6820_v53 }
 0x7ab   :  { %v11398_v15 = vpop.xlane.xlu2 %6774 }
 0x7ac   :  { %v6801_v49 = vsub.f32 %v11286_v59, %v11398_v15 }
 0x7ae   :  { %v10554_v27 = vpop.eup %10553  ;;  %v6822_v13 = vmul.f32 1.442695, %v6801_v49 }
 0x7af   :  { %6852 = vadd.xlane.f32.xlu2 %v10554_v27 }
 0x7b0   :  { %10555 = vpow2.f32 %v6822_v13 }
 0x7b3   :  { %v11402_v21 = vpop.xlane.xlu0 %6776 }
 0x7b4   :  { %v6802_v48 = vsub.f32 %v11295_v46, %v11402_v21 }
 0x7b6   :  { %v10556_v58 = vpop.eup %10555  ;;  %v6824_v16 = vmul.f32 1.442695, %v6802_v48 }
 0x7b7   :  { %6854 = vadd.xlane.f32.xlu0 %v10556_v58 }
 0x7b8   :  { %10557 = vpow2.f32 %v6824_v16 }
 0x7bb   :  { %v11406_v7 = vpop.xlane.xlu1 %6778 }
 0x7bc   :  { %v6803_v1 = vsub.f32 %v11304_v3, %v11406_v7 }
 0x7be   :  { %v10558_v35 = vpop.eup %10557  ;;  %v6826_v59 = vmul.f32 1.442695, %v6803_v1 }
 0x7bf   :  { %6856 = vadd.xlane.f32.xlu1 %v10558_v35 }
 0x7c0   :  { %10559 = vpow2.f32 %v6826_v59 }
 0x7c3   :  { %v11410_v54 = vpop.xlane.xlu2 %6780 }
 0x7c4   :  { %v6804_v57 = vsub.f32 %v11313_v10, %v11410_v54 }
 0x7c6   :  { %v10560_v28 = vpop.eup %10559  ;;  %v6828_v46 = vmul.f32 1.442695, %v6804_v57 }
 0x7c7   :  { %6858 = vadd.xlane.f32.xlu2 %v10560_v28 }
 0x7c8   :  { %10561 = vpow2.f32 %v6828_v46  ;;  %v6909_v46 = vsub.f32 %v11245_v43, %v11382_v11  ;;  %v6911_v11 = vsub.f32 %v11263_v25, %v11390_v34  ;;  %v6913_v34 = vsub.f32 %v11281_v19, %v11398_v15 }
 0x7c9   :  { %v6915_v15 = vsub.f32 %v11299_v61, %v11406_v7 }
 0x7cb   :  { %v11414_v52 = vpop.xlane.xlu0 %6782 }
 0x7cc   :  { %v6805_v42 = vsub.f32 %v11322_v26, %v11414_v52  ;;  %v6917_v7 = vsub.f32 %v11317_v24, %v11414_v52 }
 0x7ce   :  { %v10562_v40 = vpop.eup %10561  ;;  %v6830_v3 = vmul.f32 1.442695, %v6805_v42 }
 0x7cf   :  { %6860 = vadd.xlane.f32.xlu0 %v10562_v40 }
 0x7d0   :  { %10563 = vpow2.f32 %v6830_v3 }
 0x7d3   :  { %v11418_v23 = vpop.xlane.xlu1 %6784 }
 0x7d4   :  { %v6806_v29 = vsub.f32 %v11331_v44, %v11418_v23 }
 0x7d6   :  { %v10564_v62 = vpop.eup %10563  ;;  %v6832_v10 = vmul.f32 1.442695, %v6806_v29 }
 0x7d7   :  { %6862 = vadd.xlane.f32.xlu1 %v10564_v62 }
 0x7d8   :  { %10565 = vpow2.f32 %v6832_v10 }
 0x7db   :  { %v11422_v63 = vpop.xlane.xlu2 %6786 }
 0x7dc   :  { %v6807_v22 = vsub.f32 %v11340_v8, %v11422_v63  ;;  %v6919_v52 = vsub.f32 %v11335_v32, %v11422_v63 }
 0x7de   :  { %v10566_v60 = vpop.eup %10565  ;;  %v6834_v26 = vmul.f32 1.442695, %v6807_v22 }
 0x7df   :  { %6864 = vadd.xlane.f32.xlu2 %v10566_v60 }
 0x7e0   :  { %10567 = vpow2.f32 %v6834_v26 }
 0x7e3   :  { %v11426_v6 = vpop.xlane.xlu0 %6788 }
 0x7e4   :  { %v6808_v50 = vsub.f32 %v11349_v9, %v11426_v6 }
 0x7e6   :  { %v10568_v30 = vpop.eup %10567  ;;  %v6836_v44 = vmul.f32 1.442695, %v6808_v50 }
 0x7e7   :  { %6866 = vadd.xlane.f32.xlu0 %v10568_v30 }
 0x7e8   :  { %10569 = vpow2.f32 %v6836_v44 }
 0x7eb   :  { %v11430_v55 = vpop.xlane.xlu1 %6790 }
 0x7ec   :  { %v6809_v37 = vsub.f32 %v11358_v0, %v11430_v55  ;;  %v6921_v63 = vsub.f32 %v11353_v51, %v11430_v55 }
 0x7ee   :  { %v10570_v33 = vpop.eup %10569  ;;  %v6838_v8 = vmul.f32 1.442695, %v6809_v37 }
 0x7ef   :  { %6868 = vadd.xlane.f32.xlu1 %v10570_v33 }
 0x7f0   :  { %10571 = vpow2.f32 %v6838_v8 }
 0x7f3   :  { %v11434_v41 = vpop.xlane.xlu2 %6792 }
 0x7f4   :  { %v6810_v53 = vsub.f32 %v11367_v36, %v11434_v41  ;;  %v6908_v36 = vsub.f32 %v11236_v12, %v11370_v4  ;;  %v6910_v4 = vsub.f32 %v11254_v20, %v11386_v45  ;;  %v6912_v45 = vsub.f32 %v11272_v47, %v11394_v39 }
 0x7f5   :  { %v6914_v39 = vsub.f32 %v11290_v17, %v11402_v21  ;;  %v6916_v21 = vsub.f32 %v11308_v5, %v11410_v54  ;;  %v6918_v54 = vsub.f32 %v11326_v14, %v11418_v23  ;;  %v6920_v23 = vsub.f32 %v11344_v38, %v11426_v6 }
 0x7f6   :  { %v10572_v49 = vpop.eup %10571  ;;  %v6840_v9 = vmul.f32 1.442695, %v6810_v53  ;;  %v6922_v6 = vsub.f32 %v11362_v31, %v11434_v41 }
 0x7f7   :  { %6870 = vadd.xlane.f32.xlu2 %v10572_v49 }
 0x7f8   :  { %10573 = vpow2.f32 %v6840_v9 }
 0x7fb   :  { %v11438_v27 = vpop.xlane.xlu0 %6794 }
 0x7fc   :  { %v6811_v13 = vsub.f32 %v11379_v2, %v11438_v27  ;;  %v6923_v55 = vsub.f32 %v11374_v56, %v11438_v27 }
 0x7fe   :  { %v10574_v48 = vpop.eup %10573  ;;  %v6842_v0 = vmul.f32 1.442695, %v6811_v13 }
 0x7ff   :  { %6872 = vadd.xlane.f32.xlu0 %v10574_v48 }
 0x800   :  { %10575 = vpow2.f32 %v6842_v0 }
 0x802   :  { %v6845_v58 = vpop.xlane.xlu1 %6844 }
 0x803   :  { %10577 = vlog2.f32 %v6845_v58 }
 0x806   :  { %v10576_v16 = vpop.eup %10575 }
 0x807   :  { %6874 = vadd.xlane.f32.xlu1 %v10576_v16 }
 0x809   :  { %v10578_v1 = vpop.eup %10577 }
 0x80a   :  { %v6877_v35 = vmul.f32 0.6931472, %v10578_v1  ;;  %v6847_v59 = vpop.xlane.xlu2 %6846 }
 0x80b   :  { %10579 = vlog2.f32 %v6847_v59 }
 0x80c   :  { %v6924_v57 = vsub.f32 %v6908_v36, %v6877_v35 }
 0x80e   :  { %v6940_v28 = vsel %vm6747_vm0, %v6924_v57, 0.0 }
 0x80f   :  { %6956 = vst [vmem:[#allocation11] sm:$0xff] %v6940_v28 }
 0x811   :  { %v10580_v2 = vpop.eup %10579 }
 0x812   :  { %v6879_v42 = vmul.f32 0.6931472, %v10580_v2  ;;  %v6849_v40 = vpop.xlane.xlu0 %6848 }
 0x813   :  { %10581 = vlog2.f32 %v6849_v40 }
 0x814   :  { %v6925_v3 = vsub.f32 %v6909_v46, %v6879_v42 }
 0x816   :  { %v6941_v29 = vsel %vm6747_vm0, %v6925_v3, 0.0 }
 0x817   :  { %6957 = vst [vmem:[#allocation11 + $0x8] sm:$0xff] %v6941_v29 }
 0x819   :  { %v10582_v12 = vpop.eup %10581 }
 0x81a   :  { %v6881_v62 = vmul.f32 0.6931472, %v10582_v12  ;;  %v6851_v10 = vpop.xlane.xlu1 %6850 }
 0x81b   :  { %10583 = vlog2.f32 %v6851_v10 }
 0x81c   :  { %v6926_v22 = vsub.f32 %v6910_v4, %v6881_v62 }
 0x81e   :  { %v6942_v60 = vsel %vm6747_vm0, %v6926_v22, 0.0 }
 0x81f   :  { %6958 = vst [vmem:[#allocation11 + $0x10] sm:$0xff] %v6942_v60 }
 0x821   :  { %v10584_v43 = vpop.eup %10583 }
 0x822   :  { %v6883_v26 = vmul.f32 0.6931472, %v10584_v43  ;;  %v6853_v50 = vpop.xlane.xlu2 %6852 }
 0x823   :  { %10585 = vlog2.f32 %v6853_v50 }
 0x824   :  { %v6927_v30 = vsub.f32 %v6911_v11, %v6883_v26 }
 0x826   :  { %v6943_v44 = vsel %vm6747_vm0, %v6927_v30, 0.0 }
 0x827   :  { %6959 = vst [vmem:[#allocation11 + $0x18] sm:$0xff] %v6943_v44 }
 0x829   :  { %v10586_v20 = vpop.eup %10585 }
 0x82a   :  { %v6885_v37 = vmul.f32 0.6931472, %v10586_v20  ;;  %v6855_v33 = vpop.xlane.xlu0 %6854 }
 0x82b   :  { %10587 = vlog2.f32 %v6855_v33 }
 0x82c   :  { %v6928_v8 = vsub.f32 %v6912_v45, %v6885_v37 }
 0x82e   :  { %v6944_v53 = vsel %vm6747_vm0, %v6928_v8, 0.0 }
 0x82f   :  { %6960 = vst [vmem:[#allocation11 + $0x20] sm:$0xff] %v6944_v53 }
 0x831   :  { %v10588_v25 = vpop.eup %10587 }
 0x832   :  { %v6887_v49 = vmul.f32 0.6931472, %v10588_v25  ;;  %v6857_v9 = vpop.xlane.xlu1 %6856 }
 0x833   :  { %10589 = vlog2.f32 %v6857_v9 }
 0x834   :  { %v6929_v13 = vsub.f32 %v6913_v34, %v6887_v49 }
 0x836   :  { %v6945_v48 = vsel %vm6747_vm0, %v6929_v13, 0.0 }
 0x837   :  { %6961 = vst [vmem:[#allocation11 + $0x28] sm:$0xff] %v6945_v48 }
 0x839   :  { %v10590_v47 = vpop.eup %10589 }
 0x83a   :  { %v6889_v0 = vmul.f32 0.6931472, %v10590_v47  ;;  %v6859_v58 = vpop.xlane.xlu2 %6858 }
 0x83b   :  { %10591 = vlog2.f32 %v6859_v58 }
 0x83c   :  { %v6930_v16 = vsub.f32 %v6914_v39, %v6889_v0 }
 0x83e   :  { %v6946_v1 = vsel %vm6747_vm0, %v6930_v16, 0.0 }
 0x83f   :  { %6962 = vst [vmem:[#allocation11 + $0x30] sm:$0xff] %v6946_v1 }
 0x841   :  { %v10592_v19 = vpop.eup %10591 }
 0x842   :  { %v6891_v36 = vmul.f32 0.6931472, %v10592_v19  ;;  %v6861_v35 = vpop.xlane.xlu0 %6860 }
 0x843   :  { %10593 = vlog2.f32 %v6861_v35 }
 0x844   :  { %v6931_v59 = vsub.f32 %v6915_v15, %v6891_v36 }
 0x846   :  { %v6947_v57 = vsel %vm6747_vm0, %v6931_v59, 0.0 }
 0x847   :  { %6963 = vst [vmem:[#allocation11 + $0x38] sm:$0xff] %v6947_v57 }
 0x849   :  { %v10594_v17 = vpop.eup %10593 }
 0x84a   :  { %v6893_v28 = vmul.f32 0.6931472, %v10594_v17  ;;  %v6863_v2 = vpop.xlane.xlu1 %6862 }
 0x84b   :  { %10595 = vlog2.f32 %v6863_v2 }
 0x84c   :  { %v6932_v46 = vsub.f32 %v6916_v21, %v6893_v28 }
 0x84e   :  { %v6948_v42 = vsel %vm6747_vm0, %v6932_v46, 0.0 }
 0x84f   :  { %6964 = vst [vmem:[#allocation11 + $0x40] sm:$0xff] %v6948_v42 }
 0x851   :  { %v10596_v61 = vpop.eup %10595 }
 0x852   :  { %v6895_v40 = vmul.f32 0.6931472, %v10596_v61  ;;  %v6865_v3 = vpop.xlane.xlu2 %6864 }
 0x853   :  { %10597 = vlog2.f32 %v6865_v3 }
 0x854   :  { %v6933_v29 = vsub.f32 %v6917_v7, %v6895_v40 }
 0x856   :  { %v6949_v12 = vsel %vm6747_vm0, %v6933_v29, 0.0 }
 0x857   :  { %6965 = vst [vmem:[#allocation11 + $0x48] sm:$0xff] %v6949_v12 }
 0x859   :  { %v10598_v5 = vpop.eup %10597 }
 0x85a   :  { %v6897_v4 = vmul.f32 0.6931472, %v10598_v5  ;;  %v6867_v62 = vpop.xlane.xlu0 %6866 }
 0x85b   :  { %10599 = vlog2.f32 %v6867_v62 }
 0x85c   :  { %v6934_v10 = vsub.f32 %v6918_v54, %v6897_v4 }
 0x85e   :  { %v6950_v22 = vsel %vm6747_vm0, %v6934_v10, 0.0 }
 0x85f   :  { %6966 = vst [vmem:[#allocation11 + $0x50] sm:$0xff] %v6950_v22 }
 0x861   :  { %v10600_v24 = vpop.eup %10599 }
 0x862   :  { %v6899_v60 = vmul.f32 0.6931472, %v10600_v24  ;;  %v6869_v43 = vpop.xlane.xlu1 %6868 }
 0x863   :  { %10601 = vlog2.f32 %v6869_v43 }
 0x864   :  { %v6935_v11 = vsub.f32 %v6919_v52, %v6899_v60 }
 0x866   :  { %v6951_v26 = vsel %vm6747_vm0, %v6935_v11, 0.0 }
 0x867   :  { %6967 = vst [vmem:[#allocation11 + $0x58] sm:$0xff] %v6951_v26 }
 0x869   :  { %v10602_v14 = vpop.eup %10601 }
 0x86a   :  { %v6901_v50 = vmul.f32 0.6931472, %v10602_v14  ;;  %v6871_v30 = vpop.xlane.xlu2 %6870 }
 0x86b   :  { %10603 = vlog2.f32 %v6871_v30 }
 0x86c   :  { %v6936_v44 = vsub.f32 %v6920_v23, %v6901_v50 }
 0x86e   :  { %v6952_v20 = vsel %vm6747_vm0, %v6936_v44, 0.0 }
 0x86f   :  { %6968 = vst [vmem:[#allocation11 + $0x60] sm:$0xff] %v6952_v20 }
 0x871   :  { %v10604_v32 = vpop.eup %10603 }
 0x872   :  { %v6903_v45 = vmul.f32 0.6931472, %v10604_v32  ;;  %v6873_v37 = vpop.xlane.xlu0 %6872 }
 0x873   :  { %10605 = vlog2.f32 %v6873_v37 }
 0x874   :  { %v6937_v33 = vsub.f32 %v6921_v63, %v6903_v45 }
 0x876   :  { %v6953_v8 = vsel %vm6747_vm0, %v6937_v33, 0.0 }
 0x877   :  { %6969 = vst [vmem:[#allocation11 + $0x68] sm:$0xff] %v6953_v8 }
 0x879   :  { %v10606_v38 = vpop.eup %10605 }
 0x87a   :  { %v6905_v53 = vmul.f32 0.6931472, %v10606_v38  ;;  %v6875_v25 = vpop.xlane.xlu1 %6874 }
 0x87b   :  { %10607 = vlog2.f32 %v6875_v25 }
 0x87c   :  { %v6938_v34 = vsub.f32 %v6922_v6, %v6905_v53 }
 0x87e   :  { %v6954_v49 = vsel %vm6747_vm0, %v6938_v34, 0.0 }
 0x87f   :  { %6970 = vst [vmem:[#allocation11 + $0x70] sm:$0xff] %v6954_v49 }
 0x881   :  { %v10608_v51 = vpop.eup %10607 }
 0x882   :  { %v6907_v9 = vmul.f32 0.6931472, %v10608_v51 }
 0x884   :  { %v6939_v31 = vsub.f32 %v6923_v55, %v6907_v9 }
 0x886   :  { %v6955_v41 = vsel %vm6747_vm0, %v6939_v31, 0.0 }
 0x887   :  { %6971 = vst [vmem:[#allocation11 + $0x78] sm:$0xff] %v6955_v41 }
 0x888   :  { %6984 = dma.vmem_to_hbm [thread:$0]  %s6977_s3, 2048, %s6979_s15, [#allocation5], %s10741_s27, %s10741_s27, %s10742_s28  }
 0x889   :  { %10735 = dma.done.wait [#allocation5], 2048  }
 0x88a   :  { %10736 = vsyncadd [#allocation5], 4294965248 }
 0x88b   :  { %6989 = vsyncpa [#allocation4], 1 }
 0x88c   :  { %6990 = vsyncpa [#allocation7], 1 }
 0x88d   :  { %6991 = vsyncpa [#allocation10], 1 }
 0x88e   :  { %6992 = vsyncpa [#allocation5], 1 }

</bundles_post_ra>
